<compile_context>
chip_gen: v6e
topology: v6e:2x2x1
jax: 0.10.0
libtpu: 0.0.40
codegen_flags: <defaults>
</compile_context>

<pallas_src>
import math

import jax
import jax.numpy as jnp
from jax.experimental import pallas as pl
from jax.experimental.pallas import tpu as pltpu

# ----------------------- small synthetic NSP model config -------------------
VOCAB = 100
TYPE_VOCAB = 2
SEQ = 8            # S
HIDDEN = 32        # H
NUM_HEADS = 2
HEAD_DIM = HIDDEN // NUM_HEADS
HD = NUM_HEADS * HEAD_DIM          # concatenated head width
INTER = 64         # FFN intermediate size
LAYERS = 2
NUM_LABELS = 3
BATCH = 2
LN_EPS = 1e-12
INIT_STD = 0.2

N_SEQS = BATCH * NUM_LABELS        # flattened sequences (6)
NS = N_SEQS * SEQ                  # flattened tokens (48)

# embedding-pack row offsets (8-sublane aligned segments inside one table)
POS_OFF = 104
TYPE_OFF = 112
ELN_OFF = 120
EMB_ROWS = 128

# fused QKV column layout: [ Q(HD) | K(HD) | Vext_h0(VEW) | Vext_h1(VEW) ]
# per-head Vext block = [ v (HEAD_DIM) | row-sum "ones" column | zero pad ]
VEW = 24
VOFF = 2 * HD
QKVW = VOFF + NUM_HEADS * VEW      # 112

# packed static-constant tensor (rows x 2*NS lanes)
SB_BIAS = 0                        # rows 0..NS-1   : block-diag bias, tiled x2 heads
SB_SEL = NS                        # rows NS..NS+N-1: [CLS]-row selection matrix
SB_LNSEL = NS + 8                  # rows ..+2H-1   : LayerNorm stats selector (2H, 2)
STAT_ROWS = SB_LNSEL + 2 * HIDDEN  # 120
STAT_COLS = 2 * NS                 # 96

OUT_ROWS = ((N_SEQS + 1 + 7) // 8) * 8   # nsp0 rows + loss row, padded to 8


def init_params(key):
    std = INIT_STD
    ks = jax.random.split(key, 16)
    H, I, L, nh, dh = HIDDEN, INTER, LAYERS, NUM_HEADS, HEAD_DIM
    return {
        "word_emb": jax.random.normal(ks[0], (VOCAB, H), jnp.float32) * std,
        "pos_emb": jax.random.normal(ks[1], (SEQ, H), jnp.float32) * std,
        "type_emb": jax.random.normal(ks[2], (TYPE_VOCAB, H), jnp.float32) * std,
        "emb_ln_g": jnp.ones((1, H), jnp.float32),
        "emb_ln_b": jnp.zeros((1, H), jnp.float32),
        "wq": jax.random.normal(ks[3], (L, nh, H, dh), jnp.float32) * std,
        "bq": jnp.zeros((L, nh, 1, dh), jnp.float32),
        "wk": jax.random.normal(ks[4], (L, nh, H, dh), jnp.float32) * std,
        "bk": jnp.zeros((L, nh, 1, dh), jnp.float32),
        "wv": jax.random.normal(ks[5], (L, nh, H, dh), jnp.float32) * std,
        "bv": jnp.zeros((L, nh, 1, dh), jnp.float32),
        "wo": jax.random.normal(ks[6], (L, nh, dh, H), jnp.float32) * std,
        "bo": jnp.zeros((L, 1, H), jnp.float32),
        "ln1_g": jnp.ones((L, 1, H), jnp.float32),
        "ln1_b": jnp.zeros((L, 1, H), jnp.float32),
        "w1": jax.random.normal(ks[7], (L, H, I), jnp.float32) * std,
        "b1": jnp.zeros((L, 1, I), jnp.float32),
        "w2": jax.random.normal(ks[8], (L, I, H), jnp.float32) * std,
        "b2": jnp.zeros((L, 1, H), jnp.float32),
        "ln2_g": jnp.ones((L, 1, H), jnp.float32),
        "ln2_b": jnp.zeros((L, 1, H), jnp.float32),
        "wp": jax.random.normal(ks[9], (H, H), jnp.float32) * std,
        "bp": jnp.zeros((1, H), jnp.float32),
        "wc": jax.random.normal(ks[10], (H, 2), jnp.float32) * std,
        "bc": jnp.zeros((1, 2), jnp.float32),
    }


def pack_params(p):
    """Pack the 22 raw weights (+ static index constants) into 8 kernel inputs."""
    L, H, I, dh = LAYERS, HIDDEN, INTER, HEAD_DIM

    # -- embedding table: word | pos | type | emb-LN gamma/beta, 128 rows -----
    emb = jnp.zeros((EMB_ROWS, H), jnp.float32)
    emb = emb.at[0:VOCAB].set(p["word_emb"])
    emb = emb.at[POS_OFF:POS_OFF + SEQ].set(p["pos_emb"])
    emb = emb.at[TYPE_OFF:TYPE_OFF + TYPE_VOCAB].set(p["type_emb"])
    emb = emb.at[ELN_OFF].set(p["emb_ln_g"][0])
    emb = emb.at[ELN_OFF + 1].set(p["emb_ln_b"][0])

    # -- fused QKV with per-head V "row-sum" column (weights 0, bias 1) ------
    wq = p["wq"].transpose(0, 2, 1, 3).reshape(L, H, HD)
    wk = p["wk"].transpose(0, 2, 1, 3).reshape(L, H, HD)
    bq = p["bq"].reshape(L, HD)
    bk = p["bk"].reshape(L, HD)
    wqkv = jnp.zeros((L, H + 1, QKVW), jnp.float32)
    wqkv = wqkv.at[:, 0:H, 0:HD].set(wq)
    wqkv = wqkv.at[:, H, 0:HD].set(bq)
    wqkv = wqkv.at[:, 0:H, HD:2 * HD].set(wk)
    wqkv = wqkv.at[:, H, HD:2 * HD].set(bk)
    for h in range(NUM_HEADS):
        c0 = VOFF + h * VEW
        wqkv = wqkv.at[:, 0:H, c0:c0 + dh].set(p["wv"][:, h])
        wqkv = wqkv.at[:, H, c0:c0 + dh].set(p["bv"][:, h, 0])
        wqkv = wqkv.at[:, H, c0 + dh].set(1.0)      # softmax row-sum rides p@v

    wo = p["wo"].reshape(L, HD, H)                  # heads stacked on rows
    lnb = jnp.concatenate([p["bo"], p["b2"], p["ln1_g"], p["ln1_b"],
                           p["ln2_g"], p["ln2_b"]], axis=1)   # (L, 6, H)
    w1 = jnp.concatenate([p["w1"], p["b1"]], axis=1)          # (L, H+1, I)
    w2 = p["w2"]                                              # (L, I, H)

    head = jnp.zeros((H + 1, H + 1), jnp.float32)             # pooler + NSP col 0
    head = head.at[0:H, 0:H].set(p["wp"])
    head = head.at[H, 0:H].set(p["bp"][0])
    head = head.at[0:H, H].set(p["wc"][:, 0])
    head = head.at[H, H].set(p["bc"][0, 0])

    # -- input-independent index constants (built once, off the hot path) ----
    seq_id = jnp.arange(NS, dtype=jnp.int32) // SEQ
    bias1 = jnp.where(seq_id[:, None] == seq_id[None, :], 0.0, -1e9)
    bias2 = jnp.concatenate([bias1, bias1], axis=-1)          # tiled for 2 heads
    sel = (jnp.arange(NS, dtype=jnp.int32)[None, :] ==
           (SEQ * jnp.arange(N_SEQS, dtype=jnp.int32))[:, None]).astype(jnp.float32)
    lnsel = jnp.zeros((2 * H, 2), jnp.float32)
    lnsel = lnsel.at[0:H, 0].set(1.0 / H)                     # -> E[x]
    lnsel = lnsel.at[H:2 * H, 1].set(1.0 / H)                 # -> E[x^2]

    statics = jnp.zeros((STAT_ROWS, STAT_COLS), jnp.float32)
    statics = statics.at[SB_BIAS:SB_BIAS + NS, 0:2 * NS].set(bias2)
    statics = statics.at[SB_SEL:SB_SEL + N_SEQS, 0:NS].set(sel)
    statics = statics.at[SB_LNSEL:SB_LNSEL + 2 * H, 0:2].set(lnsel)

    return {"emb": emb, "wqkv": wqkv, "wo": wo, "lnb": lnb, "w1": w1,
            "w2": w2, "head": head, "statics": statics}


# --------------------------- shared math helpers -----------------------------
def _layernorm(v, g, b):
    """Standard LayerNorm (reference path)."""
    mu = jnp.mean(v, axis=-1, keepdims=True)
    var = jnp.mean(jnp.square(v - mu), axis=-1, keepdims=True)
    return (v - mu) * jax.lax.rsqrt(var + LN_EPS) * g + b


def _layernorm_mm(v, g, b, lnsel):
    """Kernel LayerNorm: E[x], E[x^2] from ONE MXU matmul against a selector."""
    stats = jnp.dot(jnp.concatenate([v, v * v], axis=-1), lnsel,
                    preferred_element_type=jnp.float32)       # (rows, 2)
    mu = stats[:, 0:1]
    var = jnp.maximum(stats[:, 1:2] - mu * mu, 0.0)           # guard cancellation
    return (v - mu) * jax.lax.rsqrt(var + LN_EPS) * g + b


def _gelu(v):
    # TODO(synk): BERT's exact GELU uses erf; tanh approximation used here for
    # robust Mosaic lowering of the transcendental (reference uses the same).
    c = math.sqrt(2.0 / math.pi)
    return 0.5 * v * (1.0 + jnp.tanh(c * (v + 0.044715 * v * v * v)))


# ------------------------------- fused Pallas kernel -------------------------
def _fused_kernel(ints_ref, mask2_ref, labels_ref, statics_ref, emb_ref,
                  wqkv_ref, wo_ref, lnb_ref, w1_ref, w2_ref, head_ref, out_ref):
    H, dh = HIDDEN, HEAD_DIM
    B = labels_ref.shape[0]
    NL = N_SEQS // B
    scale = 1.0 / math.sqrt(HEAD_DIM)
    f32 = jnp.float32

    lnsel = statics_ref[SB_LNSEL:SB_LNSEL + 2 * H, 0:2]                # (2H, 2)

    # ---- embeddings: ONE multi-hot (word+pos+type) selection matmul --------
    # TODO(synk): out-of-range token ids (>= VOCAB) silently map to a zero
    # embedding instead of erroring, unlike a gather.
    col = jax.lax.broadcasted_iota(jnp.int32, (NS, EMB_ROWS), 1)
    mh = ((col == ints_ref[:, 0:1]) |            # word id column
          (col == ints_ref[:, 1:2]) |            # TYPE_OFF + token_type
          (col == ints_ref[:, 2:3])).astype(f32)  # POS_OFF + (t % SEQ)
    x = jnp.dot(mh, emb_ref[...], preferred_element_type=f32)          # (NS, H)
    x = _layernorm_mm(x, emb_ref[ELN_OFF:ELN_OFF + 1],
                      emb_ref[ELN_OFF + 1:ELN_OFF + 2], lnsel)

    # ---- attention bias: static block-diag part + runtime key padding ------
    bias2 = (statics_ref[SB_BIAS:SB_BIAS + NS, 0:2 * NS]
             + jnp.where(mask2_ref[...] > 0, 0.0, -1e9))               # (NS, 2NS)

    for l in range(LAYERS):
        wqkv = wqkv_ref[l]                                             # (H+1, QKVW)
        lnb = lnb_ref[l]                                               # (6, H)
        qkv = (jnp.dot(x, wqkv[0:H], preferred_element_type=f32)
               + wqkv[H:H + 1])                                        # (NS, QKVW)

        # both heads' score matrices, lane-concatenated -> single softmax chain
        s_heads = [
            jax.lax.dot_general(qkv[:, h * dh:(h + 1) * dh],
                                qkv[:, HD + h * dh:HD + (h + 1) * dh],
                                (((1,), (1,)), ((), ())),
                                preferred_element_type=f32)
            for h in range(NUM_HEADS)]
        s2 = jnp.concatenate(s_heads, axis=-1) * scale + bias2         # (NS, 2NS)
        # shared per-row shift (max over both heads): per-head softmax unchanged
        s2 = s2 - jnp.max(s2, axis=-1, keepdims=True)
        p2 = jnp.exp(s2)

        ctx = []
        for h in range(NUM_HEADS):
            vext = qkv[:, VOFF + h * VEW:VOFF + (h + 1) * VEW]         # [v|1|pad]
            ce = jnp.dot(p2[:, h * NS:(h + 1) * NS], vext,
                         preferred_element_type=f32)                   # (NS, VEW)
            # ce[:, dh] is the softmax row-sum (computed on the MXU for free)
            ctx.append(ce[:, 0:dh]
                       * pl.reciprocal(ce[:, dh:dh + 1], approx=True))
        attn = (jnp.dot(jnp.concatenate(ctx, axis=-1), wo_ref[l],
                        preferred_element_type=f32) + lnb[0:1])
        x = _layernorm_mm(x + attn, lnb[2:3], lnb[3:4], lnsel)

        w1 = w1_ref[l]                                                 # (H+1, I)
        h1 = _gelu(jnp.dot(x, w1[0:H], preferred_element_type=f32) + w1[H:H + 1])
        ffn = jnp.dot(h1, w2_ref[l], preferred_element_type=f32) + lnb[1:2]
        x = _layernorm_mm(x + ffn, lnb[4:5], lnb[5:6], lnsel)

    # ---- [CLS] rows via static 0/1 selection matmul -------------------------
    sel = statics_ref[SB_SEL:SB_SEL + N_SEQS, 0:NS]
    cls = jnp.dot(sel, x, preferred_element_type=f32)                  # (N, H)

    hp = head_ref[...]                                                 # (H+1, H+1)
    pooled = jnp.tanh(jnp.dot(cls, hp[0:H, 0:H], preferred_element_type=f32)
                      + hp[H:H + 1, 0:H])
    nsp0 = (jnp.dot(pooled, hp[0:H, H:H + 1], preferred_element_type=f32)
            + hp[H:H + 1, H:H + 1])                                    # (N, 1)

    # ---- fused mean cross-entropy over (B, NUM_LABELS) groups --------------
    loss = jnp.zeros((1, 1), f32)
    for b in range(B):
        grp = nsp0[b * NL:(b + 1) * NL]                                # (NL, 1)
        m = jnp.max(grp, axis=0, keepdims=True)
        lse = jnp.log(jnp.sum(jnp.exp(grp - m), axis=0, keepdims=True)) + m
        onehot = (jax.lax.broadcasted_iota(jnp.int32, (NL, 1), 0)
                  == labels_ref[b]).astype(f32)
        chosen = jnp.sum(grp * onehot, axis=0, keepdims=True)
        loss = loss + (lse - chosen)
    loss = loss * (1.0 / B)

    pad = jnp.zeros((OUT_ROWS - N_SEQS - 1, 1), f32)
    out_ref[...] = jnp.concatenate([nsp0, loss, pad], axis=0)          # one store


# ------------------------------- wrapper -------------------------------------
def prompt_decoder_for_nsp(packed, input_ids, attention_mask, token_type_ids, labels):
    B, NL, S = input_ids.shape
    N = B * NL
    NSl = N * S
    ids = input_ids.reshape(NSl).astype(jnp.int32)          # == .view(-1, S), flattened
    tt = token_type_ids.reshape(NSl).astype(jnp.int32)
    pos = jnp.tile(jnp.arange(S, dtype=jnp.int32), N)
    # coalesced integer input: [id, TYPE_OFF+type, POS_OFF+pos] per token
    ints = jnp.concatenate([ids[:, None], (TYPE_OFF + tt)[:, None],
                            (POS_OFF + pos)[:, None]], axis=1)          # (NS, 3)
    mask1 = attention_mask.reshape(1, NSl).astype(jnp.int32)
    mask2 = jnp.concatenate([mask1, mask1], axis=1)                     # (1, 2*NS)
    lbl = labels.astype(jnp.int32)

    vmem = pl.BlockSpec(memory_space=pltpu.MemorySpace.VMEM)
    smem = pl.BlockSpec(memory_space=pltpu.MemorySpace.SMEM)
    out = pl.pallas_call(
        _fused_kernel,
        out_shape=jax.ShapeDtypeStruct((OUT_ROWS, 1), jnp.float32),
        in_specs=[vmem, vmem, smem] + [vmem] * 8,
        out_specs=vmem,
    )(ints, mask2, lbl, packed["statics"], packed["emb"], packed["wqkv"],
      packed["wo"], packed["lnb"], packed["w1"], packed["w2"], packed["head"])

    cls_logits = out[0:N, 0].reshape(B, NL)      # logits[:, 0].view(-1, num_labels)
    loss = out[N, 0]
    return {"logits": cls_logits, "loss": loss}  # stands in for ModelOutput


# --------------------------- pure-JAX reference (sanity check) ---------------
def _encoder_forward_ref(x, mask, w):
    """x: (N,S,H) summed embeddings, mask: (N,S) float -> NSP logits (N, 2)."""
    N, S, H = x.shape
    scale = 1.0 / math.sqrt(HEAD_DIM)
    bias = ((1.0 - mask) * -1e9)[:, None, :]
    x = _layernorm(x, w["emb_ln_g"], w["emb_ln_b"])
    for l in range(LAYERS):
        x2d = x.reshape(N * S, H)
        attn2d = jnp.zeros((N * S, H), jnp.float32)
        for h in range(NUM_HEADS):
            q = (jnp.dot(x2d, w["wq"][l, h], preferred_element_type=jnp.float32)
                 + w["bq"][l, h]).reshape(N, S, HEAD_DIM)
            k = (jnp.dot(x2d, w["wk"][l, h], preferred_element_type=jnp.float32)
                 + w["bk"][l, h]).reshape(N, S, HEAD_DIM)
            v = (jnp.dot(x2d, w["wv"][l, h], preferred_element_type=jnp.float32)
                 + w["bv"][l, h]).reshape(N, S, HEAD_DIM)
            s = jnp.einsum("nqd,nkd->nqk", q, k,
                           preferred_element_type=jnp.float32) * scale + bias
            s = s - jnp.max(s, axis=-1, keepdims=True)
            p = jnp.exp(s)
            p = p / jnp.sum(p, axis=-1, keepdims=True)
            ctx = jnp.einsum("nqk,nkd->nqd", p, v, preferred_element_type=jnp.float32)
            attn2d = attn2d + jnp.dot(ctx.reshape(N * S, HEAD_DIM), w["wo"][l, h],
                                      preferred_element_type=jnp.float32)
        attn = (attn2d + w["bo"][l]).reshape(N, S, H)
        x = _layernorm(x + attn, w["ln1_g"][l], w["ln1_b"][l])

        x2d = x.reshape(N * S, H)
        h1 = _gelu(jnp.dot(x2d, w["w1"][l], preferred_element_type=jnp.float32)
                   + w["b1"][l])
        ffn = (jnp.dot(h1, w["w2"][l], preferred_element_type=jnp.float32)
               + w["b2"][l]).reshape(N, S, H)
        x = _layernorm(x + ffn, w["ln2_g"][l], w["ln2_b"][l])

    cls = x[:, 0:1, :].reshape(N, H)
    pooled = jnp.tanh(jnp.dot(cls, w["wp"], preferred_element_type=jnp.float32)
                      + w["bp"])
    return jnp.dot(pooled, w["wc"], preferred_element_type=jnp.float32) + w["bc"]


def _ce_forward_ref(cls_logits, onehot):
    m = jnp.max(cls_logits, axis=-1, keepdims=True)
    lse = jnp.log(jnp.sum(jnp.exp(cls_logits - m), axis=-1, keepdims=True)) + m
    nll = -jnp.sum(onehot * (cls_logits - lse), axis=-1, keepdims=True)
    return jnp.mean(nll, axis=0, keepdims=True)


# ---------------------------------- main --------------------------------------
if __name__ == "__main__":
    key = jax.random.PRNGKey(0)
    k_par, k_ids, k_lbl = jax.random.split(key, 3)
    params = init_params(k_par)
    packed = pack_params(params)

    input_ids = jax.random.randint(k_ids, (BATCH, NUM_LABELS, SEQ), 0, VOCAB,
                                   dtype=jnp.int32)
    token_type_ids = jnp.broadcast_to(
        jnp.concatenate([jnp.zeros((SEQ // 2,), jnp.int32),
                         jnp.ones((SEQ - SEQ // 2,), jnp.int32)]),
        (BATCH, NUM_LABELS, SEQ)).astype(jnp.int32)
    attention_mask = jnp.ones((BATCH, NUM_LABELS, SEQ), jnp.int32)
    attention_mask = attention_mask.at[0, 1, 6:].set(0).at[1, 2, 5:].set(0)
    labels = jax.random.randint(k_lbl, (BATCH,), 0, NUM_LABELS, dtype=jnp.int32)

    fwd = jax.jit(prompt_decoder_for_nsp)
    out = fwd(packed, input_ids, attention_mask, token_type_ids, labels)
    jax.block_until_ready(out)

    # Pure-JAX reference with the original per-head / per-sequence math.
    N = BATCH * NUM_LABELS
    ids2 = input_ids.reshape(N, SEQ)
    tt2 = token_type_ids.reshape(N, SEQ)
    maskf = attention_mask.reshape(N, SEQ).astype(jnp.float32)
    x_emb = (params["word_emb"][ids2] + params["pos_emb"][None]
             + params["type_emb"][tt2]).astype(jnp.float32)
    ref_nsp = _encoder_forward_ref(x_emb, maskf, params)
    ref_cls = ref_nsp[:, 0].reshape(BATCH, NUM_LABELS)
    ref_loss = _ce_forward_ref(
        ref_cls, jax.nn.one_hot(labels, NUM_LABELS, dtype=jnp.float32))[0, 0]

    assert out["logits"].shape == (BATCH, NUM_LABELS)
    assert bool(jnp.isfinite(out["loss"]))
    assert jnp.allclose(out["logits"], ref_cls, rtol=5e-3, atol=5e-3)
    assert jnp.allclose(out["loss"], ref_loss, rtol=5e-3, atol=5e-3)

    print("KERNEL_OK")
</pallas_src>

<mosaic_0001>
module attributes {stable_mosaic.version = 11 : i64} {
  func.func @_fused_kernel(%arg0: memref<48x3xi32, #tpu.memory_space<vmem>>, %arg1: memref<1x96xi32, #tpu.memory_space<vmem>>, %arg2: memref<2xi32, #tpu.memory_space<smem>>, %arg3: memref<120x96xf32, #tpu.memory_space<vmem>>, %arg4: memref<128x32xf32, #tpu.memory_space<vmem>>, %arg5: memref<2x33x112xf32, #tpu.memory_space<vmem>>, %arg6: memref<2x32x32xf32, #tpu.memory_space<vmem>>, %arg7: memref<2x6x32xf32, #tpu.memory_space<vmem>>, %arg8: memref<2x33x64xf32, #tpu.memory_space<vmem>>, %arg9: memref<2x64x32xf32, #tpu.memory_space<vmem>>, %arg10: memref<33x33xf32, #tpu.memory_space<vmem>>, %arg11: memref<8x1xf32, #tpu.memory_space<vmem>>) attributes {dimension_semantics = [], scalar_prefetch = 0 : i64, scratch_operands = 0 : i64, tpu.core_type = #tpu.core_type<tc>} {
    %c56 = arith.constant 56 : index
    %c0 = arith.constant 0 : index
    %0 = vector.load %arg3[%c56, %c0] : memref<120x96xf32, #tpu.memory_space<vmem>>, vector<64x2xf32>
    %1 = tpu.iota {dimensions = array<i32: 1>} : vector<48x128xi32>
    %c0_0 = arith.constant 0 : index
    %c0_1 = arith.constant 0 : index
    %2 = vector.load %arg0[%c0_0, %c0_1] : memref<48x3xi32, #tpu.memory_space<vmem>>, vector<48x1xi32>
    %3 = vector.broadcast %2 : vector<48x1xi32> to vector<48x128xi32>
    %4 = arith.cmpi eq, %1, %3 : vector<48x128xi32>
    %c0_2 = arith.constant 0 : index
    %c1 = arith.constant 1 : index
    %5 = vector.load %arg0[%c0_2, %c1] : memref<48x3xi32, #tpu.memory_space<vmem>>, vector<48x1xi32>
    %6 = vector.broadcast %5 : vector<48x1xi32> to vector<48x128xi32>
    %7 = arith.cmpi eq, %1, %6 : vector<48x128xi32>
    %8 = arith.ori %4, %7 : vector<48x128xi1>
    %c0_3 = arith.constant 0 : index
    %c2 = arith.constant 2 : index
    %9 = vector.load %arg0[%c0_3, %c2] : memref<48x3xi32, #tpu.memory_space<vmem>>, vector<48x1xi32>
    %10 = vector.broadcast %9 : vector<48x1xi32> to vector<48x128xi32>
    %11 = arith.cmpi eq, %1, %10 : vector<48x128xi32>
    %12 = arith.ori %8, %11 : vector<48x128xi1>
    %13 = arith.extui %12 : vector<48x128xi1> to vector<48x128xi32>
    %14 = arith.sitofp %13 : vector<48x128xi32> to vector<48x128xf32>
    %c0_4 = arith.constant 0 : index
    %c0_5 = arith.constant 0 : index
    %15 = vector.load %arg4[%c0_4, %c0_5] : memref<128x32xf32, #tpu.memory_space<vmem>>, vector<128x32xf32>
    %cst = arith.constant dense<0.000000e+00> : vector<48x32xf32>
    %16 = tpu.matmul %14, %15, %cst {dimension_numbers = #tpu.dot_dimension_numbers<[1], [0], [0], [1], [0, 0, 1, 1], [], []>} : vector<48x128xf32>, vector<128x32xf32>, vector<48x32xf32> -> vector<48x32xf32>
    %c120 = arith.constant 120 : index
    %c0_6 = arith.constant 0 : index
    %17 = vector.load %arg4[%c120, %c0_6] : memref<128x32xf32, #tpu.memory_space<vmem>>, vector<1x32xf32>
    %c121 = arith.constant 121 : index
    %c0_7 = arith.constant 0 : index
    %18 = vector.load %arg4[%c121, %c0_7] : memref<128x32xf32, #tpu.memory_space<vmem>>, vector<1x32xf32>
    %19 = arith.mulf %16, %16 : vector<48x32xf32>
    %20 = tpu.concatenate %16, %19 in 1 : vector<48x32xf32>, vector<48x32xf32> -> vector<48x64xf32>
    %cst_8 = arith.constant dense<0.000000e+00> : vector<48x2xf32>
    %21 = tpu.matmul %20, %0, %cst_8 {dimension_numbers = #tpu.dot_dimension_numbers<[1], [0], [0], [1], [0, 0, 1, 1], [], []>} : vector<48x64xf32>, vector<64x2xf32>, vector<48x2xf32> -> vector<48x2xf32>
    %22 = vector.extract_strided_slice %21 {offsets = [0, 0], sizes = [48, 1], strides = [1, 1]} : vector<48x2xf32> to vector<48x1xf32>
    %23 = vector.extract_strided_slice %21 {offsets = [0, 1], sizes = [48, 1], strides = [1, 1]} : vector<48x2xf32> to vector<48x1xf32>
    %24 = arith.mulf %22, %22 : vector<48x1xf32>
    %25 = arith.subf %23, %24 : vector<48x1xf32>
    %cst_9 = arith.constant 0.000000e+00 : f32
    %26 = vector.broadcast %cst_9 : f32 to vector<48x1xf32>
    %27 = arith.maximumf %25, %26 : vector<48x1xf32>
    %28 = vector.broadcast %22 : vector<48x1xf32> to vector<48x32xf32>
    %29 = arith.subf %16, %28 : vector<48x32xf32>
    %cst_10 = arith.constant 9.99999996E-13 : f32
    %30 = vector.broadcast %cst_10 : f32 to vector<48x1xf32>
    %31 = arith.addf %27, %30 : vector<48x1xf32>
    %32 = math.rsqrt %31 : vector<48x1xf32>
    %33 = vector.broadcast %32 : vector<48x1xf32> to vector<48x32xf32>
    %34 = arith.mulf %29, %33 : vector<48x32xf32>
    %35 = vector.broadcast %17 : vector<1x32xf32> to vector<48x32xf32>
    %36 = arith.mulf %34, %35 : vector<48x32xf32>
    %37 = vector.broadcast %18 : vector<1x32xf32> to vector<48x32xf32>
    %38 = arith.addf %36, %37 : vector<48x32xf32>
    %c0_11 = arith.constant 0 : index
    %c0_12 = arith.constant 0 : index
    %39 = vector.load %arg3[%c0_11, %c0_12] : memref<120x96xf32, #tpu.memory_space<vmem>>, vector<48x96xf32>
    %c0_13 = arith.constant 0 : index
    %c0_14 = arith.constant 0 : index
    %40 = vector.load %arg1[%c0_13, %c0_14] : memref<1x96xi32, #tpu.memory_space<vmem>>, vector<1x96xi32>
    %c0_i32 = arith.constant 0 : i32
    %41 = vector.broadcast %c0_i32 : i32 to vector<1x96xi32>
    %42 = arith.cmpi sgt, %40, %41 : vector<1x96xi32>
    %cst_15 = arith.constant 0.000000e+00 : f32
    %cst_16 = arith.constant -1.000000e+09 : f32
    %43 = vector.broadcast %cst_15 : f32 to vector<1x96xf32>
    %44 = vector.broadcast %cst_16 : f32 to vector<1x96xf32>
    %45 = arith.select %42, %43, %44 : vector<1x96xi1>, vector<1x96xf32>
    %46 = vector.broadcast %45 : vector<1x96xf32> to vector<48x96xf32>
    %47 = arith.addf %39, %46 : vector<48x96xf32>
    %c0_17 = arith.constant 0 : index
    %c0_18 = arith.constant 0 : index
    %c0_19 = arith.constant 0 : index
    %48 = vector.load %arg5[%c0_17, %c0_18, %c0_19] : memref<2x33x112xf32, #tpu.memory_space<vmem>>, vector<1x33x112xf32>
    %49 = vector.shape_cast %48 : vector<1x33x112xf32> to vector<33x112xf32>
    %c0_20 = arith.constant 0 : index
    %c0_21 = arith.constant 0 : index
    %c0_22 = arith.constant 0 : index
    %50 = vector.load %arg7[%c0_20, %c0_21, %c0_22] : memref<2x6x32xf32, #tpu.memory_space<vmem>>, vector<1x6x32xf32>
    %51 = vector.shape_cast %50 : vector<1x6x32xf32> to vector<6x32xf32>
    %52 = vector.extract_strided_slice %49 {offsets = [0, 0], sizes = [32, 112], strides = [1, 1]} : vector<33x112xf32> to vector<32x112xf32>
    %cst_23 = arith.constant dense<0.000000e+00> : vector<48x112xf32>
    %53 = tpu.matmul %38, %52, %cst_23 {dimension_numbers = #tpu.dot_dimension_numbers<[1], [0], [0], [1], [0, 0, 1, 1], [], []>} : vector<48x32xf32>, vector<32x112xf32>, vector<48x112xf32> -> vector<48x112xf32>
    %54 = vector.extract_strided_slice %49 {offsets = [32, 0], sizes = [1, 112], strides = [1, 1]} : vector<33x112xf32> to vector<1x112xf32>
    %55 = vector.broadcast %54 : vector<1x112xf32> to vector<48x112xf32>
    %56 = arith.addf %53, %55 : vector<48x112xf32>
    %57 = vector.extract_strided_slice %56 {offsets = [0, 0], sizes = [48, 16], strides = [1, 1]} : vector<48x112xf32> to vector<48x16xf32>
    %58 = vector.extract_strided_slice %56 {offsets = [0, 32], sizes = [48, 16], strides = [1, 1]} : vector<48x112xf32> to vector<48x16xf32>
    %cst_24 = arith.constant dense<0.000000e+00> : vector<48x48xf32>
    %59 = tpu.matmul %57, %58, %cst_24 {dimension_numbers = #tpu.dot_dimension_numbers<[1], [1], [0], [0], [0, 0, 1, 0], [], []>} : vector<48x16xf32>, vector<48x16xf32>, vector<48x48xf32> -> vector<48x48xf32>
    %60 = vector.extract_strided_slice %56 {offsets = [0, 16], sizes = [48, 16], strides = [1, 1]} : vector<48x112xf32> to vector<48x16xf32>
    %61 = vector.extract_strided_slice %56 {offsets = [0, 48], sizes = [48, 16], strides = [1, 1]} : vector<48x112xf32> to vector<48x16xf32>
    %cst_25 = arith.constant dense<0.000000e+00> : vector<48x48xf32>
    %62 = tpu.matmul %60, %61, %cst_25 {dimension_numbers = #tpu.dot_dimension_numbers<[1], [1], [0], [0], [0, 0, 1, 0], [], []>} : vector<48x16xf32>, vector<48x16xf32>, vector<48x48xf32> -> vector<48x48xf32>
    %63 = tpu.concatenate %59, %62 in 1 : vector<48x48xf32>, vector<48x48xf32> -> vector<48x96xf32>
    %cst_26 = arith.constant 2.500000e-01 : f32
    %64 = vector.broadcast %cst_26 : f32 to vector<48x96xf32>
    %65 = arith.mulf %63, %64 : vector<48x96xf32>
    %66 = arith.addf %65, %47 : vector<48x96xf32>
    %cst_27 = arith.constant dense<0xFF800000> : vector<48xf32>
    %67 = vector.multi_reduction <maximumf>, %66, %cst_27 [1] : vector<48x96xf32> to vector<48xf32>
    %68 = vector.shape_cast %67 : vector<48xf32> to vector<48x1xf32>
    %69 = vector.broadcast %68 : vector<48x1xf32> to vector<48x96xf32>
    %70 = arith.subf %66, %69 : vector<48x96xf32>
    %71 = math.exp %70 : vector<48x96xf32>
    %72 = vector.extract_strided_slice %56 {offsets = [0, 64], sizes = [48, 24], strides = [1, 1]} : vector<48x112xf32> to vector<48x24xf32>
    %73 = vector.extract_strided_slice %71 {offsets = [0, 0], sizes = [48, 48], strides = [1, 1]} : vector<48x96xf32> to vector<48x48xf32>
    %cst_28 = arith.constant dense<0.000000e+00> : vector<48x24xf32>
    %74 = tpu.matmul %73, %72, %cst_28 {dimension_numbers = #tpu.dot_dimension_numbers<[1], [0], [0], [1], [0, 0, 1, 1], [], []>} : vector<48x48xf32>, vector<48x24xf32>, vector<48x24xf32> -> vector<48x24xf32>
    %75 = vector.extract_strided_slice %74 {offsets = [0, 0], sizes = [48, 16], strides = [1, 1]} : vector<48x24xf32> to vector<48x16xf32>
    %76 = vector.extract_strided_slice %74 {offsets = [0, 16], sizes = [48, 1], strides = [1, 1]} : vector<48x24xf32> to vector<48x1xf32>
    %77 = tpu.reciprocal %76 {approx = true} : vector<48x1xf32> -> vector<48x1xf32>
    %78 = vector.broadcast %77 : vector<48x1xf32> to vector<48x16xf32>
    %79 = arith.mulf %75, %78 : vector<48x16xf32>
    %80 = vector.extract_strided_slice %56 {offsets = [0, 88], sizes = [48, 24], strides = [1, 1]} : vector<48x112xf32> to vector<48x24xf32>
    %81 = vector.extract_strided_slice %71 {offsets = [0, 48], sizes = [48, 48], strides = [1, 1]} : vector<48x96xf32> to vector<48x48xf32>
    %cst_29 = arith.constant dense<0.000000e+00> : vector<48x24xf32>
    %82 = tpu.matmul %81, %80, %cst_29 {dimension_numbers = #tpu.dot_dimension_numbers<[1], [0], [0], [1], [0, 0, 1, 1], [], []>} : vector<48x48xf32>, vector<48x24xf32>, vector<48x24xf32> -> vector<48x24xf32>
    %83 = vector.extract_strided_slice %82 {offsets = [0, 0], sizes = [48, 16], strides = [1, 1]} : vector<48x24xf32> to vector<48x16xf32>
    %84 = vector.extract_strided_slice %82 {offsets = [0, 16], sizes = [48, 1], strides = [1, 1]} : vector<48x24xf32> to vector<48x1xf32>
    %85 = tpu.reciprocal %84 {approx = true} : vector<48x1xf32> -> vector<48x1xf32>
    %86 = vector.broadcast %85 : vector<48x1xf32> to vector<48x16xf32>
    %87 = arith.mulf %83, %86 : vector<48x16xf32>
    %88 = tpu.concatenate %79, %87 in 1 : vector<48x16xf32>, vector<48x16xf32> -> vector<48x32xf32>
    %c0_30 = arith.constant 0 : index
    %c0_31 = arith.constant 0 : index
    %c0_32 = arith.constant 0 : index
    %89 = vector.load %arg6[%c0_30, %c0_31, %c0_32] : memref<2x32x32xf32, #tpu.memory_space<vmem>>, vector<1x32x32xf32>
    %90 = vector.shape_cast %89 : vector<1x32x32xf32> to vector<32x32xf32>
    %cst_33 = arith.constant dense<0.000000e+00> : vector<48x32xf32>
    %91 = tpu.matmul %88, %90, %cst_33 {dimension_numbers = #tpu.dot_dimension_numbers<[1], [0], [0], [1], [0, 0, 1, 1], [], []>} : vector<48x32xf32>, vector<32x32xf32>, vector<48x32xf32> -> vector<48x32xf32>
    %92 = vector.extract_strided_slice %51 {offsets = [0, 0], sizes = [1, 32], strides = [1, 1]} : vector<6x32xf32> to vector<1x32xf32>
    %93 = vector.broadcast %92 : vector<1x32xf32> to vector<48x32xf32>
    %94 = arith.addf %91, %93 : vector<48x32xf32>
    %95 = arith.addf %38, %94 : vector<48x32xf32>
    %96 = vector.extract_strided_slice %51 {offsets = [2, 0], sizes = [1, 32], strides = [1, 1]} : vector<6x32xf32> to vector<1x32xf32>
    %97 = vector.extract_strided_slice %51 {offsets = [3, 0], sizes = [1, 32], strides = [1, 1]} : vector<6x32xf32> to vector<1x32xf32>
    %98 = arith.mulf %95, %95 : vector<48x32xf32>
    %99 = tpu.concatenate %95, %98 in 1 : vector<48x32xf32>, vector<48x32xf32> -> vector<48x64xf32>
    %cst_34 = arith.constant dense<0.000000e+00> : vector<48x2xf32>
    %100 = tpu.matmul %99, %0, %cst_34 {dimension_numbers = #tpu.dot_dimension_numbers<[1], [0], [0], [1], [0, 0, 1, 1], [], []>} : vector<48x64xf32>, vector<64x2xf32>, vector<48x2xf32> -> vector<48x2xf32>
    %101 = vector.extract_strided_slice %100 {offsets = [0, 0], sizes = [48, 1], strides = [1, 1]} : vector<48x2xf32> to vector<48x1xf32>
    %102 = vector.extract_strided_slice %100 {offsets = [0, 1], sizes = [48, 1], strides = [1, 1]} : vector<48x2xf32> to vector<48x1xf32>
    %103 = arith.mulf %101, %101 : vector<48x1xf32>
    %104 = arith.subf %102, %103 : vector<48x1xf32>
    %cst_35 = arith.constant 0.000000e+00 : f32
    %105 = vector.broadcast %cst_35 : f32 to vector<48x1xf32>
    %106 = arith.maximumf %104, %105 : vector<48x1xf32>
    %107 = vector.broadcast %101 : vector<48x1xf32> to vector<48x32xf32>
    %108 = arith.subf %95, %107 : vector<48x32xf32>
    %cst_36 = arith.constant 9.99999996E-13 : f32
    %109 = vector.broadcast %cst_36 : f32 to vector<48x1xf32>
    %110 = arith.addf %106, %109 : vector<48x1xf32>
    %111 = math.rsqrt %110 : vector<48x1xf32>
    %112 = vector.broadcast %111 : vector<48x1xf32> to vector<48x32xf32>
    %113 = arith.mulf %108, %112 : vector<48x32xf32>
    %114 = vector.broadcast %96 : vector<1x32xf32> to vector<48x32xf32>
    %115 = arith.mulf %113, %114 : vector<48x32xf32>
    %116 = vector.broadcast %97 : vector<1x32xf32> to vector<48x32xf32>
    %117 = arith.addf %115, %116 : vector<48x32xf32>
    %c0_37 = arith.constant 0 : index
    %c0_38 = arith.constant 0 : index
    %c0_39 = arith.constant 0 : index
    %118 = vector.load %arg8[%c0_37, %c0_38, %c0_39] : memref<2x33x64xf32, #tpu.memory_space<vmem>>, vector<1x33x64xf32>
    %119 = vector.shape_cast %118 : vector<1x33x64xf32> to vector<33x64xf32>
    %120 = vector.extract_strided_slice %119 {offsets = [0, 0], sizes = [32, 64], strides = [1, 1]} : vector<33x64xf32> to vector<32x64xf32>
    %cst_40 = arith.constant dense<0.000000e+00> : vector<48x64xf32>
    %121 = tpu.matmul %117, %120, %cst_40 {dimension_numbers = #tpu.dot_dimension_numbers<[1], [0], [0], [1], [0, 0, 1, 1], [], []>} : vector<48x32xf32>, vector<32x64xf32>, vector<48x64xf32> -> vector<48x64xf32>
    %122 = vector.extract_strided_slice %119 {offsets = [32, 0], sizes = [1, 64], strides = [1, 1]} : vector<33x64xf32> to vector<1x64xf32>
    %123 = vector.broadcast %122 : vector<1x64xf32> to vector<48x64xf32>
    %124 = arith.addf %121, %123 : vector<48x64xf32>
    %cst_41 = arith.constant 5.000000e-01 : f32
    %125 = vector.broadcast %cst_41 : f32 to vector<48x64xf32>
    %126 = arith.mulf %125, %124 : vector<48x64xf32>
    %cst_42 = arith.constant 4.471500e-02 : f32
    %127 = vector.broadcast %cst_42 : f32 to vector<48x64xf32>
    %128 = arith.mulf %127, %124 : vector<48x64xf32>
    %129 = arith.mulf %128, %124 : vector<48x64xf32>
    %130 = arith.mulf %129, %124 : vector<48x64xf32>
    %131 = arith.addf %124, %130 : vector<48x64xf32>
    %cst_43 = arith.constant 0.797884583 : f32
    %132 = vector.broadcast %cst_43 : f32 to vector<48x64xf32>
    %133 = arith.mulf %132, %131 : vector<48x64xf32>
    %134 = math.tanh %133 : vector<48x64xf32>
    %cst_44 = arith.constant 1.000000e+00 : f32
    %135 = vector.broadcast %cst_44 : f32 to vector<48x64xf32>
    %136 = arith.addf %135, %134 : vector<48x64xf32>
    %137 = arith.mulf %126, %136 : vector<48x64xf32>
    %c0_45 = arith.constant 0 : index
    %c0_46 = arith.constant 0 : index
    %c0_47 = arith.constant 0 : index
    %138 = vector.load %arg9[%c0_45, %c0_46, %c0_47] : memref<2x64x32xf32, #tpu.memory_space<vmem>>, vector<1x64x32xf32>
    %139 = vector.shape_cast %138 : vector<1x64x32xf32> to vector<64x32xf32>
    %cst_48 = arith.constant dense<0.000000e+00> : vector<48x32xf32>
    %140 = tpu.matmul %137, %139, %cst_48 {dimension_numbers = #tpu.dot_dimension_numbers<[1], [0], [0], [1], [0, 0, 1, 1], [], []>} : vector<48x64xf32>, vector<64x32xf32>, vector<48x32xf32> -> vector<48x32xf32>
    %141 = vector.extract_strided_slice %51 {offsets = [1, 0], sizes = [1, 32], strides = [1, 1]} : vector<6x32xf32> to vector<1x32xf32>
    %142 = vector.broadcast %141 : vector<1x32xf32> to vector<48x32xf32>
    %143 = arith.addf %140, %142 : vector<48x32xf32>
    %144 = arith.addf %117, %143 : vector<48x32xf32>
    %145 = vector.extract_strided_slice %51 {offsets = [4, 0], sizes = [1, 32], strides = [1, 1]} : vector<6x32xf32> to vector<1x32xf32>
    %146 = vector.extract_strided_slice %51 {offsets = [5, 0], sizes = [1, 32], strides = [1, 1]} : vector<6x32xf32> to vector<1x32xf32>
    %147 = arith.mulf %144, %144 : vector<48x32xf32>
    %148 = tpu.concatenate %144, %147 in 1 : vector<48x32xf32>, vector<48x32xf32> -> vector<48x64xf32>
    %cst_49 = arith.constant dense<0.000000e+00> : vector<48x2xf32>
    %149 = tpu.matmul %148, %0, %cst_49 {dimension_numbers = #tpu.dot_dimension_numbers<[1], [0], [0], [1], [0, 0, 1, 1], [], []>} : vector<48x64xf32>, vector<64x2xf32>, vector<48x2xf32> -> vector<48x2xf32>
    %150 = vector.extract_strided_slice %149 {offsets = [0, 0], sizes = [48, 1], strides = [1, 1]} : vector<48x2xf32> to vector<48x1xf32>
    %151 = vector.extract_strided_slice %149 {offsets = [0, 1], sizes = [48, 1], strides = [1, 1]} : vector<48x2xf32> to vector<48x1xf32>
    %152 = arith.mulf %150, %150 : vector<48x1xf32>
    %153 = arith.subf %151, %152 : vector<48x1xf32>
    %cst_50 = arith.constant 0.000000e+00 : f32
    %154 = vector.broadcast %cst_50 : f32 to vector<48x1xf32>
    %155 = arith.maximumf %153, %154 : vector<48x1xf32>
    %156 = vector.broadcast %150 : vector<48x1xf32> to vector<48x32xf32>
    %157 = arith.subf %144, %156 : vector<48x32xf32>
    %cst_51 = arith.constant 9.99999996E-13 : f32
    %158 = vector.broadcast %cst_51 : f32 to vector<48x1xf32>
    %159 = arith.addf %155, %158 : vector<48x1xf32>
    %160 = math.rsqrt %159 : vector<48x1xf32>
    %161 = vector.broadcast %160 : vector<48x1xf32> to vector<48x32xf32>
    %162 = arith.mulf %157, %161 : vector<48x32xf32>
    %163 = vector.broadcast %145 : vector<1x32xf32> to vector<48x32xf32>
    %164 = arith.mulf %162, %163 : vector<48x32xf32>
    %165 = vector.broadcast %146 : vector<1x32xf32> to vector<48x32xf32>
    %166 = arith.addf %164, %165 : vector<48x32xf32>
    %c1_52 = arith.constant 1 : index
    %c0_53 = arith.constant 0 : index
    %c0_54 = arith.constant 0 : index
    %167 = vector.load %arg5[%c1_52, %c0_53, %c0_54] : memref<2x33x112xf32, #tpu.memory_space<vmem>>, vector<1x33x112xf32>
    %168 = vector.shape_cast %167 : vector<1x33x112xf32> to vector<33x112xf32>
    %c1_55 = arith.constant 1 : index
    %c0_56 = arith.constant 0 : index
    %c0_57 = arith.constant 0 : index
    %169 = vector.load %arg7[%c1_55, %c0_56, %c0_57] : memref<2x6x32xf32, #tpu.memory_space<vmem>>, vector<1x6x32xf32>
    %170 = vector.shape_cast %169 : vector<1x6x32xf32> to vector<6x32xf32>
    %171 = vector.extract_strided_slice %168 {offsets = [0, 0], sizes = [32, 112], strides = [1, 1]} : vector<33x112xf32> to vector<32x112xf32>
    %cst_58 = arith.constant dense<0.000000e+00> : vector<48x112xf32>
    %172 = tpu.matmul %166, %171, %cst_58 {dimension_numbers = #tpu.dot_dimension_numbers<[1], [0], [0], [1], [0, 0, 1, 1], [], []>} : vector<48x32xf32>, vector<32x112xf32>, vector<48x112xf32> -> vector<48x112xf32>
    %173 = vector.extract_strided_slice %168 {offsets = [32, 0], sizes = [1, 112], strides = [1, 1]} : vector<33x112xf32> to vector<1x112xf32>
    %174 = vector.broadcast %173 : vector<1x112xf32> to vector<48x112xf32>
    %175 = arith.addf %172, %174 : vector<48x112xf32>
    %176 = vector.extract_strided_slice %175 {offsets = [0, 0], sizes = [48, 16], strides = [1, 1]} : vector<48x112xf32> to vector<48x16xf32>
    %177 = vector.extract_strided_slice %175 {offsets = [0, 32], sizes = [48, 16], strides = [1, 1]} : vector<48x112xf32> to vector<48x16xf32>
    %cst_59 = arith.constant dense<0.000000e+00> : vector<48x48xf32>
    %178 = tpu.matmul %176, %177, %cst_59 {dimension_numbers = #tpu.dot_dimension_numbers<[1], [1], [0], [0], [0, 0, 1, 0], [], []>} : vector<48x16xf32>, vector<48x16xf32>, vector<48x48xf32> -> vector<48x48xf32>
    %179 = vector.extract_strided_slice %175 {offsets = [0, 16], sizes = [48, 16], strides = [1, 1]} : vector<48x112xf32> to vector<48x16xf32>
    %180 = vector.extract_strided_slice %175 {offsets = [0, 48], sizes = [48, 16], strides = [1, 1]} : vector<48x112xf32> to vector<48x16xf32>
    %cst_60 = arith.constant dense<0.000000e+00> : vector<48x48xf32>
    %181 = tpu.matmul %179, %180, %cst_60 {dimension_numbers = #tpu.dot_dimension_numbers<[1], [1], [0], [0], [0, 0, 1, 0], [], []>} : vector<48x16xf32>, vector<48x16xf32>, vector<48x48xf32> -> vector<48x48xf32>
    %182 = tpu.concatenate %178, %181 in 1 : vector<48x48xf32>, vector<48x48xf32> -> vector<48x96xf32>
    %cst_61 = arith.constant 2.500000e-01 : f32
    %183 = vector.broadcast %cst_61 : f32 to vector<48x96xf32>
    %184 = arith.mulf %182, %183 : vector<48x96xf32>
    %185 = arith.addf %184, %47 : vector<48x96xf32>
    %cst_62 = arith.constant dense<0xFF800000> : vector<48xf32>
    %186 = vector.multi_reduction <maximumf>, %185, %cst_62 [1] : vector<48x96xf32> to vector<48xf32>
    %187 = vector.shape_cast %186 : vector<48xf32> to vector<48x1xf32>
    %188 = vector.broadcast %187 : vector<48x1xf32> to vector<48x96xf32>
    %189 = arith.subf %185, %188 : vector<48x96xf32>
    %190 = math.exp %189 : vector<48x96xf32>
    %191 = vector.extract_strided_slice %175 {offsets = [0, 64], sizes = [48, 24], strides = [1, 1]} : vector<48x112xf32> to vector<48x24xf32>
    %192 = vector.extract_strided_slice %190 {offsets = [0, 0], sizes = [48, 48], strides = [1, 1]} : vector<48x96xf32> to vector<48x48xf32>
    %cst_63 = arith.constant dense<0.000000e+00> : vector<48x24xf32>
    %193 = tpu.matmul %192, %191, %cst_63 {dimension_numbers = #tpu.dot_dimension_numbers<[1], [0], [0], [1], [0, 0, 1, 1], [], []>} : vector<48x48xf32>, vector<48x24xf32>, vector<48x24xf32> -> vector<48x24xf32>
    %194 = vector.extract_strided_slice %193 {offsets = [0, 0], sizes = [48, 16], strides = [1, 1]} : vector<48x24xf32> to vector<48x16xf32>
    %195 = vector.extract_strided_slice %193 {offsets = [0, 16], sizes = [48, 1], strides = [1, 1]} : vector<48x24xf32> to vector<48x1xf32>
    %196 = tpu.reciprocal %195 {approx = true} : vector<48x1xf32> -> vector<48x1xf32>
    %197 = vector.broadcast %196 : vector<48x1xf32> to vector<48x16xf32>
    %198 = arith.mulf %194, %197 : vector<48x16xf32>
    %199 = vector.extract_strided_slice %175 {offsets = [0, 88], sizes = [48, 24], strides = [1, 1]} : vector<48x112xf32> to vector<48x24xf32>
    %200 = vector.extract_strided_slice %190 {offsets = [0, 48], sizes = [48, 48], strides = [1, 1]} : vector<48x96xf32> to vector<48x48xf32>
    %cst_64 = arith.constant dense<0.000000e+00> : vector<48x24xf32>
    %201 = tpu.matmul %200, %199, %cst_64 {dimension_numbers = #tpu.dot_dimension_numbers<[1], [0], [0], [1], [0, 0, 1, 1], [], []>} : vector<48x48xf32>, vector<48x24xf32>, vector<48x24xf32> -> vector<48x24xf32>
    %202 = vector.extract_strided_slice %201 {offsets = [0, 0], sizes = [48, 16], strides = [1, 1]} : vector<48x24xf32> to vector<48x16xf32>
    %203 = vector.extract_strided_slice %201 {offsets = [0, 16], sizes = [48, 1], strides = [1, 1]} : vector<48x24xf32> to vector<48x1xf32>
    %204 = tpu.reciprocal %203 {approx = true} : vector<48x1xf32> -> vector<48x1xf32>
    %205 = vector.broadcast %204 : vector<48x1xf32> to vector<48x16xf32>
    %206 = arith.mulf %202, %205 : vector<48x16xf32>
    %207 = tpu.concatenate %198, %206 in 1 : vector<48x16xf32>, vector<48x16xf32> -> vector<48x32xf32>
    %c1_65 = arith.constant 1 : index
    %c0_66 = arith.constant 0 : index
    %c0_67 = arith.constant 0 : index
    %208 = vector.load %arg6[%c1_65, %c0_66, %c0_67] : memref<2x32x32xf32, #tpu.memory_space<vmem>>, vector<1x32x32xf32>
    %209 = vector.shape_cast %208 : vector<1x32x32xf32> to vector<32x32xf32>
    %cst_68 = arith.constant dense<0.000000e+00> : vector<48x32xf32>
    %210 = tpu.matmul %207, %209, %cst_68 {dimension_numbers = #tpu.dot_dimension_numbers<[1], [0], [0], [1], [0, 0, 1, 1], [], []>} : vector<48x32xf32>, vector<32x32xf32>, vector<48x32xf32> -> vector<48x32xf32>
    %211 = vector.extract_strided_slice %170 {offsets = [0, 0], sizes = [1, 32], strides = [1, 1]} : vector<6x32xf32> to vector<1x32xf32>
    %212 = vector.broadcast %211 : vector<1x32xf32> to vector<48x32xf32>
    %213 = arith.addf %210, %212 : vector<48x32xf32>
    %214 = arith.addf %166, %213 : vector<48x32xf32>
    %215 = vector.extract_strided_slice %170 {offsets = [2, 0], sizes = [1, 32], strides = [1, 1]} : vector<6x32xf32> to vector<1x32xf32>
    %216 = vector.extract_strided_slice %170 {offsets = [3, 0], sizes = [1, 32], strides = [1, 1]} : vector<6x32xf32> to vector<1x32xf32>
    %217 = arith.mulf %214, %214 : vector<48x32xf32>
    %218 = tpu.concatenate %214, %217 in 1 : vector<48x32xf32>, vector<48x32xf32> -> vector<48x64xf32>
    %cst_69 = arith.constant dense<0.000000e+00> : vector<48x2xf32>
    %219 = tpu.matmul %218, %0, %cst_69 {dimension_numbers = #tpu.dot_dimension_numbers<[1], [0], [0], [1], [0, 0, 1, 1], [], []>} : vector<48x64xf32>, vector<64x2xf32>, vector<48x2xf32> -> vector<48x2xf32>
    %220 = vector.extract_strided_slice %219 {offsets = [0, 0], sizes = [48, 1], strides = [1, 1]} : vector<48x2xf32> to vector<48x1xf32>
    %221 = vector.extract_strided_slice %219 {offsets = [0, 1], sizes = [48, 1], strides = [1, 1]} : vector<48x2xf32> to vector<48x1xf32>
    %222 = arith.mulf %220, %220 : vector<48x1xf32>
    %223 = arith.subf %221, %222 : vector<48x1xf32>
    %cst_70 = arith.constant 0.000000e+00 : f32
    %224 = vector.broadcast %cst_70 : f32 to vector<48x1xf32>
    %225 = arith.maximumf %223, %224 : vector<48x1xf32>
    %226 = vector.broadcast %220 : vector<48x1xf32> to vector<48x32xf32>
    %227 = arith.subf %214, %226 : vector<48x32xf32>
    %cst_71 = arith.constant 9.99999996E-13 : f32
    %228 = vector.broadcast %cst_71 : f32 to vector<48x1xf32>
    %229 = arith.addf %225, %228 : vector<48x1xf32>
    %230 = math.rsqrt %229 : vector<48x1xf32>
    %231 = vector.broadcast %230 : vector<48x1xf32> to vector<48x32xf32>
    %232 = arith.mulf %227, %231 : vector<48x32xf32>
    %233 = vector.broadcast %215 : vector<1x32xf32> to vector<48x32xf32>
    %234 = arith.mulf %232, %233 : vector<48x32xf32>
    %235 = vector.broadcast %216 : vector<1x32xf32> to vector<48x32xf32>
    %236 = arith.addf %234, %235 : vector<48x32xf32>
    %c1_72 = arith.constant 1 : index
    %c0_73 = arith.constant 0 : index
    %c0_74 = arith.constant 0 : index
    %237 = vector.load %arg8[%c1_72, %c0_73, %c0_74] : memref<2x33x64xf32, #tpu.memory_space<vmem>>, vector<1x33x64xf32>
    %238 = vector.shape_cast %237 : vector<1x33x64xf32> to vector<33x64xf32>
    %239 = vector.extract_strided_slice %238 {offsets = [0, 0], sizes = [32, 64], strides = [1, 1]} : vector<33x64xf32> to vector<32x64xf32>
    %cst_75 = arith.constant dense<0.000000e+00> : vector<48x64xf32>
    %240 = tpu.matmul %236, %239, %cst_75 {dimension_numbers = #tpu.dot_dimension_numbers<[1], [0], [0], [1], [0, 0, 1, 1], [], []>} : vector<48x32xf32>, vector<32x64xf32>, vector<48x64xf32> -> vector<48x64xf32>
    %241 = vector.extract_strided_slice %238 {offsets = [32, 0], sizes = [1, 64], strides = [1, 1]} : vector<33x64xf32> to vector<1x64xf32>
    %242 = vector.broadcast %241 : vector<1x64xf32> to vector<48x64xf32>
    %243 = arith.addf %240, %242 : vector<48x64xf32>
    %cst_76 = arith.constant 5.000000e-01 : f32
    %244 = vector.broadcast %cst_76 : f32 to vector<48x64xf32>
    %245 = arith.mulf %244, %243 : vector<48x64xf32>
    %cst_77 = arith.constant 4.471500e-02 : f32
    %246 = vector.broadcast %cst_77 : f32 to vector<48x64xf32>
    %247 = arith.mulf %246, %243 : vector<48x64xf32>
    %248 = arith.mulf %247, %243 : vector<48x64xf32>
    %249 = arith.mulf %248, %243 : vector<48x64xf32>
    %250 = arith.addf %243, %249 : vector<48x64xf32>
    %cst_78 = arith.constant 0.797884583 : f32
    %251 = vector.broadcast %cst_78 : f32 to vector<48x64xf32>
    %252 = arith.mulf %251, %250 : vector<48x64xf32>
    %253 = math.tanh %252 : vector<48x64xf32>
    %cst_79 = arith.constant 1.000000e+00 : f32
    %254 = vector.broadcast %cst_79 : f32 to vector<48x64xf32>
    %255 = arith.addf %254, %253 : vector<48x64xf32>
    %256 = arith.mulf %245, %255 : vector<48x64xf32>
    %c1_80 = arith.constant 1 : index
    %c0_81 = arith.constant 0 : index
    %c0_82 = arith.constant 0 : index
    %257 = vector.load %arg9[%c1_80, %c0_81, %c0_82] : memref<2x64x32xf32, #tpu.memory_space<vmem>>, vector<1x64x32xf32>
    %258 = vector.shape_cast %257 : vector<1x64x32xf32> to vector<64x32xf32>
    %cst_83 = arith.constant dense<0.000000e+00> : vector<48x32xf32>
    %259 = tpu.matmul %256, %258, %cst_83 {dimension_numbers = #tpu.dot_dimension_numbers<[1], [0], [0], [1], [0, 0, 1, 1], [], []>} : vector<48x64xf32>, vector<64x32xf32>, vector<48x32xf32> -> vector<48x32xf32>
    %260 = vector.extract_strided_slice %170 {offsets = [1, 0], sizes = [1, 32], strides = [1, 1]} : vector<6x32xf32> to vector<1x32xf32>
    %261 = vector.broadcast %260 : vector<1x32xf32> to vector<48x32xf32>
    %262 = arith.addf %259, %261 : vector<48x32xf32>
    %263 = arith.addf %236, %262 : vector<48x32xf32>
    %264 = vector.extract_strided_slice %170 {offsets = [4, 0], sizes = [1, 32], strides = [1, 1]} : vector<6x32xf32> to vector<1x32xf32>
    %265 = vector.extract_strided_slice %170 {offsets = [5, 0], sizes = [1, 32], strides = [1, 1]} : vector<6x32xf32> to vector<1x32xf32>
    %266 = arith.mulf %263, %263 : vector<48x32xf32>
    %267 = tpu.concatenate %263, %266 in 1 : vector<48x32xf32>, vector<48x32xf32> -> vector<48x64xf32>
    %cst_84 = arith.constant dense<0.000000e+00> : vector<48x2xf32>
    %268 = tpu.matmul %267, %0, %cst_84 {dimension_numbers = #tpu.dot_dimension_numbers<[1], [0], [0], [1], [0, 0, 1, 1], [], []>} : vector<48x64xf32>, vector<64x2xf32>, vector<48x2xf32> -> vector<48x2xf32>
    %269 = vector.extract_strided_slice %268 {offsets = [0, 0], sizes = [48, 1], strides = [1, 1]} : vector<48x2xf32> to vector<48x1xf32>
    %270 = vector.extract_strided_slice %268 {offsets = [0, 1], sizes = [48, 1], strides = [1, 1]} : vector<48x2xf32> to vector<48x1xf32>
    %271 = arith.mulf %269, %269 : vector<48x1xf32>
    %272 = arith.subf %270, %271 : vector<48x1xf32>
    %cst_85 = arith.constant 0.000000e+00 : f32
    %273 = vector.broadcast %cst_85 : f32 to vector<48x1xf32>
    %274 = arith.maximumf %272, %273 : vector<48x1xf32>
    %275 = vector.broadcast %269 : vector<48x1xf32> to vector<48x32xf32>
    %276 = arith.subf %263, %275 : vector<48x32xf32>
    %cst_86 = arith.constant 9.99999996E-13 : f32
    %277 = vector.broadcast %cst_86 : f32 to vector<48x1xf32>
    %278 = arith.addf %274, %277 : vector<48x1xf32>
    %279 = math.rsqrt %278 : vector<48x1xf32>
    %280 = vector.broadcast %279 : vector<48x1xf32> to vector<48x32xf32>
    %281 = arith.mulf %276, %280 : vector<48x32xf32>
    %282 = vector.broadcast %264 : vector<1x32xf32> to vector<48x32xf32>
    %283 = arith.mulf %281, %282 : vector<48x32xf32>
    %284 = vector.broadcast %265 : vector<1x32xf32> to vector<48x32xf32>
    %285 = arith.addf %283, %284 : vector<48x32xf32>
    %c48 = arith.constant 48 : index
    %c0_87 = arith.constant 0 : index
    %286 = vector.load %arg3[%c48, %c0_87] : memref<120x96xf32, #tpu.memory_space<vmem>>, vector<6x48xf32>
    %cst_88 = arith.constant dense<0.000000e+00> : vector<6x32xf32>
    %287 = tpu.matmul %286, %285, %cst_88 {dimension_numbers = #tpu.dot_dimension_numbers<[1], [0], [0], [1], [0, 0, 1, 1], [], []>} : vector<6x48xf32>, vector<48x32xf32>, vector<6x32xf32> -> vector<6x32xf32>
    %c0_89 = arith.constant 0 : index
    %c0_90 = arith.constant 0 : index
    %288 = vector.load %arg10[%c0_89, %c0_90] : memref<33x33xf32, #tpu.memory_space<vmem>>, vector<33x33xf32>
    %289 = vector.extract_strided_slice %288 {offsets = [0, 0], sizes = [32, 32], strides = [1, 1]} : vector<33x33xf32> to vector<32x32xf32>
    %cst_91 = arith.constant dense<0.000000e+00> : vector<6x32xf32>
    %290 = tpu.matmul %287, %289, %cst_91 {dimension_numbers = #tpu.dot_dimension_numbers<[1], [0], [0], [1], [0, 0, 1, 1], [], []>} : vector<6x32xf32>, vector<32x32xf32>, vector<6x32xf32> -> vector<6x32xf32>
    %291 = vector.extract_strided_slice %288 {offsets = [32, 0], sizes = [1, 32], strides = [1, 1]} : vector<33x33xf32> to vector<1x32xf32>
    %292 = vector.broadcast %291 : vector<1x32xf32> to vector<6x32xf32>
    %293 = arith.addf %290, %292 : vector<6x32xf32>
    %294 = math.tanh %293 : vector<6x32xf32>
    %295 = vector.extract_strided_slice %288 {offsets = [0, 32], sizes = [32, 1], strides = [1, 1]} : vector<33x33xf32> to vector<32x1xf32>
    %cst_92 = arith.constant dense<0.000000e+00> : vector<6x1xf32>
    %296 = tpu.matmul %294, %295, %cst_92 {dimension_numbers = #tpu.dot_dimension_numbers<[1], [0], [0], [1], [0, 0, 1, 1], [], []>} : vector<6x32xf32>, vector<32x1xf32>, vector<6x1xf32> -> vector<6x1xf32>
    %297 = vector.extract_strided_slice %288 {offsets = [32, 32], sizes = [1, 1], strides = [1, 1]} : vector<33x33xf32> to vector<1x1xf32>
    %298 = vector.broadcast %297 : vector<1x1xf32> to vector<6x1xf32>
    %299 = arith.addf %296, %298 : vector<6x1xf32>
    %cst_93 = arith.constant 0.000000e+00 : f32
    %300 = vector.broadcast %cst_93 : f32 to vector<1x1xf32>
    %301 = vector.extract_strided_slice %299 {offsets = [0, 0], sizes = [3, 1], strides = [1, 1]} : vector<6x1xf32> to vector<3x1xf32>
    %cst_94 = arith.constant dense<0xFF800000> : vector<1xf32>
    %302 = vector.multi_reduction <maximumf>, %301, %cst_94 [0] : vector<3x1xf32> to vector<1xf32>
    %303 = vector.shape_cast %302 : vector<1xf32> to vector<1x1xf32>
    %304 = vector.broadcast %303 : vector<1x1xf32> to vector<3x1xf32>
    %305 = arith.subf %301, %304 : vector<3x1xf32>
    %306 = math.exp %305 : vector<3x1xf32>
    %cst_95 = arith.constant dense<0.000000e+00> : vector<1xf32>
    %307 = vector.multi_reduction <add>, %306, %cst_95 [0] : vector<3x1xf32> to vector<1xf32>
    %308 = vector.shape_cast %307 : vector<1xf32> to vector<1x1xf32>
    %309 = math.log %308 : vector<1x1xf32>
    %310 = arith.addf %309, %303 : vector<1x1xf32>
    %311 = tpu.iota {dimensions = array<i32: 0>} : vector<3x1xi32>
    %c0_96 = arith.constant 0 : index
    %312 = memref.load %arg2[%c0_96] : memref<2xi32, #tpu.memory_space<smem>>
    %313 = vector.broadcast %312 : i32 to vector<3x1xi32>
    %314 = arith.cmpi eq, %311, %313 : vector<3x1xi32>
    %315 = arith.extui %314 : vector<3x1xi1> to vector<3x1xi32>
    %316 = arith.sitofp %315 : vector<3x1xi32> to vector<3x1xf32>
    %317 = arith.mulf %301, %316 : vector<3x1xf32>
    %cst_97 = arith.constant dense<0.000000e+00> : vector<1xf32>
    %318 = vector.multi_reduction <add>, %317, %cst_97 [0] : vector<3x1xf32> to vector<1xf32>
    %319 = vector.shape_cast %318 : vector<1xf32> to vector<1x1xf32>
    %320 = arith.subf %310, %319 : vector<1x1xf32>
    %321 = arith.addf %300, %320 : vector<1x1xf32>
    %322 = vector.extract_strided_slice %299 {offsets = [3, 0], sizes = [3, 1], strides = [1, 1]} : vector<6x1xf32> to vector<3x1xf32>
    %cst_98 = arith.constant dense<0xFF800000> : vector<1xf32>
    %323 = vector.multi_reduction <maximumf>, %322, %cst_98 [0] : vector<3x1xf32> to vector<1xf32>
    %324 = vector.shape_cast %323 : vector<1xf32> to vector<1x1xf32>
    %325 = vector.broadcast %324 : vector<1x1xf32> to vector<3x1xf32>
    %326 = arith.subf %322, %325 : vector<3x1xf32>
    %327 = math.exp %326 : vector<3x1xf32>
    %cst_99 = arith.constant dense<0.000000e+00> : vector<1xf32>
    %328 = vector.multi_reduction <add>, %327, %cst_99 [0] : vector<3x1xf32> to vector<1xf32>
    %329 = vector.shape_cast %328 : vector<1xf32> to vector<1x1xf32>
    %330 = math.log %329 : vector<1x1xf32>
    %331 = arith.addf %330, %324 : vector<1x1xf32>
    %332 = tpu.iota {dimensions = array<i32: 0>} : vector<3x1xi32>
    %c1_100 = arith.constant 1 : index
    %333 = memref.load %arg2[%c1_100] : memref<2xi32, #tpu.memory_space<smem>>
    %334 = vector.broadcast %333 : i32 to vector<3x1xi32>
    %335 = arith.cmpi eq, %332, %334 : vector<3x1xi32>
    %336 = arith.extui %335 : vector<3x1xi1> to vector<3x1xi32>
    %337 = arith.sitofp %336 : vector<3x1xi32> to vector<3x1xf32>
    %338 = arith.mulf %322, %337 : vector<3x1xf32>
    %cst_101 = arith.constant dense<0.000000e+00> : vector<1xf32>
    %339 = vector.multi_reduction <add>, %338, %cst_101 [0] : vector<3x1xf32> to vector<1xf32>
    %340 = vector.shape_cast %339 : vector<1xf32> to vector<1x1xf32>
    %341 = arith.subf %331, %340 : vector<1x1xf32>
    %342 = arith.addf %321, %341 : vector<1x1xf32>
    %cst_102 = arith.constant 5.000000e-01 : f32
    %343 = vector.broadcast %cst_102 : f32 to vector<1x1xf32>
    %344 = arith.mulf %342, %343 : vector<1x1xf32>
    %cst_103 = arith.constant 0.000000e+00 : f32
    %345 = vector.broadcast %cst_103 : f32 to vector<1x1xf32>
    %346 = tpu.concatenate %299, %344, %345 in 0 : vector<6x1xf32>, vector<1x1xf32>, vector<1x1xf32> -> vector<8x1xf32>
    %c0_104 = arith.constant 0 : index
    %c0_105 = arith.constant 0 : index
    %347 = vector.load %arg11[%c0_104, %c0_105] : memref<8x1xf32, #tpu.memory_space<vmem>>, vector<8x1xf32>
    tpu.vector_store %arg11[%c0_104, %c0_105], %346 {strides = array<i32>} : memref<8x1xf32, #tpu.memory_space<vmem>>, vector<8x1xf32>,
    return
  }
}

</mosaic_0001>

<bundles_post_ra>
// kernel: squeeze.2
= control target key start
LH: loop header
LB: loop body
LE: loop exit
PB: predicated region body
PF: predicated region fallthrough
CT: control target
= control target key end

     0   :  { %s77_s0 = inlined_call_operand.vmem [shape: f32[6], index: 0, kind: input, shape index: {}]   ;;  %s78_s1 = inlined_call_operand.hbm [shape: f32[2,3], index: 1, kind: output, shape index: {}]  }
   0x1   :  { %v6_v0 = vld [vmem:[%s77_s0] sm:$0x1] }
   0x2   :  { %2 = vsyncpa [#allocation1], 0  ;;  %7 = vst [vmem:[#allocation3] sm:$0x1] %v6_v0  ;;  %vm9_vm0 = vcmask 23552   ;;  %s59_s0 = smov 125  }
   0x3   :  { %s60_s8 = smov [#allocation0]  }
   0x4   :  { %s29_s9 = sshll.u32 %s60_s8, 4  ;;  %s30_s9 = int_to_ptr.vmem [resolvable:$true] %s29_s9 }
   0x5   :  { %s37_s10 = scalar_lea.vmem %s30_s9, 32  ;;  %p42_p1 = scmp.lt.s32.totalorder %s30_s9, %s30_s9 }
   0x6   :  { %p38_p0 = scmp.ne.s32.totalorder %s30_s9, %s37_s10  ;;  %p43_p2 = scmp.lt.s32.totalorder %s37_s10, %s37_s10 }
   0x8   :  { %p44_p3 = por %p43_p2, %p42_p1 }
   0x9   :  { %v11_v1 = vld [vmem:[#allocation3] sm:$0x1]  }
   0xa   :  { %v8_v2 = vld [vmem:[#allocation3] sm:$0x1]   ;;  %12 = vrot.lane.b32.xlu0 %v11_v1, %s59_s0  ;;  %p45_p4 = pnand %p44_p3, %p38_p0 }
   0xb   :  { %10 = vst.msk [vmem:[#allocation2] sm:$0x1] %vm9_vm0, %v8_v2  }
  0x7c   :  { %v13_v3 = vpop.permute.xlu0 %12  }
  0x7d   :  { %16 = vst.msk [vmem:[#allocation2 + $0x1] sm:$0x1] %vm9_vm0, %v13_v3  }
  0x84   :  { %v21_v4 = vld [vmem:[#allocation2] sm:$0x3] }
  0x85   :  { %24 = vst [vmem:[#allocation0] sm:$0x3] %v21_v4 }
  0x86   :  { %48 = shalt.err (!%p45_p4)
}
  0x87   :  { %32 = dma.vmem_to_hbm [thread:$0]  %s30_s9, 32, %s78_s1, [#allocation1]  }
  0x88   :  { %57 = dma.done.wait [#allocation1], 32  }
  0x89   :  { %58 = vsyncadd [#allocation1], 4294967264 }
  0x8a   :  { %34 = vsyncpa [#allocation1], 1 }

// kernel: prompt_decoder_for_nsp.1
= control target key start
LH: loop header
LB: loop body
LE: loop exit
PB: predicated region body
PF: predicated region fallthrough
CT: control target
= control target key end

     0   :  { %16 = vsyncpa [#allocation3], 0  ;;  %s7571_s0 = inlined_call_operand.vmem [shape: s32[48,3], index: 0, kind: input, shape index: {}]   ;;  %s7572_s1 = inlined_call_operand.vmem [shape: s32[1,96], index: 1, kind: input, shape index: {}]   ;;  %s7573_s2 = inlined_call_operand.vmem [shape: s32[2], index: 2, kind: input, shape index: {}]   ;;  %s7574_s3 = inlined_call_operand.vmem [shape: f32[120,96], index: 3, kind: input, shape index: {}]   ;;  %s7575_s4 = inlined_call_operand.vmem [shape: f32[128,32], index: 4, kind: input, shape index: {}]   ;;  %s7576_s5 = inlined_call_operand.vmem [shape: f32[2,33,112], index: 5, kind: input, shape index: {}]   ;;  %s7577_s6 = inlined_call_operand.vmem [shape: f32[2,32,32], index: 6, kind: input, shape index: {}]   ;;  %s7578_s7 = inlined_call_operand.vmem [shape: f32[2,6,32], index: 7, kind: input, shape index: {}]   ;;  %s7579_s8 = inlined_call_operand.vmem [shape: f32[2,33,64], index: 8, kind: input, shape index: {}]   ;;  %s7580_s9 = inlined_call_operand.vmem [shape: f32[2,64,32], index: 9, kind: input, shape index: {}]   ;;  %s7581_s10 = inlined_call_operand.vmem [shape: f32[33,33], index: 10, kind: input, shape index: {}]   ;;  %s7582_s11 = inlined_call_operand.vmem [shape: f32[8,1], index: 11, kind: output, shape index: {}]  }
   0x1   :  { %s27_s19 = sshll.u32 %s7573_s2, 4  ;;  %s28_s19 = int_to_ptr.vmem [resolvable:$true] %s27_s19 }
   0x2   :  { %s5983_s20 = scalar_lea.vmem %s28_s19, 16  ;;  %p5988_p1 = scmp.lt.s32.totalorder %s28_s19, %s28_s19 }
   0x3   :  { %p5984_p0 = scmp.ne.s32.totalorder %s28_s19, %s5983_s20  ;;  %p5989_p2 = scmp.lt.s32.totalorder %s5983_s20, %s5983_s20 }
   0x5   :  { %p5990_p3 = por %p5989_p2, %p5988_p1 }
   0x7   :  { %p5991_p4 = pnand %p5990_p3, %p5984_p0 }
   0x9   :  { %5994 = shalt.err (!%p5991_p4)
}
   0xa   :  { %s5997_s21 = smov [#allocation2]  }
   0xb   :  { %30 = dma.vmem_to_smem %s28_s19, 16, %s5997_s21, [#allocation3]  }
   0xc   :  { %5995 = dma.done.wait [#allocation3], 16  }
   0xd   :  { %5996 = vsyncadd [#allocation3], 4294967280 }
   0xe   :  { %50 = sfence }
   0xf   :  { %v62_v0 = vld [vmem:[%s7571_s0 + $0x8] sm:$0xff]  ;;  %v61_v1 = vld [vmem:[%s7571_s0] sm:$0xff]  ;;  %v5998_v2 = vmov 1   ;;  %v5999_v3 = vmov 0   ;;  %v178_v4 = vld [vmem:[%s7575_s4 + $0x78] sm:$0xff]  ;;  %v6000_v9 = vmov 2   ;;  %v59_v26 = vlaneseq }
  0x10   :  { %5753 = vset.pattern.permute.xlu0 %v5998_v2  ;;  %5755 = vset.pattern.permute.xlu1 %v5999_v3  ;;  %v177_v5 = vld [vmem:[%s7575_s4 + $0x70] sm:$0xff]  ;;  %v176_v6 = vld [vmem:[%s7575_s4 + $0x68] sm:$0xff]  ;;  %v64_v7 = vld [vmem:[%s7571_s0 + $0x18] sm:$0xff]  ;;  %v6001_v33 = vmov 1.0   ;;  %s6002_s21 = smov 32   ;;  %s6003_s22 = smov 1  }
  0x11   :  { %71 = vperm.xlu1 %5755, %v62_v0   ;;  %92 = vperm.xlu0 %5753, %v61_v1   ;;  %v175_v8 = vld [vmem:[%s7575_s4 + $0x60] sm:$0xff]  ;;  %v174_v10 = vld [vmem:[%s7575_s4 + $0x58] sm:$0xff]  ;;  %v66_v11 = vld [vmem:[%s7571_s0 + $0x28] sm:$0xff]  ;;  %v60_v28 = vand.u32 127, %v59_v26  ;;  %s6004_s15 = smov 80   ;;  %s6005_s16 = smov 112  }
  0x12   :  { %5212 = vmatprep.subr.mxu0 %v178_v4  ;;  %v173_v12 = vld [vmem:[%s7575_s4 + $0x50] sm:$0xff]  ;;  %v172_v14 = vld [vmem:[%s7575_s4 + $0x48] sm:$0xff]  ;;  %v171_v15 = vld [vmem:[%s7575_s4 + $0x40] sm:$0xff]  ;;  %s6006_s17 = smov 96   ;;  %s6007_s18 = smov 48  }
  0x13   :  { %5213 = vmatpush3.msra.mxu0 %v178_v4  ;;  %v63_v13 = vld [vmem:[%s7571_s0 + $0x10] sm:$0xff]  ;;  %v170_v16 = vld [vmem:[%s7575_s4 + $0x38] sm:$0xff]  ;;  %v168_v18 = vld [vmem:[%s7575_s4 + $0x28] sm:$0xff]  ;;  %s6009_s13 = smov 40   ;;  %s6012_s2 = smov 16  }
  0x14   :  { %5214 = vmatprep.subr.mxu0 %v177_v5  ;;  %v169_v17 = vld [vmem:[%s7575_s4 + $0x30] sm:$0xff]  ;;  %v167_v19 = vld [vmem:[%s7575_s4 + $0x20] sm:$0xff]  ;;  %v166_v20 = vld [vmem:[%s7575_s4 + $0x18] sm:$0xff] }
  0x15   :  { %5756 = vset.pattern.permute.xlu1 %v5998_v2  ;;  %5754 = vset.pattern.permute.xlu0 %v5999_v3  ;;  %v165_v21 = vld [vmem:[%s7575_s4 + $0x10] sm:$0xff]  ;;  %v164_v22 = vld [vmem:[%s7575_s4 + $0x8] sm:$0xff]  ;;  %v65_v23 = vld [vmem:[%s7571_s0 + $0x20] sm:$0xff] }
  0x16   :  { %95 = vperm.xlu1 %5756, %v62_v0   ;;  %68 = vperm.xlu0 %5754, %v61_v1   ;;  %v163_v24 = vld [vmem:[%s7575_s4] sm:$0xff]  ;;  %v6158_v46 = vld [vmem:[%s7574_s3 + $0x70] sm:$0xff]  ;;  %v6163_v47 = vld [vmem:[%s7574_s3 + $0x68] sm:$0xff] }
  0x17   :  { %5215 = vmatpush3.msra.mxu0 %v177_v5  ;;  %5253 = vmatprep.subr.mxu1 %v6158_v46  ;;  %v6170_v48 = vld [vmem:[%s7574_s3 + $0x60] sm:$0xff]  ;;  %v6177_v49 = vld [vmem:[%s7574_s3 + $0x58] sm:$0xff]  ;;  %v6184_v50 = vld [vmem:[%s7574_s3 + $0x50] sm:$0xff] }
  0x18   :  { %5216 = vmatprep.subr.mxu0 %v176_v6  ;;  %5254 = vmatpush3.msra.mxu1 %v6158_v46  ;;  %v6193_v51 = vld [vmem:[%s7574_s3 + $0x48] sm:$0xff]  ;;  %v6199_v52 = vld [vmem:[%s7574_s3 + $0x40] sm:$0xff]  ;;  %v6207_v53 = vld [vmem:[%s7574_s3 + $0x38] sm:$0xff] }
  0x19   :  { %5217 = vmatpush3.msra.mxu0 %v176_v6  ;;  %5255 = vmatprep.subr.mxu1 %v6163_v47 }
  0x1a   :  { %5757 = vset.pattern.permute.xlu1 %v6000_v9  ;;  %77 = vperm.xlu0 %5754, %v64_v7  }
  0x1b   :  { %122 = vperm.xlu1 %5757, %v61_v1   ;;  %5218 = vmatprep.subr.mxu0 %v175_v8 }
  0x1c   :  { %5219 = vmatpush3.msra.mxu0 %v175_v8  ;;  %5256 = vmatpush3.msra.mxu1 %v6163_v47 }
  0x1d   :  { %5220 = vmatprep.subr.mxu0 %v174_v10  ;;  %5257 = vmatprep.subr.mxu1 %v6170_v48 }
  0x1e   :  { %83 = vperm.xlu0 %5754, %v66_v11   ;;  %5221 = vmatpush3.msra.mxu0 %v174_v10 }
  0x1f   :  { %5758 = vset.pattern.permute.xlu1 %v5999_v3  ;;  %5222 = vmatprep.subr.mxu0 %v173_v12 }
  0x20   :  { %74 = vperm.xlu1 %5758, %v63_v13   ;;  %5223 = vmatpush3.msra.mxu0 %v173_v12 }
  0x21   :  { %5224 = vmatprep.subr.mxu0 %v172_v14  ;;  %5258 = vmatpush3.msra.mxu1 %v6170_v48 }
  0x22   :  { %5763 = vset.pattern.permute.xlu0 %v6000_v9  ;;  %5225 = vmatpush3.msra.mxu0 %v172_v14 }
  0x23   :  { %125 = vperm.xlu0 %5763, %v62_v0   ;;  %5226 = vmatprep.subr.mxu0 %v171_v15 }
  0x24   :  { %5759 = vset.pattern.permute.xlu1 %v5998_v2  ;;  %5227 = vmatpush3.msra.mxu0 %v171_v15 }
  0x25   :  { %98 = vperm.xlu1 %5759, %v63_v13   ;;  %5228 = vmatprep.subr.mxu0 %v170_v16 }
  0x26   :  { %5229 = vmatpush3.msra.mxu0 %v170_v16  ;;  %5259 = vmatprep.subr.mxu1 %v6177_v49 }
  0x27   :  { %131 = vperm.xlu0 %5763, %v64_v7   ;;  %5230 = vmatprep.subr.mxu0 %v169_v17 }
  0x28   :  { %5231 = vmatpush3.msra.mxu0 %v169_v17  ;;  %5260 = vmatpush3.msra.mxu1 %v6177_v49 }
  0x29   :  { %101 = vperm.xlu1 %5759, %v64_v7   ;;  %5232 = vmatprep.subr.mxu0 %v168_v18 }
  0x2a   :  { %5233 = vmatpush3.msra.mxu0 %v168_v18  ;;  %5261 = vmatprep.subr.mxu1 %v6184_v50 }
  0x2b   :  { %137 = vperm.xlu0 %5763, %v66_v11   ;;  %5234 = vmatprep.subr.mxu0 %v167_v19 }
  0x2c   :  { %5235 = vmatpush3.msra.mxu0 %v167_v19  ;;  %5262 = vmatpush3.msra.mxu1 %v6184_v50 }
  0x2d   :  { %5760 = vset.pattern.permute.xlu1 %v6000_v9  ;;  %5236 = vmatprep.subr.mxu0 %v166_v20 }
  0x2e   :  { %128 = vperm.xlu1 %5760, %v63_v13   ;;  %5237 = vmatpush3.msra.mxu0 %v166_v20 }
  0x2f   :  { %5238 = vmatprep.subr.mxu0 %v165_v21  ;;  %5765 = vset.pattern.permute.xlu0 %v5999_v3 }
  0x30   :  { %5239 = vmatpush3.msra.mxu0 %v165_v21  ;;  %5263 = vmatprep.subr.mxu1 %v6193_v51 }
  0x31   :  { %5240 = vmatprep.subr.mxu0 %v164_v22  ;;  %5264 = vmatpush3.msra.mxu1 %v6193_v51 }
  0x32   :  { %5761 = vset.pattern.permute.xlu1 %v5999_v3  ;;  %5241 = vmatpush3.msra.mxu0 %v164_v22 }
  0x33   :  { %80 = vperm.xlu1 %5761, %v65_v23   ;;  %5242 = vmatprep.subr.mxu0 %v163_v24 }
  0x34   :  { %5243 = vmatpush3.msra.mxu0 %v163_v24  ;;  %5265 = vmatprep.subr.mxu1 %v6199_v52 }
  0x35   :  { %5266 = vmatpush3.msra.mxu1 %v6199_v52 }
  0x36   :  { %5267 = vmatprep.subr.mxu1 %v6207_v53 }
  0x37   :  { %5762 = vset.pattern.permute.xlu1 %v5998_v2  ;;  %5268 = vmatpush3.msra.mxu1 %v6207_v53 }
  0x38   :  { %104 = vperm.xlu1 %5762, %v65_v23  }
  0x3c   :  { %107 = vperm.xlu1 %5762, %v66_v11  }
  0x40   :  { %5764 = vset.pattern.permute.xlu1 %v6000_v9 }
  0x41   :  { %134 = vperm.xlu1 %5764, %v65_v23  }
  0x45   :  { %5766 = vset.pattern.permute.xlu1 %v5999_v3 }
  0x8c   :  { %v72_v25 = vpop.permute.xlu1 %71  ;;  %v93_v27 = vpop.permute.xlu0 %92 }
  0x8d   :  { %vm109_vm0 = vcmp.eq.s32.totalorder %v60_v28, %v93_v27  ;;  %vm86_vm6 = vcmp.eq.s32.totalorder %v60_v28, %v72_v25 }
  0x91   :  { %v96_v29 = vpop.permute.xlu1 %95  ;;  %v69_v30 = vpop.permute.xlu0 %68 }
  0x92   :  { %vm85_vm1 = vcmp.eq.s32.totalorder %v60_v28, %v69_v30  ;;  %vm110_vm5 = vcmp.eq.s32.totalorder %v60_v28, %v96_v29 }
  0x93   :  { %vm115_vm2 = vmor %vm85_vm1, %vm109_vm0 }
  0x94   :  { %vm116_vm7 = vmor %vm86_vm6, %vm110_vm5 }
  0x95   :  { %v78_v31 = vpop.permute.xlu0 %77 }
  0x96   :  { %v123_v32 = vpop.permute.xlu1 %122  ;;  %vm88_vm12 = vcmp.eq.s32.totalorder %v60_v28, %v78_v31 }
  0x97   :  { %vm139_vm3 = vcmp.eq.s32.totalorder %v60_v28, %v123_v32 }
  0x98   :  { %vm145_vm4 = vmor %vm115_vm2, %vm139_vm3 }
  0x99   :  { %5244 = vmatprep.mubr.msk.f32.mxu0 %vm145_vm4, %v6001_v33  ;;  %v84_v34 = vpop.permute.xlu0 %83 }
  0x9a   :  { %vm90_vm6 = vcmp.eq.s32.totalorder %v60_v28, %v84_v34 }
  0x9b   :  { %v75_v35 = vpop.permute.xlu1 %74 }
  0x9c   :  { %vm87_vm13 = vcmp.eq.s32.totalorder %v60_v28, %v75_v35 }
  0x9e   :  { %v126_v36 = vpop.permute.xlu0 %125 }
  0x9f   :  { %vm140_vm8 = vcmp.eq.s32.totalorder %v60_v28, %v126_v36 }
  0xa0   :  { %vm146_vm9 = vmor %vm116_vm7, %vm140_vm8  ;;  %v99_v37 = vpop.permute.xlu1 %98 }
  0xa1   :  { %5245 = vmatmul.mubr.msk.f32.vlgmr.msra.gmra.mxu0 %vm146_vm9, %v6001_v33  ;;  %vm111_vm11 = vcmp.eq.s32.totalorder %v60_v28, %v99_v37 }
  0xa2   :  { %v132_v39 = vpop.permute.xlu0 %131  ;;  %vm117_vm0 = vmor %vm87_vm13, %vm111_vm11 }
  0xa3   :  { %vm142_vm15 = vcmp.eq.s32.totalorder %v60_v28, %v132_v39 }
  0xa4   :  { %v102_v38 = vpop.permute.xlu1 %101 }
  0xa5   :  { %vm112_vm10 = vcmp.eq.s32.totalorder %v60_v28, %v102_v38 }
  0xa6   :  { %vm118_vm14 = vmor %vm88_vm12, %vm112_vm10  ;;  %v138_v44 = vpop.permute.xlu0 %137 }
  0xa7   :  { %vm148_vm3 = vmor %vm118_vm14, %vm142_vm15  ;;  %vm144_vm12 = vcmp.eq.s32.totalorder %v60_v28, %v138_v44  ;;  %vm306_vm14 = vcmask 261120   ;;  %vm313_vm15 = vcmask 523264  }
  0xa9   :  { %v129_v40 = vpop.permute.xlu1 %128 }
  0xaa   :  { %vm141_vm1 = vcmp.eq.s32.totalorder %v60_v28, %v129_v40 }
  0xab   :  { %vm147_vm2 = vmor %vm117_vm0, %vm141_vm1  ;;  %vm735_vm0 = vcmask 130048  }
  0xac   :  { %5247 = vmatprep.mubr.msk.f32.mxu0 %vm147_vm2, %v6001_v33  ;;  %vm1022_vm2 = vcmask 392192  }
  0xad   :  { %5248 = vmatmul.mubr.msk.f32.gmra.mxu0 %vm148_vm3, %v6001_v33  ;;  %vm1041_vm3 = vcmask 785408  }
  0xae   :  { %v81_v41 = vpop.permute.xlu1 %80 }
  0xaf   :  { %vm89_vm7 = vcmp.eq.s32.totalorder %v60_v28, %v81_v41 }
  0xb3   :  { %v105_v42 = vpop.permute.xlu1 %104 }
  0xb4   :  { %vm113_vm5 = vcmp.eq.s32.totalorder %v60_v28, %v105_v42 }
  0xb5   :  { %vm119_vm9 = vmor %vm89_vm7, %vm113_vm5  ;;  %vm4626_vm5 = vcmask 2048  }
  0xb7   :  { %v108_v43 = vpop.permute.xlu1 %107 }
  0xb8   :  { %vm114_vm4 = vcmp.eq.s32.totalorder %v60_v28, %v108_v43 }
  0xb9   :  { %vm120_vm8 = vmor %vm90_vm6, %vm114_vm4  ;;  %vm6014_vm4 = vmmov 0   ;;  %vm4664_vm6 = vcmask 5123  }
  0xba   :  { %vm150_vm13 = vmor %vm120_vm8, %vm144_vm12  ;;  %vm4714_vm12 = vcmask 7168  }
  0xbc   :  { %v135_v45 = vpop.permute.xlu1 %134 }
  0xbd   :  { %vm143_vm10 = vcmp.eq.s32.totalorder %v60_v28, %v135_v45  ;;  %v597_v45 = vld [vmem:[%s7576_s5 + $0x18] sm:$0xff] }
  0xbe   :  { %vm149_vm11 = vmor %vm119_vm9, %vm143_vm10  ;;  %5278 = vmatprep.subr.mxu1 %v597_v45  ;;  %vm4710_vm9 = vcmask 1045504   ;;  %vm4712_vm10 = vcmask 1046528  }
  0xbf   :  { %5250 = vmatprep.mubr.msk.f32.mxu0 %vm149_vm11, %v6001_v33 }
  0xc0   :  { %5251 = vmatmul.mubr.msk.f32.gmra.mxu0 %vm150_vm13, %v6001_v33 }
 0x161   :  { %v6211_v54 = vpop.f32.mrf.mxu0 }
 0x162   :  { %v277_v57 = vmul.f32 %v6211_v54, %v6211_v54 }
 0x163   :  { %v6213_v55 = vpop.f32.mrf.mxu0 }
 0x164   :  { %v276_v56 = vmul.f32 %v6213_v55, %v6213_v55 }
 0x166   :  { %288 = vrot.lane.b32.xlu1 %v276_v56, %s6002_s21  ;;  %v596_v56 = vld [vmem:[%s7576_s5 + $0x10] sm:$0xff] }
 0x16a   :  { %290 = vrot.lane.b32.xlu1 %v277_v57, %s6002_s21 }
 0x16d   :  { %v6221_v58 = vpop.f32.mrf.mxu0 }
 0x16e   :  { %v279_v59 = vmul.f32 %v6221_v58, %v6221_v58 }
 0x16f   :  { %v6225_v60 = vpop.f32.mrf.mxu0 }
 0x170   :  { %v278_v61 = vmul.f32 %v6225_v60, %v6225_v60  ;;  %294 = vrot.lane.b32.xlu1 %v279_v59, %s6002_s21  ;;  %v595_v59 = vld [vmem:[%s7576_s5 + $0x8] sm:$0xff] }
 0x172   :  { %292 = vrot.lane.b32.xlu0 %v278_v61, %s6002_s21 }
 0x180   :  { %v6231_v62 = vpop.f32.mrf.mxu0 }
 0x181   :  { %v281_v63 = vmul.f32 %v6231_v62, %v6231_v62 }
 0x182   :  { %v6235_v0 = vpop.f32.mrf.mxu0 }
 0x183   :  { %v280_v1 = vmul.f32 %v6235_v0, %v6235_v0  ;;  %298 = vrot.lane.b32.xlu1 %v281_v63, %s6002_s21  ;;  %v594_v63 = vld [vmem:[%s7576_s5] sm:$0xff] }
 0x185   :  { %296 = vrot.lane.b32.xlu0 %v280_v1, %s6002_s21 }
 0x1d8   :  { %v289_v4 = vpop.permute.xlu1 %288 }
 0x1d9   :  { %v307_v5 = vsel %vm306_vm14, %v6213_v55, %v289_v4 }
 0x1da   :  { %5269 = vmatprep.mubr.msk.f32.mxu1 %vm313_vm15, %v307_v5 }
 0x1dc   :  { %v291_v6 = vpop.permute.xlu1 %290 }
 0x1dd   :  { %v308_v7 = vsel %vm306_vm14, %v6211_v54, %v291_v6 }
 0x1de   :  { %5270 = vmatmul.mubr.msk.f32.vlgmr.msra.gmra.mxu1 %vm313_vm15, %v308_v7 }
 0x1df   :  { %5279 = vmatpush3.msra.mxu1 %v597_v45 }
 0x1e0   :  { %5280 = vmatprep.subr.mxu1 %v596_v56 }
 0x1e1   :  { %5281 = vmatpush3.msra.mxu1 %v596_v56 }
 0x1e2   :  { %v295_v8 = vpop.permute.xlu1 %294  ;;  %5282 = vmatprep.subr.mxu1 %v595_v59 }
 0x1e3   :  { %v310_v11 = vsel %vm306_vm14, %v6221_v58, %v295_v8  ;;  %5283 = vmatpush3.msra.mxu1 %v595_v59 }
 0x1e4   :  { %v293_v9 = vpop.permute.xlu0 %292  ;;  %5284 = vmatprep.subr.mxu1 %v594_v63 }
 0x1e5   :  { %v309_v10 = vsel %vm306_vm14, %v6225_v60, %v293_v9  ;;  %5285 = vmatpush3.msra.mxu1 %v594_v63 }
 0x1e6   :  { %5272 = vmatprep.mubr.msk.f32.mxu1 %vm313_vm15, %v309_v10 }
 0x1e7   :  { %5273 = vmatmul.mubr.msk.f32.gmra.mxu1 %vm313_vm15, %v310_v11 }
 0x1f5   :  { %v299_v12 = vpop.permute.xlu1 %298 }
 0x1f6   :  { %v312_v15 = vsel %vm306_vm14, %v6231_v62, %v299_v12 }
 0x1f7   :  { %v297_v13 = vpop.permute.xlu0 %296 }
 0x1f8   :  { %v311_v14 = vsel %vm306_vm14, %v6235_v0, %v297_v13 }
 0x1f9   :  { %5275 = vmatprep.mubr.msk.f32.mxu1 %vm313_vm15, %v311_v14 }
 0x1fa   :  { %5276 = vmatmul.mubr.msk.f32.gmra.mxu1 %vm313_vm15, %v312_v15 }
 0x29e   :  { %v5271_v16 = vpop.f32.mrf.mxu1 }
 0x29f   :  { %v428_v17 = vmul.f32 %v5271_v16, %v5271_v16 }
 0x2a0   :  { %v398_v18 = vpop.f32.mrf.mxu1 }
 0x2a1   :  { %v427_v19 = vmul.f32 %v398_v18, %v398_v18  ;;  %441 = vrot.lane.b32.xlu1 %v428_v17, %s6003_s22 }
 0x2a3   :  { %439 = vrot.lane.b32.xlu0 %v427_v19, %s6003_s22 }
 0x2a7   :  { %v5274_v20 = vpop.f32.mrf.mxu1 }
 0x2a8   :  { %v430_v21 = vmul.f32 %v5274_v20, %v5274_v20 }
 0x2a9   :  { %v408_v22 = vpop.f32.mrf.mxu1 }
 0x2aa   :  { %v429_v23 = vmul.f32 %v408_v22, %v408_v22  ;;  %445 = vrot.lane.b32.xlu1 %v430_v21, %s6003_s22 }
 0x2ac   :  { %443 = vrot.lane.b32.xlu0 %v429_v23, %s6003_s22 }
 0x2ba   :  { %v5277_v24 = vpop.f32.mrf.mxu1 }
 0x2bb   :  { %v432_v25 = vmul.f32 %v5277_v24, %v5277_v24 }
 0x2bc   :  { %v418_v27 = vpop.f32.mrf.mxu1 }
 0x2bd   :  { %v431_v28 = vmul.f32 %v418_v27, %v418_v27  ;;  %449 = vrot.lane.b32.xlu1 %v432_v25, %s6003_s22 }
 0x2bf   :  { %447 = vrot.lane.b32.xlu0 %v431_v28, %s6003_s22  ;;  %v4740_v28 = vld [vmem:[%s7575_s4 + $0x79] ss:$0 sm:$0xff] }
 0x2c1   :  { %476 = vperm.xlu1 %5766, %v5271_v16  }
 0x2c3   :  { %471 = vperm.xlu0 %5765, %v398_v18  }
 0x2c5   :  { %481 = vperm.xlu1 %5766, %v408_v22  }
 0x2c7   :  { %5767 = vset.pattern.permute.xlu0 %v5998_v2 }
 0x2c9   :  { %486 = vperm.xlu1 %5766, %v5274_v20  }
 0x2cd   :  { %5768 = vset.pattern.permute.xlu1 %v5998_v2 }
 0x313   :  { %v442_v29 = vpop.permute.xlu1 %441 }
 0x314   :  { %v458_v30 = vsub.f32 %v5271_v16, %v442_v29 }
 0x315   :  { %v440_v31 = vpop.permute.xlu0 %439 }
 0x316   :  { %v464_v32 = vmax.f32 %v458_v30, 0.0  ;;  %v457_v33 = vsub.f32 %v398_v18, %v440_v31 }
 0x318   :  { %v506_v34 = vadd.f32 1e-12, %v464_v32  ;;  %v463_v35 = vmax.f32 %v457_v33, 0.0 }
 0x31a   :  { %5801 = vrsqrt.f32 %v506_v34  ;;  %v505_v36 = vadd.f32 1e-12, %v463_v35 }
 0x31c   :  { %5803 = vrsqrt.f32 %v505_v36  ;;  %v446_v37 = vpop.permute.xlu1 %445 }
 0x31d   :  { %v460_v38 = vsub.f32 %v5274_v20, %v446_v37 }
 0x31e   :  { %v444_v39 = vpop.permute.xlu0 %443 }
 0x31f   :  { %v466_v40 = vmax.f32 %v460_v38, 0.0  ;;  %v459_v41 = vsub.f32 %v408_v22, %v444_v39  ;;  %v4739_v22 = vld [vmem:[%s7575_s4 + $0x78] ss:$0 sm:$0xff]  ;;  %s6010_s4 = smov 64  }
 0x321   :  { %v508_v42 = vadd.f32 1e-12, %v466_v40  ;;  %v465_v43 = vmax.f32 %v459_v41, 0.0 }
 0x323   :  { %5805 = vrsqrt.f32 %v508_v42  ;;  %v507_v44 = vadd.f32 1e-12, %v465_v43 }
 0x325   :  { %5807 = vrsqrt.f32 %v507_v44 }
 0x327   :  { %v5802_v57 = vpop.eup %5801 }
 0x328   :  { %524 = vperm.xlu0 %5767, %v5802_v57  }
 0x329   :  { %v5804_v61 = vpop.eup %5803 }
 0x32a   :  { %519 = vperm.xlu1 %5768, %v5804_v61  }
 0x32f   :  { %v450_v1 = vpop.permute.xlu1 %449 }
 0x330   :  { %v5806_v4 = vpop.eup %5805  ;;  %v462_v5 = vsub.f32 %v5277_v24, %v450_v1 }
 0x331   :  { %534 = vperm.xlu1 %5768, %v5806_v4   ;;  %v448_v6 = vpop.permute.xlu0 %447 }
 0x332   :  { %v5808_v7 = vpop.eup %5807  ;;  %v468_v8 = vmax.f32 %v462_v5, 0.0  ;;  %v461_v9 = vsub.f32 %v418_v27, %v448_v6 }
 0x333   :  { %529 = vperm.xlu0 %5767, %v5808_v7  }
 0x334   :  { %v510_v10 = vadd.f32 1e-12, %v468_v8  ;;  %v467_v11 = vmax.f32 %v461_v9, 0.0 }
 0x335   :  { %5770 = vset.pattern.permute.xlu1 %v5999_v3 }
 0x336   :  { %5809 = vrsqrt.f32 %v510_v10  ;;  %v509_v12 = vadd.f32 1e-12, %v467_v11  ;;  %496 = vperm.xlu1 %5770, %v5277_v24  }
 0x337   :  { %5769 = vset.pattern.permute.xlu0 %v5999_v3 }
 0x338   :  { %5811 = vrsqrt.f32 %v509_v12  ;;  %491 = vperm.xlu0 %5769, %v418_v27  }
 0x33a   :  { %5771 = vset.pattern.permute.xlu1 %v5998_v2 }
 0x33c   :  { %5772 = vset.pattern.permute.xlu0 %v5998_v2  ;;  %v477_v15 = vpop.permute.xlu1 %476 }
 0x33d   :  { %v500_v19 = vsub.f32 %v6211_v54, %v477_v15 }
 0x33e   :  { %v472_v17 = vpop.permute.xlu0 %471 }
 0x33f   :  { %v499_v21 = vsub.f32 %v6213_v55, %v472_v17 }
 0x340   :  { %v482_v16 = vpop.permute.xlu1 %481 }
 0x341   :  { %v501_v32 = vsub.f32 %v6225_v60, %v482_v16 }
 0x343   :  { %v5810_v13 = vpop.eup %5809 }
 0x344   :  { %544 = vperm.xlu0 %5772, %v5810_v13   ;;  %v487_v18 = vpop.permute.xlu1 %486 }
 0x345   :  { %v5812_v14 = vpop.eup %5811  ;;  %v502_v54 = vsub.f32 %v6221_v58, %v487_v18 }
 0x346   :  { %539 = vperm.xlu1 %5771, %v5812_v14  }
 0x3a3   :  { %v525_v20 = vpop.permute.xlu0 %524 }
 0x3a4   :  { %v548_v23 = vmul.f32 %v525_v20, %v500_v19 }
 0x3a5   :  { %v520_v24 = vpop.permute.xlu1 %519 }
 0x3a6   :  { %v547_v25 = vmul.f32 %v520_v24, %v499_v21  ;;  %v558_v27 = vmul.f32 %v4739_v22, %v548_v23 }
 0x3a8   :  { %v557_v29 = vmul.f32 %v4739_v22, %v547_v25  ;;  %v6294_v31 = vadd.f32 %v4740_v28, %v558_v27 }
 0x3aa   :  { %v6291_v30 = vadd.f32 %v4740_v28, %v557_v29 }
 0x3ac   :  { %v535_v55 = vpop.permute.xlu1 %534  ;;  %5286 = vmatprep.mubr.msk.f32.mxu1 %vm306_vm14, %v6291_v30 }
 0x3ad   :  { %v550_v33 = vmul.f32 %v535_v55, %v502_v54  ;;  %5287 = vmatmul.mubr.msk.f32.vlgmr.msra.gmra.mxu1 %vm306_vm14, %v6294_v31 }
 0x3ae   :  { %v530_v34 = vpop.permute.xlu0 %529 }
 0x3af   :  { %v549_v35 = vmul.f32 %v530_v34, %v501_v32  ;;  %v560_v36 = vmul.f32 %v4739_v22, %v550_v33 }
 0x3b1   :  { %v559_v37 = vmul.f32 %v4739_v22, %v549_v35  ;;  %v6303_v39 = vadd.f32 %v4740_v28, %v560_v36  ;;  %v497_v58 = vpop.permute.xlu1 %496 }
 0x3b2   :  { %v504_v40 = vsub.f32 %v6231_v62, %v497_v58  ;;  %v4741_v62 = vld [vmem:[%s7576_s5 + $0x20] ss:$0 sm:$0xff] }
 0x3b3   :  { %v6301_v38 = vadd.f32 %v4740_v28, %v559_v37  ;;  %v492_v60 = vpop.permute.xlu0 %491  ;;  %v579_v58 = vld [vmem:[%s7572_s1] sm:$0x1] }
 0x3b4   :  { %v503_v42 = vsub.f32 %v6235_v0, %v492_v60  ;;  %v6422_v60 = vshrl.u32 %v59_v26, 7  ;;  %vm580_vm1 = vcmp.gt.s32.totalorder %v579_v58, 0  ;;  %v573_v26 = vld [vmem:[%s7574_s3] sm:$0xff] }
 0x3b5   :  { %5289 = vmatprep.mubr.msk.f32.mxu1 %vm306_vm14, %v6301_v38 }
 0x3b6   :  { %5290 = vmatmul.mubr.msk.f32.gmra.mxu1 %vm306_vm14, %v6303_v39 }
 0x3bf   :  { %v545_v41 = vpop.permute.xlu0 %544 }
 0x3c0   :  { %v552_v43 = vmul.f32 %v545_v41, %v504_v40  ;;  %v6425_v41 = vsub.s32 0, %v6422_v60 }
 0x3c1   :  { %v540_v44 = vpop.permute.xlu1 %539 }
 0x3c2   :  { %v551_v45 = vmul.f32 %v540_v44, %v503_v42  ;;  %v562_v56 = vmul.f32 %v4739_v22, %v552_v43  ;;  %v6008_v42 = vmov -1e+09  }
 0x3c3   :  { %v581_v43 = vsel %vm580_vm1, 0.0, %v6008_v42 }
 0x3c4   :  { %v561_v57 = vmul.f32 %v4739_v22, %v551_v45  ;;  %v6313_v61 = vadd.f32 %v4740_v28, %v562_v56  ;;  %v586_v45 = vrot.slane %v581_v43, %v6425_v41  ;;  %v574_v56 = vld [vmem:[%s7574_s3 + $0x8] sm:$0xff] }
 0x3c6   :  { %v6311_v59 = vadd.f32 %v4740_v28, %v561_v57 }
 0x3c8   :  { %5292 = vmatprep.mubr.msk.f32.mxu1 %vm306_vm14, %v6311_v59 }
 0x3c9   :  { %5293 = vmatmul.mubr.msk.f32.gmra.mxu1 %vm306_vm14, %v6313_v61 }
 0x46d   :  { %v5288_v63 = vpop.f32.mrf.mxu1 }
 0x46e   :  { %v6330_v6 = vadd.f32 %v5288_v63, %v4741_v62 }
 0x46f   :  { %v688_v0 = vpop.f32.mrf.mxu1 }
 0x470   :  { %v6322_v1 = vadd.f32 %v4741_v62, %v688_v0 }
 0x472   :  { %5307 = vmatprep.mubr.msk.f32.mxu1 %vm735_vm0, %v6322_v1 }
 0x476   :  { %v5291_v4 = vpop.f32.mrf.mxu1 }
 0x477   :  { %v6326_v5 = vadd.f32 %v5291_v4, %v4741_v62 }
 0x478   :  { %v698_v7 = vpop.f32.mrf.mxu1 }
 0x479   :  { %873 = vrot.lane.b32.xlu0 %v6326_v5, %s6004_s15  ;;  %v6336_v8 = vadd.f32 %v4741_v62, %v698_v7 }
 0x47d   :  { %869 = vrot.lane.b32.xlu0 %v6330_v6, %s6004_s15 }
 0x481   :  { %855 = vrot.lane.b32.xlu0 %v6322_v1, %s6005_s16 }
 0x485   :  { %859 = vrot.lane.b32.xlu0 %v6336_v8, %s6005_s16 }
 0x489   :  { %v5294_v9 = vpop.f32.mrf.mxu1 }
 0x48a   :  { %v6340_v10 = vadd.f32 %v5294_v9, %v4741_v62 }
 0x48b   :  { %v708_v11 = vpop.f32.mrf.mxu1 }
 0x48c   :  { %v6342_v12 = vadd.f32 %v4741_v62, %v708_v11  ;;  %877 = vrot.lane.b32.xlu1 %v6340_v10, %s6004_s15  ;;  %v6434_v62 = vadd.f32 %v586_v45, %v574_v56  ;;  %v6437_v11 = vadd.f32 %v586_v45, %v573_v26 }
 0x48e   :  { %863 = vrot.lane.b32.xlu0 %v6342_v12, %s6005_s16 }
 0x490   :  { %875 = vrot.lane.b32.xlu1 %v6342_v12, %s6004_s15 }
 0x492   :  { %733 = vrot.lane.b32.xlu0 %v6340_v10, %s6006_s17 }
 0x494   :  { %871 = vrot.lane.b32.xlu1 %v6336_v8, %s6004_s15 }
 0x496   :  { %729 = vrot.lane.b32.xlu0 %v6326_v5, %s6006_s17 }
 0x498   :  { %867 = vrot.lane.b32.xlu1 %v6322_v1, %s6004_s15 }
 0x49a   :  { %725 = vrot.lane.b32.xlu0 %v6330_v6, %s6006_s17 }
 0x49c   :  { %857 = vrot.lane.b32.xlu1 %v6330_v6, %s6005_s16 }
 0x4a0   :  { %861 = vrot.lane.b32.xlu1 %v6326_v5, %s6005_s16 }
 0x4a4   :  { %865 = vrot.lane.b32.xlu1 %v6340_v10, %s6005_s16 }
 0x4a8   :  { %731 = vrot.lane.b32.xlu1 %v6342_v12, %s6006_s17 }
 0x4ac   :  { %727 = vrot.lane.b32.xlu1 %v6336_v8, %s6006_s17 }
 0x4b0   :  { %723 = vrot.lane.b32.xlu1 %v6322_v1, %s6006_s17 }
 0x4eb   :  { %v874_v13 = vpop.permute.xlu0 %873 }
 0x4ef   :  { %v870_v14 = vpop.permute.xlu0 %869 }
 0x4f3   :  { %v856_v15 = vpop.permute.xlu0 %855 }
 0x4f4   :  { %5328 = vmatprep.mubr.msk.f32.mxu0 %vm735_vm0, %v856_v15 }
 0x4f7   :  { %v860_v16 = vpop.permute.xlu0 %859 }
 0x4fe   :  { %v878_v17 = vpop.permute.xlu1 %877 }
 0x4ff   :  { %5316 = vmatprep.subr.msk.mxu0 %vm735_vm0, %v878_v17 }
 0x500   :  { %5317 = vmatpush3.xpose.msk.msra.mxu0 %vm735_vm0, %v878_v17  ;;  %v864_v18 = vpop.permute.xlu0 %863 }
 0x502   :  { %v876_v19 = vpop.permute.xlu1 %875 }
 0x503   :  { %5318 = vmatprep.subr.msk.mxu0 %vm735_vm0, %v876_v19 }
 0x504   :  { %5319 = vmatpush3.xpose.msk.msra.mxu0 %vm735_vm0, %v876_v19  ;;  %v734_v20 = vpop.permute.xlu0 %733  ;;  %v576_v19 = vld [vmem:[%s7574_s3 + $0x18] sm:$0xff] }
 0x505   :  { %5295 = vmatprep.subr.msk.mxu1 %vm735_vm0, %v734_v20  ;;  %5320 = vmatprep.subr.msk.mxu0 %vm735_vm0, %v874_v13 }
 0x506   :  { %v872_v21 = vpop.permute.xlu1 %871  ;;  %5296 = vmatpush3.xpose.msk.msra.mxu1 %vm735_vm0, %v734_v20 }
 0x508   :  { %5321 = vmatpush3.xpose.msk.msra.mxu0 %vm735_vm0, %v874_v13  ;;  %v730_v28 = vpop.permute.xlu0 %729 }
 0x509   :  { %5322 = vmatprep.subr.msk.mxu0 %vm735_vm0, %v872_v21 }
 0x50a   :  { %v868_v22 = vpop.permute.xlu1 %867 }
 0x50c   :  { %5323 = vmatpush3.xpose.msk.msra.mxu0 %vm735_vm0, %v872_v21  ;;  %v726_v54 = vpop.permute.xlu0 %725 }
 0x50d   :  { %5324 = vmatprep.subr.msk.mxu0 %vm735_vm0, %v870_v14 }
 0x50e   :  { %v858_v23 = vpop.permute.xlu1 %857 }
 0x510   :  { %5325 = vmatpush3.xpose.msk.msra.mxu0 %vm735_vm0, %v870_v14  ;;  %v575_v14 = vld [vmem:[%s7574_s3 + $0x10] sm:$0xff] }
 0x511   :  { %5326 = vmatprep.subr.msk.mxu0 %vm735_vm0, %v868_v22 }
 0x512   :  { %v862_v24 = vpop.permute.xlu1 %861 }
 0x514   :  { %5327 = vmatpush3.xpose.msk.msra.mxu0 %vm735_vm0, %v868_v22 }
 0x516   :  { %v866_v25 = vpop.permute.xlu1 %865 }
 0x517   :  { %5329 = vmatmul.mubr.msk.f32.vlgmr.msra.gmra.mxu0 %vm735_vm0, %v858_v23 }
 0x518   :  { %5331 = vmatprep.mubr.msk.f32.mxu0 %vm735_vm0, %v860_v16 }
 0x51a   :  { %v732_v27 = vpop.permute.xlu1 %731 }
 0x51b   :  { %5297 = vmatprep.subr.msk.mxu1 %vm735_vm0, %v732_v27  ;;  %5332 = vmatmul.mubr.msk.f32.gmra.mxu0 %vm735_vm0, %v862_v24  ;;  %v6450_v24 = vadd.f32 %v586_v45, %v575_v14 }
 0x51c   :  { %5298 = vmatpush3.xpose.msk.msra.mxu1 %vm735_vm0, %v732_v27  ;;  %5334 = vmatprep.mubr.msk.f32.mxu0 %vm735_vm0, %v864_v18  ;;  %v577_v27 = vld [vmem:[%s7574_s3 + $0x20] sm:$0xff] }
 0x51d   :  { %5299 = vmatprep.subr.msk.mxu1 %vm735_vm0, %v730_v28  ;;  %v6464_v58 = vadd.f32 %v586_v45, %v577_v27 }
 0x51e   :  { %v728_v29 = vpop.permute.xlu1 %727 }
 0x51f   :  { %5335 = vmatmul.mubr.msk.f32.gmra.mxu0 %vm735_vm0, %v866_v25 }
 0x520   :  { %5300 = vmatpush3.xpose.msk.msra.mxu1 %vm735_vm0, %v730_v28 }
 0x521   :  { %5301 = vmatprep.subr.msk.mxu1 %vm735_vm0, %v728_v29 }
 0x522   :  { %v724_v55 = vpop.permute.xlu1 %723 }
 0x524   :  { %5302 = vmatpush3.xpose.msk.msra.mxu1 %vm735_vm0, %v728_v29 }
 0x525   :  { %5303 = vmatprep.subr.msk.mxu1 %vm735_vm0, %v726_v54 }
 0x528   :  { %5304 = vmatpush3.xpose.msk.msra.mxu1 %vm735_vm0, %v726_v54 }
 0x529   :  { %5305 = vmatprep.subr.msk.mxu1 %vm735_vm0, %v724_v55 }
 0x52c   :  { %5306 = vmatpush3.xpose.msk.msra.mxu1 %vm735_vm0, %v724_v55 }
 0x52f   :  { %5308 = vmatmul.mubr.msk.f32.vlgmr.msra.gmra.mxu1 %vm735_vm0, %v6330_v6 }
 0x530   :  { %5310 = vmatprep.mubr.msk.f32.mxu1 %vm735_vm0, %v6336_v8 }
 0x533   :  { %5311 = vmatmul.mubr.msk.f32.gmra.mxu1 %vm735_vm0, %v6326_v5 }
 0x534   :  { %5313 = vmatprep.mubr.msk.f32.mxu1 %vm735_vm0, %v6342_v12 }
 0x537   :  { %5314 = vmatmul.mubr.msk.f32.gmra.mxu1 %vm735_vm0, %v6340_v10 }
 0x5d7   :  { %v5330_v32 = vpop.f32.mrf.mxu0 }
 0x5d8   :  { %1006 = vrot.lane.b32.xlu1 %v5330_v32, %s6007_s18  ;;  %v6457_v32 = vadd.f32 %v586_v45, %v576_v19 }
 0x5d9   :  { %v969_v33 = vpop.f32.mrf.mxu0 }
 0x5da   :  { %1004 = vrot.lane.b32.xlu0 %v969_v33, %s6007_s18  ;;  %v578_v33 = vld [vmem:[%s7574_s3 + $0x28] sm:$0xff] }
 0x5db   :  { %v5333_v34 = vpop.f32.mrf.mxu0  ;;  %v6467_v42 = vadd.f32 %v586_v45, %v578_v33 }
 0x5dc   :  { %1010 = vrot.lane.b32.xlu1 %v5333_v34, %s6007_s18 }
 0x5dd   :  { %v979_v35 = vpop.f32.mrf.mxu0 }
 0x5de   :  { %1008 = vrot.lane.b32.xlu0 %v979_v35, %s6007_s18 }
 0x5df   :  { %v5336_v36 = vpop.f32.mrf.mxu0 }
 0x5e0   :  { %1014 = vrot.lane.b32.xlu1 %v5336_v36, %s6007_s18 }
 0x5e1   :  { %v989_v37 = vpop.f32.mrf.mxu0 }
 0x5e2   :  { %1012 = vrot.lane.b32.xlu0 %v989_v37, %s6007_s18 }
 0x5ef   :  { %v5309_v40 = vpop.f32.mrf.mxu1 }
 0x5f1   :  { %v826_v44 = vpop.f32.mrf.mxu1 }
 0x5f3   :  { %v5312_v57 = vpop.f32.mrf.mxu1 }
 0x5f5   :  { %v836_v4 = vpop.f32.mrf.mxu1 }
 0x5f7   :  { %v5315_v20 = vpop.f32.mrf.mxu1 }
 0x5f9   :  { %v846_v35 = vpop.f32.mrf.mxu1 }
 0x64a   :  { %v1007_v63 = vpop.permute.xlu1 %1006 }
 0x64b   :  { %v1024_v0 = vsel %vm1022_vm2, %v5309_v40, %v1007_v63 }
 0x64c   :  { %v1030_v7 = vmul.f32 0.25, %v1024_v0  ;;  %v1005_v9 = vpop.permute.xlu0 %1004 }
 0x64d   :  { %v1023_v13 = vsel %vm1022_vm2, %v826_v44, %v1005_v9 }
 0x64e   :  { %v1029_v15 = vmul.f32 0.25, %v1023_v13  ;;  %v1011_v16 = vpop.permute.xlu1 %1010  ;;  %v1036_v17 = vadd.f32 %v1030_v7, %v6434_v62 }
 0x64f   :  { %v1026_v18 = vsel %vm1022_vm2, %v5312_v57, %v1011_v16 }
 0x650   :  { %v1009_v21 = vpop.permute.xlu0 %1008  ;;  %v1045_v22 = vsel %vm1041_vm3, %v1036_v17, -inf  ;;  %v1035_v23 = vadd.f32 %v1029_v15, %v6437_v11  ;;  %v1032_v28 = vmul.f32 0.25, %v1026_v18 }
 0x651   :  { %v1025_v25 = vsel %vm1022_vm2, %v836_v4, %v1009_v21  ;;  %1046 = vmax.xlane.f32.xlu1 %v1045_v22 }
 0x652   :  { %v1031_v29 = vmul.f32 0.25, %v1025_v25  ;;  %v1015_v54 = vpop.permute.xlu1 %1014  ;;  %v1042_v55 = vsel %vm1041_vm3, %v1035_v23, -inf  ;;  %v1038_v57 = vadd.f32 %v1032_v28, %v6457_v32 }
 0x653   :  { %v1028_v34 = vsel %vm1022_vm2, %v5315_v20, %v1015_v54  ;;  %1043 = vmax.xlane.f32.xlu0 %v1042_v55 }
 0x654   :  { %v1013_v36 = vpop.permute.xlu0 %1012  ;;  %v1037_v37 = vadd.f32 %v1031_v29, %v6450_v24  ;;  %v1034_v43 = vmul.f32 0.25, %v1028_v34  ;;  %v1051_v63 = vsel %vm1041_vm3, %v1038_v57, -inf }
 0x655   :  { %v1027_v40 = vsel %vm1022_vm2, %v846_v35, %v1013_v36 }
 0x656   :  { %v1033_v44 = vmul.f32 0.25, %v1027_v40  ;;  %v1048_v56 = vsel %vm1041_vm3, %v1037_v37, -inf  ;;  %v1040_v4 = vadd.f32 %v1034_v43, %v6467_v42 }
 0x657   :  { %1049 = vmax.xlane.f32.xlu0 %v1048_v56 }
 0x658   :  { %v1039_v26 = vadd.f32 %v1033_v44, %v6464_v58  ;;  %v1057_v45 = vsel %vm1041_vm3, %v1040_v4, -inf }
 0x65a   :  { %v1054_v0 = vsel %vm1041_vm3, %v1039_v26, -inf }
 0x65b   :  { %1052 = vmax.xlane.f32.xlu0 %v1051_v63  ;;  %1055 = vmax.xlane.f32.xlu1 %v1054_v0 }
 0x65f   :  { %1058 = vmax.xlane.f32.xlu0 %v1057_v45 }
 0x66c   :  { %1273 = vrot.lane.b32.xlu1 %v6340_v10, %s6009_s13 }
 0x670   :  { %1269 = vrot.lane.b32.xlu1 %v6326_v5, %s6009_s13 }
 0x674   :  { %1267 = vrot.lane.b32.xlu1 %v6336_v8, %s6009_s13 }
 0x675   :  { %1271 = vrot.lane.b32.xlu0 %v6342_v12, %s6009_s13 }
 0x678   :  { %1263 = vrot.lane.b32.xlu1 %v6322_v1, %s6009_s13 }
 0x679   :  { %1265 = vrot.lane.b32.xlu0 %v6330_v6, %s6009_s13 }
 0x6da   :  { %v1047_v7 = vpop.xlane.xlu1 %1046 }
 0x6db   :  { %v1061_v9 = vsub.f32 %v1036_v17, %v1047_v7 }
 0x6dc   :  { %v1044_v13 = vpop.xlane.xlu0 %1043 }
 0x6dd   :  { %v1068_v14 = vmul.f32 1.442695, %v1061_v9  ;;  %v1060_v15 = vsub.f32 %v1035_v23, %v1044_v13 }
 0x6df   :  { %5813 = vpow2.f32 %v1068_v14  ;;  %v1066_v16 = vmul.f32 1.442695, %v1060_v15 }
 0x6e0   :  { %v1050_v18 = vpop.xlane.xlu0 %1049 }
 0x6e1   :  { %5815 = vpow2.f32 %v1066_v16  ;;  %v1062_v19 = vsub.f32 %v1037_v37, %v1050_v18 }
 0x6e3   :  { %v1070_v20 = vmul.f32 1.442695, %v1062_v19 }
 0x6e4   :  { %v1056_v21 = vpop.xlane.xlu1 %1055  ;;  %v1053_v22 = vpop.xlane.xlu0 %1052 }
 0x6e5   :  { %5817 = vpow2.f32 %v1070_v20  ;;  %v1064_v25 = vsub.f32 %v1039_v26, %v1056_v21  ;;  %v1063_v27 = vsub.f32 %v1038_v57, %v1053_v22 }
 0x6e7   :  { %v1074_v28 = vmul.f32 1.442695, %v1064_v25  ;;  %v1072_v29 = vmul.f32 1.442695, %v1063_v27 }
 0x6e8   :  { %v1274_v54 = vpop.permute.xlu1 %1273  ;;  %v1059_v55 = vpop.xlane.xlu0 %1058 }
 0x6e9   :  { %5819 = vpow2.f32 %v1074_v28  ;;  %v1065_v17 = vsub.f32 %v1040_v4, %v1059_v55  ;;  %5358 = vmatprep.subr.mxu0 %v1274_v54 }
 0x6ea   :  { %5821 = vpow2.f32 %v1072_v29  ;;  %5359 = vmatpush3.msra.mxu0 %v1274_v54 }
 0x6eb   :  { %v1076_v23 = vmul.f32 1.442695, %v1065_v17 }
 0x6ec   :  { %v6488_v33 = vpop.eup %5813  ;;  %v1270_v34 = vpop.permute.xlu1 %1269 }
 0x6ed   :  { %v1272_v35 = vpop.permute.xlu0 %1271  ;;  %5823 = vpow2.f32 %v1076_v23  ;;  %1253 = vrot.lane.b32.xlu1 %v6488_v33, %s6004_s15  ;;  %v1463_v23 = vld [vmem:[%s7577_s6 + $0x18] sm:$0xff] }
 0x6ee   :  { %5360 = vmatprep.subr.mxu0 %v1272_v35  ;;  %v5816_v36 = vpop.eup %5815 }
 0x6ef   :  { %5361 = vmatpush3.msra.mxu0 %v1272_v35  ;;  %1251 = vrot.lane.b32.xlu0 %v5816_v36, %s6004_s15  ;;  %v1461_v35 = vld [vmem:[%s7577_s6 + $0x8] sm:$0xff] }
 0x6f0   :  { %5349 = vmatprep.mubr.msk.f32.mxu1 %vm1022_vm2, %v5816_v36  ;;  %5362 = vmatprep.subr.mxu0 %v1270_v34  ;;  %v1268_v37 = vpop.permute.xlu1 %1267  ;;  %v1460_v36 = vld [vmem:[%s7577_s6] sm:$0xff] }
 0x6f1   :  { %5363 = vmatpush3.msra.mxu0 %v1270_v34  ;;  %v1266_v43 = vpop.permute.xlu0 %1265 }
 0x6f2   :  { %v6494_v40 = vpop.eup %5817  ;;  %5364 = vmatprep.subr.mxu0 %v1268_v37 }
 0x6f3   :  { %5365 = vmatpush3.msra.mxu0 %v1268_v37  ;;  %1255 = vrot.lane.b32.xlu0 %v6494_v40, %s6004_s15 }
 0x6f4   :  { %5366 = vmatprep.subr.mxu0 %v1266_v43  ;;  %v1264_v44 = vpop.permute.xlu1 %1263 }
 0x6f5   :  { %5367 = vmatpush3.msra.mxu0 %v1266_v43 }
 0x6f6   :  { %v6498_v56 = vpop.eup %5819  ;;  %5368 = vmatprep.subr.mxu0 %v1264_v44 }
 0x6f7   :  { %v5822_v57 = vpop.eup %5821  ;;  %5369 = vmatpush3.msra.mxu0 %v1264_v44  ;;  %1259 = vrot.lane.b32.xlu0 %v6498_v56, %s6004_s15 }
 0x6f8   :  { %1257 = vrot.lane.b32.xlu1 %v5822_v57, %s6004_s15  ;;  %5396 = vmatprep.subr.mxu0 %v6158_v46 }
 0x6fa   :  { %v5824_v26 = vpop.eup %5823 }
 0x6fb   :  { %1088 = vrot.lane.b32.xlu0 %v6340_v10, %s6010_s4 }
 0x6fc   :  { %1261 = vrot.lane.b32.xlu1 %v5824_v26, %s6004_s15 }
 0x6ff   :  { %1084 = vrot.lane.b32.xlu0 %v6326_v5, %s6010_s4 }
 0x700   :  { %1086 = vrot.lane.b32.xlu1 %v6342_v12, %s6010_s4 }
 0x703   :  { %1080 = vrot.lane.b32.xlu0 %v6330_v6, %s6010_s4 }
 0x704   :  { %1082 = vrot.lane.b32.xlu1 %v6336_v8, %s6010_s4 }
 0x708   :  { %1078 = vrot.lane.b32.xlu1 %v6322_v1, %s6010_s4 }
 0x75f   :  { %v1254_v0 = vpop.permute.xlu1 %1253 }
 0x761   :  { %v1252_v63 = vpop.permute.xlu0 %1251 }
 0x762   :  { %5370 = vmatprep.mubr.msk.f32.mxu0 %vm1022_vm2, %v1252_v63 }
 0x763   :  { %5371 = vmatmul.mubr.msk.f32.vlgmr.msra.gmra.mxu0 %vm1022_vm2, %v1254_v0 }
 0x764   :  { %5397 = vmatpush3.msra.mxu0 %v6158_v46 }
 0x765   :  { %v1256_v5 = vpop.permute.xlu0 %1255  ;;  %5398 = vmatprep.subr.mxu0 %v6163_v47 }
 0x766   :  { %5373 = vmatprep.mubr.msk.f32.mxu0 %vm1022_vm2, %v1256_v5  ;;  %5399 = vmatpush3.msra.mxu0 %v6163_v47 }
 0x767   :  { %5400 = vmatprep.subr.mxu0 %v6170_v48 }
 0x768   :  { %5401 = vmatpush3.msra.mxu0 %v6170_v48 }
 0x769   :  { %v1260_v1 = vpop.permute.xlu0 %1259  ;;  %5402 = vmatprep.subr.mxu0 %v6177_v49 }
 0x76a   :  { %v1258_v6 = vpop.permute.xlu1 %1257  ;;  %5403 = vmatpush3.msra.mxu0 %v6177_v49 }
 0x76b   :  { %5374 = vmatmul.mubr.msk.f32.gmra.mxu0 %vm1022_vm2, %v1258_v6  ;;  %5404 = vmatprep.subr.mxu0 %v6184_v50 }
 0x76c   :  { %5376 = vmatprep.mubr.msk.f32.mxu0 %vm1022_vm2, %v1260_v1  ;;  %5405 = vmatpush3.msra.mxu0 %v6184_v50 }
 0x76d   :  { %v1089_v46 = vpop.permute.xlu0 %1088  ;;  %5406 = vmatprep.subr.mxu0 %v6193_v51 }
 0x76e   :  { %v1262_v47 = vpop.permute.xlu1 %1261  ;;  %5337 = vmatprep.subr.mxu1 %v1089_v46  ;;  %5407 = vmatpush3.msra.mxu0 %v6193_v51 }
 0x76f   :  { %5377 = vmatmul.mubr.msk.f32.gmra.mxu0 %vm1022_vm2, %v1262_v47  ;;  %5338 = vmatpush3.msra.mxu1 %v1089_v46 }
 0x770   :  { %5408 = vmatprep.subr.mxu0 %v6199_v52 }
 0x771   :  { %5409 = vmatpush3.msra.mxu0 %v6199_v52  ;;  %v1085_v49 = vpop.permute.xlu0 %1084  ;;  %v6011_v52 = vmov 16  }
 0x772   :  { %v1087_v48 = vpop.permute.xlu1 %1086  ;;  %5410 = vmatprep.subr.mxu0 %v6207_v53  ;;  %5774 = vset.pattern.permute.xlu1 %v6011_v52 }
 0x773   :  { %5339 = vmatprep.subr.mxu1 %v1087_v48  ;;  %5411 = vmatpush3.msra.mxu0 %v6207_v53 }
 0x774   :  { %5340 = vmatpush3.msra.mxu1 %v1087_v48  ;;  %5773 = vset.pattern.permute.xlu0 %v6011_v52 }
 0x775   :  { %5341 = vmatprep.subr.mxu1 %v1085_v49  ;;  %v1081_v51 = vpop.permute.xlu0 %1080 }
 0x776   :  { %v1083_v50 = vpop.permute.xlu1 %1082  ;;  %5342 = vmatpush3.msra.mxu1 %v1085_v49 }
 0x777   :  { %5343 = vmatprep.subr.mxu1 %v1083_v50 }
 0x778   :  { %5344 = vmatpush3.msra.mxu1 %v1083_v50 }
 0x779   :  { %5345 = vmatprep.subr.mxu1 %v1081_v51 }
 0x77a   :  { %v1079_v8 = vpop.permute.xlu1 %1078  ;;  %5346 = vmatpush3.msra.mxu1 %v1081_v51 }
 0x77b   :  { %5347 = vmatprep.subr.mxu1 %v1079_v8 }
 0x77c   :  { %5348 = vmatpush3.msra.mxu1 %v1079_v8 }
 0x77d   :  { %5350 = vmatmul.mubr.msk.f32.vlgmr.msra.gmra.mxu1 %vm1022_vm2, %v6488_v33  ;;  %v1462_v33 = vld [vmem:[%s7577_s6 + $0x10] sm:$0xff]  ;;  %5379 = vmatprep.subr.mxu1 %v1463_v23 }
 0x77e   :  { %5352 = vmatprep.mubr.msk.f32.mxu1 %vm1022_vm2, %v6494_v40  ;;  %5380 = vmatpush3.msra.mxu1 %v1463_v23 }
 0x77f   :  { %5381 = vmatprep.subr.mxu1 %v1462_v33 }
 0x780   :  { %5382 = vmatpush3.msra.mxu1 %v1462_v33 }
 0x781   :  { %5353 = vmatmul.mubr.msk.f32.gmra.mxu1 %vm1022_vm2, %v5822_v57  ;;  %5383 = vmatprep.subr.mxu1 %v1461_v35 }
 0x782   :  { %5355 = vmatprep.mubr.msk.f32.mxu1 %vm1022_vm2, %v6498_v56  ;;  %5384 = vmatpush3.msra.mxu1 %v1461_v35 }
 0x783   :  { %5385 = vmatprep.subr.mxu1 %v1460_v36 }
 0x784   :  { %5386 = vmatpush3.msra.mxu1 %v1460_v36 }
 0x785   :  { %5356 = vmatmul.mubr.msk.f32.gmra.mxu1 %vm1022_vm2, %v5824_v26 }
 0x823   :  { %v6548_v53 = vpop.f32.mrf.mxu0 }
 0x824   :  { %5825 = vrcp.f32 %v6548_v53 }
 0x825   :  { %v6551_v10 = vpop.f32.mrf.mxu0 }
 0x826   :  { %5827 = vrcp.f32 %v6551_v10 }
 0x82b   :  { %v6554_v12 = vpop.f32.mrf.mxu0 }
 0x82c   :  { %5829 = vrcp.f32 %v6554_v12 }
 0x82d   :  { %v6557_v4 = vpop.f32.mrf.mxu0 }
 0x82e   :  { %5831 = vrcp.f32 %v6557_v4 }
 0x82f   :  { %v6560_v45 = vpop.f32.mrf.mxu0 }
 0x830   :  { %5833 = vrcp.f32 %v6560_v45 }
 0x831   :  { %v5826_v7 = vpop.eup %5825  ;;  %v6563_v9 = vpop.f32.mrf.mxu0 }
 0x832   :  { %5835 = vrcp.f32 %v6563_v9  ;;  %1401 = vperm.xlu1 %5774, %v5826_v7  }
 0x833   :  { %v5828_v13 = vpop.eup %5827 }
 0x834   :  { %1396 = vperm.xlu0 %5773, %v5828_v13  }
 0x839   :  { %v5830_v14 = vpop.eup %5829 }
 0x83a   :  { %1411 = vperm.xlu0 %5773, %v5830_v14  }
 0x83b   :  { %v5832_v15 = vpop.eup %5831 }
 0x83c   :  { %1406 = vperm.xlu1 %5774, %v5832_v15  }
 0x83d   :  { %v5834_v16 = vpop.eup %5833  ;;  %v6566_v18 = vpop.f32.mrf.mxu1 }
 0x83e   :  { %5837 = vrcp.f32 %v6566_v18  ;;  %1421 = vperm.xlu0 %5773, %v5834_v16  }
 0x83f   :  { %v5836_v19 = vpop.eup %5835  ;;  %v1180_v20 = vpop.f32.mrf.mxu1 }
 0x840   :  { %5839 = vrcp.f32 %v1180_v20  ;;  %1416 = vperm.xlu1 %5774, %v5836_v19  }
 0x841   :  { %v6569_v21 = vpop.f32.mrf.mxu1 }
 0x842   :  { %5841 = vrcp.f32 %v6569_v21 }
 0x843   :  { %v6572_v22 = vpop.f32.mrf.mxu1 }
 0x844   :  { %5843 = vrcp.f32 %v6572_v22 }
 0x845   :  { %v6575_v25 = vpop.f32.mrf.mxu1 }
 0x847   :  { %v6577_v27 = vpop.f32.mrf.mxu1 }
 0x848   :  { %5845 = vrcp.f32 %v6577_v27 }
 0x849   :  { %5847 = vrcp.f32 %v6575_v25 }
 0x84b   :  { %v5838_v28 = vpop.eup %5837 }
 0x84c   :  { %1222 = vperm.xlu0 %5773, %v5838_v28  }
 0x84d   :  { %v5840_v29 = vpop.eup %5839 }
 0x84e   :  { %1217 = vperm.xlu1 %5774, %v5840_v29  }
 0x84f   :  { %v5842_v54 = vpop.eup %5841 }
 0x850   :  { %1232 = vperm.xlu0 %5773, %v5842_v54  }
 0x851   :  { %v5844_v55 = vpop.eup %5843 }
 0x852   :  { %1227 = vperm.xlu1 %5774, %v5844_v55  }
 0x855   :  { %v5846_v17 = vpop.eup %5845 }
 0x856   :  { %1237 = vperm.xlu0 %5773, %v5846_v17   ;;  %5775 = vset.pattern.permute.xlu1 %v5999_v3  ;;  %v5848_v34 = vpop.eup %5847 }
 0x85a   :  { %1242 = vperm.xlu0 %5773, %v5848_v34  }
 0x85e   :  { %5776 = vset.pattern.permute.xlu0 %v5999_v3 }
 0x8ad   :  { %v1402_v37 = vpop.permute.xlu1 %1401 }
 0x8ae   :  { %v1425_v40 = vmul.f32 %v6548_v53, %v1402_v37 }
 0x8af   :  { %v1397_v43 = vpop.permute.xlu0 %1396 }
 0x8b0   :  { %1438 = vrot.lane.b32.xlu1 %v1425_v40, %s6012_s2  ;;  %v1424_v44 = vmul.f32 %v1397_v43, %v6551_v10 }
 0x8b4   :  { %1436 = vrot.lane.b32.xlu1 %v1424_v44, %s6012_s2 }
 0x8b5   :  { %v1412_v56 = vpop.permute.xlu0 %1411 }
 0x8b6   :  { %v1427_v57 = vmul.f32 %v6554_v12, %v1412_v56 }
 0x8b7   :  { %v1407_v26 = vpop.permute.xlu1 %1406 }
 0x8b8   :  { %v1426_v63 = vmul.f32 %v1407_v26, %v6557_v4  ;;  %1442 = vrot.lane.b32.xlu0 %v1427_v57, %s6012_s2 }
 0x8b9   :  { %v1422_v0 = vpop.permute.xlu0 %1421 }
 0x8ba   :  { %v1429_v5 = vmul.f32 %v6560_v45, %v1422_v0  ;;  %1440 = vrot.lane.b32.xlu1 %v1426_v63, %s6012_s2 }
 0x8bb   :  { %v1417_v1 = vpop.permute.xlu1 %1416 }
 0x8bc   :  { %v1428_v6 = vmul.f32 %v1417_v1, %v6563_v9  ;;  %1446 = vrot.lane.b32.xlu0 %v1429_v5, %s6012_s2 }
 0x8be   :  { %1444 = vrot.lane.b32.xlu1 %v1428_v6, %s6012_s2 }
 0x8c7   :  { %v1223_v46 = vpop.permute.xlu0 %1222 }
 0x8c8   :  { %v1246_v53 = vmul.f32 %v6566_v18, %v1223_v46 }
 0x8c9   :  { %v1218_v47 = vpop.permute.xlu1 %1217 }
 0x8ca   :  { %v1245_v8 = vmul.f32 %v1218_v47, %v1180_v20 }
 0x8cb   :  { %v1233_v48 = vpop.permute.xlu0 %1232 }
 0x8cc   :  { %v1248_v13 = vmul.f32 %v6569_v21, %v1233_v48  ;;  %v6627_v21 = vld [vmem:[%s7578_s7] sm:$0x3f] }
 0x8cd   :  { %v1228_v49 = vpop.permute.xlu1 %1227 }
 0x8ce   :  { %v1247_v9 = vmul.f32 %v1228_v49, %v6572_v22 }
 0x8d1   :  { %v1238_v50 = vpop.permute.xlu0 %1237 }
 0x8d2   :  { %v1249_v18 = vmul.f32 %v1238_v50, %v6577_v27  ;;  %v1467_v27 = vrot.slane %v6627_v21, %v6425_v41 }
 0x8d5   :  { %v1243_v10 = vpop.permute.xlu0 %1242 }
 0x8d6   :  { %v1250_v20 = vmul.f32 %v6575_v25, %v1243_v10 }
 0x922   :  { %v1439_v51 = vpop.permute.xlu1 %1438 }
 0x923   :  { %v1455_v45 = vsel %vm735_vm0, %v1246_v53, %v1439_v51 }
 0x926   :  { %v1437_v12 = vpop.permute.xlu1 %1436 }
 0x927   :  { %v1454_v4 = vsel %vm735_vm0, %v1245_v8, %v1437_v12 }
 0x928   :  { %5387 = vmatprep.mubr.msk.f32.mxu1 %vm306_vm14, %v1454_v4 }
 0x929   :  { %5388 = vmatmul.mubr.msk.f32.vlgmr.msra.gmra.mxu1 %vm306_vm14, %v1455_v45 }
 0x92a   :  { %v1443_v7 = vpop.permute.xlu0 %1442 }
 0x92b   :  { %v1457_v16 = vsel %vm735_vm0, %v1248_v13, %v1443_v7 }
 0x92c   :  { %v1441_v14 = vpop.permute.xlu1 %1440 }
 0x92d   :  { %v1456_v15 = vsel %vm735_vm0, %v1247_v9, %v1441_v14 }
 0x92e   :  { %5390 = vmatprep.mubr.msk.f32.mxu1 %vm306_vm14, %v1456_v15  ;;  %v1447_v19 = vpop.permute.xlu0 %1446 }
 0x92f   :  { %5391 = vmatmul.mubr.msk.f32.gmra.mxu1 %vm306_vm14, %v1457_v16  ;;  %v1459_v22 = vsel %vm735_vm0, %v1250_v20, %v1447_v19 }
 0x930   :  { %v1445_v28 = vpop.permute.xlu1 %1444 }
 0x931   :  { %v1458_v29 = vsel %vm735_vm0, %v1249_v18, %v1445_v28  ;;  %v1885_v28 = vld [vmem:[%s7579_s8 + $0x18] sm:$0xff] }
 0x932   :  { %5393 = vmatprep.mubr.msk.f32.mxu1 %vm306_vm14, %v1458_v29  ;;  %5421 = vmatprep.subr.mxu1 %v1885_v28 }
 0x933   :  { %5394 = vmatmul.mubr.msk.f32.gmra.mxu1 %vm306_vm14, %v1459_v22 }
 0x934   :  { %5422 = vmatpush3.msra.mxu1 %v1885_v28 }
 0x9e9   :  { %v5389_v54 = vpop.f32.mrf.mxu1 }
 0x9ea   :  { %v1558_v55 = vadd.f32 %v5389_v54, %v1467_v27 }
 0x9eb   :  { %v1552_v25 = vpop.f32.mrf.mxu1 }
 0x9ec   :  { %v6632_v17 = vadd.f32 %v1558_v55, %v6294_v31  ;;  %v1553_v23 = vadd.f32 %v1552_v25, %v1467_v27 }
 0x9ee   :  { %v1588_v33 = vmul.f32 %v6632_v17, %v6632_v17  ;;  %v6637_v34 = vadd.f32 %v1553_v23, %v6291_v30 }
 0x9ef   :  { %v5392_v35 = vpop.f32.mrf.mxu1 }
 0x9f0   :  { %v1587_v36 = vmul.f32 %v6637_v34, %v6637_v34  ;;  %v1568_v37 = vadd.f32 %v5392_v35, %v1467_v27  ;;  %1601 = vrot.lane.b32.xlu0 %v1588_v33, %s6002_s21 }
 0x9f1   :  { %v1562_v40 = vpop.f32.mrf.mxu1 }
 0x9f2   :  { %v6643_v43 = vadd.f32 %v1568_v37, %v6303_v39  ;;  %v1563_v31 = vadd.f32 %v1562_v40, %v1467_v27  ;;  %1599 = vrot.lane.b32.xlu1 %v1587_v36, %s6002_s21 }
 0x9f3   :  { %v5395_v44 = vpop.f32.mrf.mxu1 }
 0x9f4   :  { %v1590_v56 = vmul.f32 %v6643_v43, %v6643_v43  ;;  %v6649_v30 = vadd.f32 %v1563_v31, %v6301_v38  ;;  %v1578_v57 = vadd.f32 %v5395_v44, %v1467_v27 }
 0x9f5   :  { %v1572_v26 = vpop.f32.mrf.mxu1 }
 0x9f6   :  { %v1589_v63 = vmul.f32 %v6649_v30, %v6649_v30  ;;  %v6654_v0 = vadd.f32 %v1578_v57, %v6313_v61  ;;  %v1573_v39 = vadd.f32 %v1572_v26, %v1467_v27  ;;  %1605 = vrot.lane.b32.xlu0 %v1590_v56, %s6002_s21 }
 0x9f8   :  { %v1592_v5 = vmul.f32 %v6654_v0, %v6654_v0  ;;  %v6660_v1 = vadd.f32 %v1573_v39, %v6311_v59  ;;  %1603 = vrot.lane.b32.xlu1 %v1589_v63, %s6002_s21 }
 0x9fa   :  { %v1591_v38 = vmul.f32 %v6660_v1, %v6660_v1  ;;  %1609 = vrot.lane.b32.xlu0 %v1592_v5, %s6002_s21 }
 0x9fc   :  { %1607 = vrot.lane.b32.xlu1 %v1591_v38, %s6002_s21 }
 0xa62   :  { %v1602_v61 = vpop.permute.xlu0 %1601 }
 0xa63   :  { %v1618_v47 = vsel %vm306_vm14, %v6632_v17, %v1602_v61 }
 0xa64   :  { %v1600_v6 = vpop.permute.xlu1 %1599 }
 0xa65   :  { %v1617_v46 = vsel %vm306_vm14, %v6637_v34, %v1600_v6 }
 0xa66   :  { %5412 = vmatprep.mubr.msk.f32.mxu0 %vm313_vm15, %v1617_v46 }
 0xa67   :  { %5413 = vmatmul.mubr.msk.f32.vlgmr.msra.gmra.mxu0 %vm313_vm15, %v1618_v47 }
 0xa68   :  { %v1606_v59 = vpop.permute.xlu0 %1605 }
 0xa69   :  { %v1620_v50 = vsel %vm306_vm14, %v6643_v43, %v1606_v59  ;;  %v1884_v59 = vld [vmem:[%s7579_s8 + $0x10] sm:$0xff] }
 0xa6a   :  { %v1604_v48 = vpop.permute.xlu1 %1603  ;;  %5423 = vmatprep.subr.mxu1 %v1884_v59 }
 0xa6b   :  { %v1619_v49 = vsel %vm306_vm14, %v6649_v30, %v1604_v48  ;;  %5424 = vmatpush3.msra.mxu1 %v1884_v59 }
 0xa6c   :  { %5415 = vmatprep.mubr.msk.f32.mxu0 %vm313_vm15, %v1619_v49  ;;  %v1610_v51 = vpop.permute.xlu0 %1609  ;;  %v1883_v49 = vld [vmem:[%s7579_s8 + $0x8] sm:$0xff] }
 0xa6d   :  { %5416 = vmatmul.mubr.msk.f32.gmra.mxu0 %vm313_vm15, %v1620_v50  ;;  %v1622_v10 = vsel %vm306_vm14, %v6654_v0, %v1610_v51  ;;  %5425 = vmatprep.subr.mxu1 %v1883_v49  ;;  %v1882_v50 = vld [vmem:[%s7579_s8] sm:$0xff] }
 0xa6e   :  { %v1608_v8 = vpop.permute.xlu1 %1607  ;;  %5426 = vmatpush3.msra.mxu1 %v1883_v49  ;;  %v5973_v49 = vld [vmem:[%s7574_s3 + $0x40] sm:$0xff] }
 0xa6f   :  { %v1621_v53 = vsel %vm306_vm14, %v6660_v1, %v1608_v8  ;;  %5427 = vmatprep.subr.mxu1 %v1882_v50 }
 0xa70   :  { %5418 = vmatprep.mubr.msk.f32.mxu0 %vm313_vm15, %v1621_v53  ;;  %5428 = vmatpush3.msra.mxu1 %v1882_v50  ;;  %v5967_v53 = vld [vmem:[%s7574_s3 + $0x70] sm:$0xff]  ;;  %v5974_v50 = vld [vmem:[%s7574_s3 + $0x38] sm:$0xff] }
 0xa71   :  { %5419 = vmatmul.mubr.msk.f32.gmra.mxu0 %vm313_vm15, %v1622_v10  ;;  %5463 = vmatprep.subr.mxu1 %v5967_v53 }
 0xb27   :  { %v5414_v12 = vpop.f32.mrf.mxu0 }
 0xb28   :  { %v1737_v4 = vmul.f32 %v5414_v12, %v5414_v12 }
 0xb29   :  { %v1707_v45 = vpop.f32.mrf.mxu0 }
 0xb2a   :  { %v1736_v7 = vmul.f32 %v1707_v45, %v1707_v45  ;;  %1750 = vrot.lane.b32.xlu0 %v1737_v4, %s6003_s22 }
 0xb2c   :  { %1748 = vrot.lane.b32.xlu1 %v1736_v7, %s6003_s22 }
 0xb2d   :  { %v5417_v9 = vpop.f32.mrf.mxu0 }
 0xb2e   :  { %v1739_v13 = vmul.f32 %v5417_v9, %v5417_v9 }
 0xb2f   :  { %v1717_v14 = vpop.f32.mrf.mxu0 }
 0xb30   :  { %v1738_v15 = vmul.f32 %v1717_v14, %v1717_v14  ;;  %1754 = vrot.lane.b32.xlu0 %v1739_v13, %s6003_s22  ;;  %v1864_v13 = vsub.s32 2, %v6422_v60 }
 0xb31   :  { %v6688_v16 = vpop.f32.mrf.mxu0 }
 0xb32   :  { %v1741_v18 = vmul.f32 %v6688_v16, %v6688_v16  ;;  %1752 = vrot.lane.b32.xlu1 %v1738_v15, %s6003_s22 }
 0xb33   :  { %v1727_v19 = vpop.f32.mrf.mxu0 }
 0xb34   :  { %v1740_v20 = vmul.f32 %v1727_v19, %v1727_v19  ;;  %1758 = vrot.lane.b32.xlu0 %v1741_v18, %s6003_s22  ;;  %v1865_v18 = vrot.slane %v6627_v21, %v1864_v13 }
 0xb36   :  { %1756 = vrot.lane.b32.xlu1 %v1740_v20, %s6003_s22 }
 0xb38   :  { %1785 = vperm.xlu0 %5776, %v5414_v12  }
 0xb3a   :  { %1780 = vperm.xlu1 %5775, %v1707_v45  }
 0xb3c   :  { %1790 = vperm.xlu0 %5776, %v1717_v14  }
 0xb3e   :  { %1795 = vperm.xlu1 %5775, %v5417_v9  }
 0xb40   :  { %5778 = vset.pattern.permute.xlu0 %v5998_v2 }
 0xb42   :  { %1800 = vperm.xlu1 %5775, %v1727_v19  }
 0xb46   :  { %5777 = vset.pattern.permute.xlu1 %v5998_v2 }
 0xb9c   :  { %v1751_v29 = vpop.permute.xlu0 %1750 }
 0xb9d   :  { %v1767_v22 = vsub.f32 %v5414_v12, %v1751_v29 }
 0xb9e   :  { %v1749_v27 = vpop.permute.xlu1 %1748 }
 0xb9f   :  { %v1773_v54 = vmax.f32 %v1767_v22, 0.0  ;;  %v1766_v55 = vsub.f32 %v1707_v45, %v1749_v27 }
 0xba1   :  { %v1815_v25 = vadd.f32 1e-12, %v1773_v54  ;;  %v1772_v23 = vmax.f32 %v1766_v55, 0.0 }
 0xba2   :  { %v1755_v33 = vpop.permute.xlu0 %1754 }
 0xba3   :  { %5849 = vrsqrt.f32 %v1815_v25  ;;  %v1814_v35 = vadd.f32 1e-12, %v1772_v23  ;;  %v1769_v36 = vsub.f32 %v5417_v9, %v1755_v33 }
 0xba4   :  { %v1753_v37 = vpop.permute.xlu1 %1752 }
 0xba5   :  { %v1775_v40 = vmax.f32 %v1769_v36, 0.0  ;;  %v1768_v31 = vsub.f32 %v1717_v14, %v1753_v37  ;;  %5851 = vrsqrt.f32 %v1814_v35 }
 0xba6   :  { %v1759_v44 = vpop.permute.xlu0 %1758 }
 0xba7   :  { %v1817_v56 = vadd.f32 1e-12, %v1775_v40  ;;  %v1774_v57 = vmax.f32 %v1768_v31, 0.0  ;;  %v1771_v26 = vsub.f32 %v6688_v16, %v1759_v44 }
 0xba8   :  { %v1757_v63 = vpop.permute.xlu1 %1756 }
 0xba9   :  { %v1816_v39 = vadd.f32 1e-12, %v1774_v57  ;;  %v1770_v5 = vsub.f32 %v1727_v19, %v1757_v63  ;;  %5853 = vrsqrt.f32 %v1817_v56  ;;  %v1777_v38 = vmax.f32 %v1771_v26, 0.0 }
 0xbaa   :  { %v1874_v19 = vsub.s32 3, %v6422_v60 }
 0xbab   :  { %5855 = vrsqrt.f32 %v1816_v39  ;;  %v1776_v61 = vmax.f32 %v1770_v5, 0.0  ;;  %v1819_v46 = vadd.f32 1e-12, %v1777_v38  ;;  %v5969_v38 = vld [vmem:[%s7574_s3 + $0x60] sm:$0xff] }
 0xbac   :  { %v1875_v27 = vrot.slane %v6627_v21, %v1874_v19 }
 0xbad   :  { %v1818_v6 = vadd.f32 1e-12, %v1776_v61 }
 0xbaf   :  { %5857 = vrsqrt.f32 %v1818_v6 }
 0xbb0   :  { %v5850_v47 = vpop.eup %5849  ;;  %5859 = vrsqrt.f32 %v1819_v46 }
 0xbb1   :  { %1833 = vperm.xlu1 %5777, %v5850_v47   ;;  %v5971_v47 = vld [vmem:[%s7574_s3 + $0x50] sm:$0xff] }
 0xbb2   :  { %v5852_v48 = vpop.eup %5851 }
 0xbb3   :  { %v1786_v9 = vpop.permute.xlu0 %1785 }
 0xbb4   :  { %v1809_v14 = vsub.f32 %v6632_v17, %v1786_v9  ;;  %v4796_v9 = vld [vmem:[%s7579_s8 + $0x20] ss:$0 sm:$0xff] }
 0xbb5   :  { %1828 = vperm.xlu1 %5777, %v5852_v48   ;;  %v1781_v4 = vpop.permute.xlu1 %1780  ;;  %v5972_v48 = vld [vmem:[%s7574_s3 + $0x48] sm:$0xff] }
 0xbb6   :  { %v5854_v51 = vpop.eup %5853  ;;  %v1808_v20 = vsub.f32 %v6637_v34, %v1781_v4  ;;  %v2060_v4 = vld [vmem:[%s7580_s9 + $0x10] sm:$0xff] }
 0xbb7   :  { %v1791_v28 = vpop.permute.xlu0 %1790 }
 0xbb8   :  { %v5856_v8 = vpop.eup %5855  ;;  %v1810_v17 = vsub.f32 %v6649_v30, %v1791_v28 }
 0xbb9   :  { %1838 = vperm.xlu0 %5778, %v5856_v8   ;;  %1843 = vperm.xlu1 %5777, %v5854_v51   ;;  %v1796_v45 = vpop.permute.xlu1 %1795  ;;  %v2065_v51 = vld [vmem:[%s7580_s9 + $0x38] sm:$0xff]  ;;  %v2064_v8 = vld [vmem:[%s7580_s9 + $0x30] sm:$0xff] }
 0xbba   :  { %v1811_v55 = vsub.f32 %v6643_v43, %v1796_v45  ;;  %5438 = vmatprep.subr.mxu0 %v2065_v51  ;;  %v2059_v45 = vld [vmem:[%s7580_s9 + $0x8] sm:$0xff] }
 0xbbb   :  { %5439 = vmatpush3.msra.mxu0 %v2065_v51 }
 0xbbc   :  { %v5858_v10 = vpop.eup %5857  ;;  %5440 = vmatprep.subr.mxu0 %v2064_v8 }
 0xbbd   :  { %5779 = vset.pattern.permute.xlu0 %v5999_v3  ;;  %1848 = vperm.xlu1 %5777, %v5858_v10   ;;  %v5860_v12 = vpop.eup %5859  ;;  %v1801_v7 = vpop.permute.xlu1 %1800  ;;  %v2062_v10 = vld [vmem:[%s7580_s9 + $0x20] sm:$0xff] }
 0xbbe   :  { %1805 = vperm.xlu0 %5779, %v6688_v16   ;;  %v1812_v40 = vsub.f32 %v6660_v1, %v1801_v7  ;;  %v5968_v1 = vld [vmem:[%s7574_s3 + $0x68] sm:$0xff]  ;;  %5441 = vmatpush3.msra.mxu0 %v2064_v8  ;;  %v2058_v7 = vld [vmem:[%s7580_s9] sm:$0xff] }
 0xbc1   :  { %1853 = vperm.xlu1 %5777, %v5860_v12   ;;  %v2061_v12 = vld [vmem:[%s7580_s9 + $0x18] sm:$0xff] }
 0xbc5   :  { %5780 = vset.pattern.permute.xlu1 %v5999_v3 }
 0xc2c   :  { %v1834_v15 = vpop.permute.xlu1 %1833 }
 0xc2d   :  { %v1857_v16 = vmul.f32 %v1834_v15, %v1809_v14 }
 0xc2f   :  { %v1867_v54 = vmul.f32 %v1865_v18, %v1857_v16 }
 0xc30   :  { %v1829_v29 = vpop.permute.xlu1 %1828 }
 0xc31   :  { %v1856_v22 = vmul.f32 %v1829_v29, %v1808_v20  ;;  %v6730_v34 = vadd.f32 %v1875_v27, %v1867_v54 }
 0xc33   :  { %v1866_v25 = vmul.f32 %v1865_v18, %v1856_v22 }
 0xc34   :  { %v1839_v23 = vpop.permute.xlu0 %1838  ;;  %v1844_v33 = vpop.permute.xlu1 %1843 }
 0xc35   :  { %v6728_v35 = vadd.f32 %v1875_v27, %v1866_v25  ;;  %v1858_v36 = vmul.f32 %v1839_v23, %v1810_v17  ;;  %v1859_v37 = vmul.f32 %v1844_v33, %v1811_v55 }
 0xc37   :  { %v1868_v31 = vmul.f32 %v1865_v18, %v1858_v36  ;;  %v1869_v44 = vmul.f32 %v1865_v18, %v1859_v37  ;;  %5429 = vmatprep.mubr.msk.f32.mxu1 %vm306_vm14, %v6728_v35 }
 0xc38   :  { %v1849_v56 = vpop.permute.xlu1 %1848  ;;  %5430 = vmatmul.mubr.msk.f32.vlgmr.msra.gmra.mxu1 %vm306_vm14, %v6730_v34 }
 0xc39   :  { %v6737_v43 = vadd.f32 %v1875_v27, %v1868_v31  ;;  %v6739_v30 = vadd.f32 %v1875_v27, %v1869_v44  ;;  %v1860_v57 = vmul.f32 %v1849_v56, %v1812_v40  ;;  %v1806_v26 = vpop.permute.xlu0 %1805  ;;  %5464 = vmatpush3.msra.mxu1 %v5967_v53  ;;  %v2063_v53 = vld [vmem:[%s7580_s9 + $0x28] sm:$0xff] }
 0xc3a   :  { %5465 = vmatprep.subr.mxu1 %v5968_v1  ;;  %v1813_v39 = vsub.f32 %v6654_v0, %v1806_v26  ;;  %v5970_v0 = vld [vmem:[%s7574_s3 + $0x58] sm:$0xff]  ;;  %5442 = vmatprep.subr.mxu0 %v2063_v53 }
 0xc3b   :  { %v1870_v63 = vmul.f32 %v1865_v18, %v1860_v57  ;;  %5432 = vmatprep.mubr.msk.f32.mxu1 %vm306_vm14, %v6737_v43  ;;  %5466 = vmatpush3.msra.mxu1 %v5968_v1 }
 0xc3c   :  { %v1854_v5 = vpop.permute.xlu1 %1853  ;;  %5433 = vmatmul.mubr.msk.f32.gmra.mxu1 %vm306_vm14, %v6739_v30  ;;  %5467 = vmatprep.subr.mxu1 %v5969_v38 }
 0xc3d   :  { %v6752_v61 = vadd.f32 %v1875_v27, %v1870_v63  ;;  %v1861_v6 = vmul.f32 %v1854_v5, %v1813_v39  ;;  %5468 = vmatpush3.msra.mxu1 %v5969_v38  ;;  %5443 = vmatpush3.msra.mxu0 %v2063_v53 }
 0xc3e   :  { %5469 = vmatprep.subr.mxu1 %v5970_v0  ;;  %5444 = vmatprep.subr.mxu0 %v2062_v10 }
 0xc3f   :  { %v1871_v46 = vmul.f32 %v1865_v18, %v1861_v6  ;;  %5435 = vmatprep.mubr.msk.f32.mxu1 %vm306_vm14, %v6752_v61  ;;  %5470 = vmatpush3.msra.mxu1 %v5970_v0 }
 0xc40   :  { %5471 = vmatprep.subr.mxu1 %v5971_v47  ;;  %5445 = vmatpush3.msra.mxu0 %v2062_v10 }
 0xc41   :  { %v6762_v59 = vadd.f32 %v1875_v27, %v1871_v46  ;;  %5472 = vmatpush3.msra.mxu1 %v5971_v47  ;;  %5446 = vmatprep.subr.mxu0 %v2061_v12 }
 0xc42   :  { %5473 = vmatprep.subr.mxu1 %v5972_v48  ;;  %5447 = vmatpush3.msra.mxu0 %v2061_v12 }
 0xc43   :  { %5436 = vmatmul.mubr.msk.f32.gmra.mxu1 %vm306_vm14, %v6762_v59  ;;  %5448 = vmatprep.subr.mxu0 %v2060_v4 }
 0xc44   :  { %5474 = vmatpush3.msra.mxu1 %v5972_v48  ;;  %5449 = vmatpush3.msra.mxu0 %v2060_v4 }
 0xc45   :  { %5475 = vmatprep.subr.mxu1 %v5973_v49  ;;  %5450 = vmatprep.subr.mxu0 %v2059_v45 }
 0xc46   :  { %5476 = vmatpush3.msra.mxu1 %v5973_v49  ;;  %5451 = vmatpush3.msra.mxu0 %v2059_v45 }
 0xc47   :  { %5477 = vmatprep.subr.mxu1 %v5974_v50  ;;  %5452 = vmatprep.subr.mxu0 %v2058_v7 }
 0xc48   :  { %5478 = vmatpush3.msra.mxu1 %v5974_v50  ;;  %5453 = vmatpush3.msra.mxu0 %v2058_v7 }
 0xcf8   :  { %v5431_v14 = vpop.f32.mrf.mxu1 }
 0xcf9   :  { %v1981_v15 = vadd.f32 %v5431_v14, %v4796_v9 }
 0xcfa   :  { %v1975_v18 = vpop.f32.mrf.mxu1 }
 0xcfb   :  { %v2011_v16 = vmul.f32 0.044715, %v1981_v15  ;;  %v1976_v20 = vadd.f32 %v4796_v9, %v1975_v18 }
 0xcfc   :  { %v5434_v28 = vpop.f32.mrf.mxu1 }
 0xcfd   :  { %v2017_v29 = vmul.f32 %v2011_v16, %v1981_v15  ;;  %v2010_v22 = vmul.f32 0.044715, %v1976_v20  ;;  %v1991_v27 = vadd.f32 %v5434_v28, %v4796_v9  ;;  %v2004_v18 = vmul.f32 0.5, %v1976_v20 }
 0xcfe   :  { %v1985_v54 = vpop.f32.mrf.mxu1 }
 0xcff   :  { %v2023_v17 = vmul.f32 %v2017_v29, %v1981_v15  ;;  %v2016_v55 = vmul.f32 %v2010_v22, %v1976_v20  ;;  %v2013_v25 = vmul.f32 0.044715, %v1991_v27  ;;  %v1986_v23 = vadd.f32 %v4796_v9, %v1985_v54 }
 0xd00   :  { %v2005_v29 = vmul.f32 0.5, %v1981_v15 }
 0xd01   :  { %v2029_v33 = vadd.f32 %v2023_v17, %v1981_v15  ;;  %v2022_v36 = vmul.f32 %v2016_v55, %v1976_v20  ;;  %v2019_v37 = vmul.f32 %v2013_v25, %v1991_v27  ;;  %v2012_v40 = vmul.f32 0.044715, %v1986_v23 }
 0xd02   :  { %v2006_v25 = vmul.f32 0.5, %v1986_v23 }
 0xd03   :  { %v2035_v31 = vmul.f32 0.7978846, %v2029_v33  ;;  %v2028_v44 = vadd.f32 %v2022_v36, %v1976_v20  ;;  %v2025_v56 = vmul.f32 %v2019_v37, %v1991_v27  ;;  %v2018_v57 = vmul.f32 %v2012_v40, %v1986_v23  ;;  %v5437_v26 = vpop.f32.mrf.mxu1 }
 0xd04   :  { %v2001_v1 = vadd.f32 %v5437_v26, %v4796_v9  ;;  %v2007_v36 = vmul.f32 0.5, %v1991_v27 }
 0xd05   :  { %5861 = vtanh.f32 %v2035_v31  ;;  %v2031_v63 = vadd.f32 %v2025_v56, %v1991_v27  ;;  %v2024_v39 = vmul.f32 %v2018_v57, %v1986_v23  ;;  %v1995_v5 = vpop.f32.mrf.mxu1  ;;  %v2034_v38 = vmul.f32 0.7978846, %v2028_v44 }
 0xd06   :  { %v2015_v6 = vmul.f32 0.044715, %v2001_v1  ;;  %v1996_v0 = vadd.f32 %v4796_v9, %v1995_v5  ;;  %v2009_v57 = vmul.f32 0.5, %v2001_v1  ;;  %v2068_v27 = vsub.s32 1, %v6422_v60 }
 0xd07   :  { %v2030_v46 = vadd.f32 %v2024_v39, %v1986_v23  ;;  %5863 = vtanh.f32 %v2034_v38  ;;  %v2037_v47 = vmul.f32 0.7978846, %v2031_v63 }
 0xd08   :  { %v2021_v48 = vmul.f32 %v2015_v6, %v2001_v1  ;;  %v2014_v49 = vmul.f32 0.044715, %v1996_v0  ;;  %v2008_v44 = vmul.f32 0.5, %v1996_v0  ;;  %v2069_v23 = vrot.slane %v6627_v21, %v2068_v27 }
 0xd09   :  { %v2036_v50 = vmul.f32 0.7978846, %v2030_v46  ;;  %5865 = vtanh.f32 %v2037_v47 }
 0xd0a   :  { %v2027_v51 = vmul.f32 %v2021_v48, %v2001_v1  ;;  %v2020_v8 = vmul.f32 %v2014_v49, %v1996_v0 }
 0xd0b   :  { %5867 = vtanh.f32 %v2036_v50 }
 0xd0c   :  { %v2033_v53 = vadd.f32 %v2027_v51, %v2001_v1  ;;  %v2026_v10 = vmul.f32 %v2020_v8, %v1996_v0 }
 0xd0e   :  { %v2032_v12 = vadd.f32 %v2026_v10, %v1996_v0  ;;  %v2039_v4 = vmul.f32 0.7978846, %v2033_v53 }
 0xd10   :  { %v2038_v45 = vmul.f32 0.7978846, %v2032_v12  ;;  %5869 = vtanh.f32 %v2039_v4 }
 0xd12   :  { %v5862_v7 = vpop.eup %5861  ;;  %5871 = vtanh.f32 %v2038_v45 }
 0xd13   :  { %v2047_v9 = vadd.f32 1.0, %v5862_v7 }
 0xd14   :  { %v5864_v14 = vpop.eup %5863 }
 0xd15   :  { %v2046_v16 = vadd.f32 1.0, %v5864_v14  ;;  %v2053_v17 = vmul.f32 %v2047_v9, %v2005_v29 }
 0xd16   :  { %v5866_v28 = vpop.eup %5865 }
 0xd17   :  { %v2052_v22 = vmul.f32 %v2046_v16, %v2004_v18  ;;  %v2049_v55 = vadd.f32 1.0, %v5866_v28 }
 0xd18   :  { %v5868_v54 = vpop.eup %5867 }
 0xd19   :  { %5454 = vmatprep.mubr.msk.f32.mxu0 %vm313_vm15, %v2052_v22  ;;  %v2048_v33 = vadd.f32 1.0, %v5868_v54  ;;  %v2055_v40 = vmul.f32 %v2049_v55, %v2007_v36 }
 0xd1a   :  { %5455 = vmatmul.mubr.msk.f32.vlgmr.msra.gmra.mxu0 %vm313_vm15, %v2053_v17 }
 0xd1b   :  { %v2054_v37 = vmul.f32 %v2048_v33, %v2006_v25 }
 0xd1d   :  { %v5870_v31 = vpop.eup %5869  ;;  %5457 = vmatprep.mubr.msk.f32.mxu0 %vm313_vm15, %v2054_v37 }
 0xd1e   :  { %5458 = vmatmul.mubr.msk.f32.gmra.mxu0 %vm313_vm15, %v2055_v40  ;;  %v2051_v15 = vadd.f32 1.0, %v5870_v31 }
 0xd1f   :  { %v5872_v20 = vpop.eup %5871 }
 0xd20   :  { %v2050_v56 = vadd.f32 1.0, %v5872_v20  ;;  %v2057_v63 = vmul.f32 %v2051_v15, %v2009_v57 }
 0xd22   :  { %v2056_v26 = vmul.f32 %v2050_v56, %v2008_v44 }
 0xd24   :  { %5460 = vmatprep.mubr.msk.f32.mxu0 %vm313_vm15, %v2056_v26 }
 0xd25   :  { %5461 = vmatmul.mubr.msk.f32.gmra.mxu0 %vm313_vm15, %v2057_v63 }
 0xdda   :  { %v5456_v39 = vpop.f32.mrf.mxu0 }
 0xddb   :  { %v2160_v5 = vadd.f32 %v5456_v39, %v2069_v23 }
 0xddc   :  { %v2154_v38 = vpop.f32.mrf.mxu0 }
 0xddd   :  { %v6813_v6 = vadd.f32 %v2160_v5, %v6730_v34  ;;  %v2155_v0 = vadd.f32 %v2154_v38, %v2069_v23 }
 0xdde   :  { %v5459_v1 = vpop.f32.mrf.mxu0 }
 0xddf   :  { %v2190_v46 = vmul.f32 %v6813_v6, %v6813_v6  ;;  %v6818_v47 = vadd.f32 %v2155_v0, %v6728_v35  ;;  %v2170_v48 = vadd.f32 %v5459_v1, %v2069_v23 }
 0xde0   :  { %v2164_v49 = vpop.f32.mrf.mxu0 }
 0xde1   :  { %v2189_v50 = vmul.f32 %v6818_v47, %v6818_v47  ;;  %v6823_v51 = vadd.f32 %v2170_v48, %v6739_v30  ;;  %v2165_v8 = vadd.f32 %v2164_v49, %v2069_v23  ;;  %2203 = vrot.lane.b32.xlu1 %v2190_v46, %s6002_s21 }
 0xde3   :  { %v2192_v34 = vmul.f32 %v6823_v51, %v6823_v51  ;;  %v6829_v53 = vadd.f32 %v2165_v8, %v6737_v43  ;;  %2201 = vrot.lane.b32.xlu0 %v2189_v50, %s6002_s21 }
 0xde5   :  { %v2191_v35 = vmul.f32 %v6829_v53, %v6829_v53  ;;  %2207 = vrot.lane.b32.xlu1 %v2192_v34, %s6002_s21  ;;  %v5462_v10 = vpop.f32.mrf.mxu0 }
 0xde6   :  { %v2180_v12 = vadd.f32 %v5462_v10, %v2069_v23 }
 0xde7   :  { %2205 = vrot.lane.b32.xlu0 %v2191_v35, %s6002_s21  ;;  %v2174_v30 = vpop.f32.mrf.mxu0 }
 0xde8   :  { %v6837_v4 = vadd.f32 %v2180_v12, %v6762_v59  ;;  %v2175_v45 = vadd.f32 %v2174_v30, %v2069_v23 }
 0xdea   :  { %v2194_v43 = vmul.f32 %v6837_v4, %v6837_v4  ;;  %v6842_v7 = vadd.f32 %v2175_v45, %v6752_v61 }
 0xdec   :  { %v2193_v14 = vmul.f32 %v6842_v7, %v6842_v7  ;;  %2211 = vrot.lane.b32.xlu1 %v2194_v43, %s6002_s21 }
 0xdee   :  { %2209 = vrot.lane.b32.xlu0 %v2193_v14, %s6002_s21 }
 0xe53   :  { %v2204_v9 = vpop.permute.xlu1 %2203 }
 0xe54   :  { %v2220_v16 = vsel %vm306_vm14, %v6813_v6, %v2204_v9 }
 0xe55   :  { %v2202_v18 = vpop.permute.xlu0 %2201 }
 0xe56   :  { %v2219_v59 = vsel %vm306_vm14, %v6818_v47, %v2202_v18 }
 0xe57   :  { %5479 = vmatprep.mubr.msk.f32.mxu1 %vm313_vm15, %v2219_v59  ;;  %v2208_v28 = vpop.permute.xlu1 %2207 }
 0xe58   :  { %5480 = vmatmul.mubr.msk.f32.vlgmr.msra.gmra.mxu1 %vm313_vm15, %v2220_v16  ;;  %v2222_v22 = vsel %vm306_vm14, %v6823_v51, %v2208_v28  ;;  %v4818_v28 = vld [vmem:[%s7576_s5 + $0x40] sm:$0xff] }
 0xe59   :  { %v2206_v61 = vpop.permute.xlu0 %2205  ;;  %5488 = vmatprep.subr.mxu0 %v4818_v28 }
 0xe5a   :  { %v2221_v29 = vsel %vm306_vm14, %v6829_v53, %v2206_v61  ;;  %5489 = vmatpush3.msra.mxu0 %v4818_v28 }
 0xe5b   :  { %5482 = vmatprep.mubr.msk.f32.mxu1 %vm313_vm15, %v2221_v29  ;;  %v4817_v29 = vld [vmem:[%s7576_s5 + $0x38] sm:$0xff] }
 0xe5c   :  { %5483 = vmatmul.mubr.msk.f32.gmra.mxu1 %vm313_vm15, %v2222_v22  ;;  %5490 = vmatprep.subr.mxu0 %v4817_v29 }
 0xe5d   :  { %5491 = vmatpush3.msra.mxu0 %v4817_v29  ;;  %v4821_v29 = vld [vmem:[%s7576_s5 + $0x48] ss:$0 sm:$0xff] }
 0xe5e   :  { %v2212_v54 = vpop.permute.xlu1 %2211 }
 0xe5f   :  { %v2224_v25 = vsel %vm306_vm14, %v6837_v4, %v2212_v54 }
 0xe60   :  { %v2210_v17 = vpop.permute.xlu0 %2209 }
 0xe61   :  { %v2223_v55 = vsel %vm306_vm14, %v6842_v7, %v2210_v17  ;;  %v4816_v17 = vld [vmem:[%s7576_s5 + $0x30] sm:$0xff] }
 0xe62   :  { %5485 = vmatprep.mubr.msk.f32.mxu1 %vm313_vm15, %v2223_v55  ;;  %5492 = vmatprep.subr.mxu0 %v4816_v17 }
 0xe63   :  { %5486 = vmatmul.mubr.msk.f32.gmra.mxu1 %vm313_vm15, %v2224_v25  ;;  %5493 = vmatpush3.msra.mxu0 %v4816_v17  ;;  %v4815_v25 = vld [vmem:[%s7576_s5 + $0x28] sm:$0xff] }
 0xe64   :  { %5494 = vmatprep.subr.mxu0 %v4815_v25 }
 0xe65   :  { %5495 = vmatpush3.msra.mxu0 %v4815_v25 }
 0xf18   :  { %v5481_v33 = vpop.f32.mrf.mxu1 }
 0xf19   :  { %v2339_v36 = vmul.f32 %v5481_v33, %v5481_v33 }
 0xf1a   :  { %v2309_v37 = vpop.f32.mrf.mxu1 }
 0xf1b   :  { %v2338_v40 = vmul.f32 %v2309_v37, %v2309_v37  ;;  %2352 = vrot.lane.b32.xlu1 %v2339_v36, %s6003_s22 }
 0xf1c   :  { %v5484_v31 = vpop.f32.mrf.mxu1 }
 0xf1d   :  { %v2341_v20 = vmul.f32 %v5484_v31, %v5484_v31  ;;  %2350 = vrot.lane.b32.xlu0 %v2338_v40, %s6003_s22 }
 0xf1e   :  { %v2319_v15 = vpop.f32.mrf.mxu1 }
 0xf1f   :  { %v2340_v44 = vmul.f32 %v2319_v15, %v2319_v15  ;;  %2356 = vrot.lane.b32.xlu1 %v2341_v20, %s6003_s22 }
 0xf21   :  { %2354 = vrot.lane.b32.xlu0 %v2340_v44, %s6003_s22 }
 0xf23   :  { %v6870_v56 = vpop.f32.mrf.mxu1 }
 0xf24   :  { %v2343_v57 = vmul.f32 %v6870_v56, %v6870_v56 }
 0xf25   :  { %v2329_v26 = vpop.f32.mrf.mxu1 }
 0xf26   :  { %v2342_v63 = vmul.f32 %v2329_v26, %v2329_v26  ;;  %2360 = vrot.lane.b32.xlu1 %v2343_v57, %s6003_s22 }
 0xf28   :  { %2358 = vrot.lane.b32.xlu0 %v2342_v63, %s6003_s22 }
 0xf2a   :  { %2387 = vperm.xlu1 %5780, %v5481_v33  }
 0xf2c   :  { %2382 = vperm.xlu0 %5779, %v2309_v37  }
 0xf2e   :  { %2392 = vperm.xlu1 %5780, %v2319_v15  }
 0xf30   :  { %2397 = vperm.xlu0 %5779, %v5484_v31  }
 0xf32   :  { %5781 = vset.pattern.permute.xlu1 %v5998_v2 }
 0xf34   :  { %5782 = vset.pattern.permute.xlu0 %v5998_v2 }
 0xf8d   :  { %v2353_v23 = vpop.permute.xlu1 %2352 }
 0xf8e   :  { %v2369_v39 = vsub.f32 %v5481_v33, %v2353_v23 }
 0xf8f   :  { %v2351_v5 = vpop.permute.xlu0 %2350 }
 0xf90   :  { %v2375_v38 = vmax.f32 %v2369_v39, 0.0  ;;  %v2368_v0 = vsub.f32 %v2309_v37, %v2351_v5 }
 0xf91   :  { %v2357_v1 = vpop.permute.xlu1 %2356 }
 0xf92   :  { %v2417_v46 = vadd.f32 1e-12, %v2375_v38  ;;  %v2374_v48 = vmax.f32 %v2368_v0, 0.0  ;;  %v2371_v49 = vsub.f32 %v5484_v31, %v2357_v1 }
 0xf93   :  { %v2355_v50 = vpop.permute.xlu0 %2354 }
 0xf94   :  { %5873 = vrsqrt.f32 %v2417_v46  ;;  %v2416_v8 = vadd.f32 1e-12, %v2374_v48  ;;  %v2377_v34 = vmax.f32 %v2371_v49, 0.0  ;;  %v2370_v35 = vsub.f32 %v2319_v15, %v2355_v50 }
 0xf95   :  { %v2466_v15 = vsub.s32 4, %v6422_v60 }
 0xf96   :  { %5875 = vrsqrt.f32 %v2416_v8  ;;  %v2419_v10 = vadd.f32 1e-12, %v2377_v34  ;;  %v2376_v12 = vmax.f32 %v2370_v35, 0.0 }
 0xf98   :  { %5877 = vrsqrt.f32 %v2419_v10  ;;  %v2418_v30 = vadd.f32 1e-12, %v2376_v12  ;;  %v2361_v45 = vpop.permute.xlu1 %2360 }
 0xf99   :  { %v2373_v43 = vsub.f32 %v6870_v56, %v2361_v45 }
 0xf9a   :  { %v2359_v14 = vpop.permute.xlu0 %2358  ;;  %5879 = vrsqrt.f32 %v2418_v30 }
 0xf9b   :  { %v2372_v9 = vsub.f32 %v2329_v26, %v2359_v14  ;;  %v2379_v59 = vmax.f32 %v2373_v43, 0.0 }
 0xf9d   :  { %v2378_v18 = vmax.f32 %v2372_v9, 0.0  ;;  %v2421_v22 = vadd.f32 1e-12, %v2379_v59 }
 0xf9f   :  { %v2420_v16 = vadd.f32 1e-12, %v2378_v18 }
 0xfa1   :  { %v5874_v61 = vpop.eup %5873  ;;  %5881 = vrsqrt.f32 %v2420_v16 }
 0xfa2   :  { %2435 = vperm.xlu1 %5781, %v5874_v61   ;;  %5883 = vrsqrt.f32 %v2421_v22 }
 0xfa3   :  { %v5876_v54 = vpop.eup %5875 }
 0xfa4   :  { %2430 = vperm.xlu0 %5782, %v5876_v54  }
 0xfa5   :  { %v5878_v55 = vpop.eup %5877  ;;  %v2388_v40 = vpop.permute.xlu1 %2387 }
 0xfa6   :  { %2445 = vperm.xlu1 %5781, %v5878_v55   ;;  %v2411_v57 = vsub.f32 %v6813_v6, %v2388_v40 }
 0xfa7   :  { %v5880_v33 = vpop.eup %5879  ;;  %v2383_v31 = vpop.permute.xlu0 %2382 }
 0xfa8   :  { %5783 = vset.pattern.permute.xlu0 %v5999_v3  ;;  %v2410_v23 = vsub.f32 %v6818_v47, %v2383_v31 }
 0xfa9   :  { %2402 = vperm.xlu0 %5783, %v2329_v26   ;;  %v2393_v20 = vpop.permute.xlu1 %2392  ;;  %v2476_v26 = vsub.s32 5, %v6422_v60 }
 0xfaa   :  { %2440 = vperm.xlu1 %5781, %v5880_v33   ;;  %v2412_v49 = vsub.f32 %v6829_v53, %v2393_v20 }
 0xfab   :  { %v2398_v44 = vpop.permute.xlu0 %2397  ;;  %v2477_v0 = vrot.slane %v6627_v21, %v2476_v26 }
 0xfac   :  { %v2413_v38 = vsub.f32 %v6823_v51, %v2398_v44 }
 0xfad   :  { %5785 = vset.pattern.permute.xlu0 %v5998_v2 }
 0xfae   :  { %v5882_v36 = vpop.eup %5881  ;;  %5784 = vset.pattern.permute.xlu1 %v5999_v3 }
 0xfaf   :  { %2407 = vperm.xlu1 %5784, %v6870_v56   ;;  %2450 = vperm.xlu0 %5785, %v5882_v36   ;;  %v5884_v37 = vpop.eup %5883  ;;  %v2467_v56 = vrot.slane %v6627_v21, %v2466_v15 }
 0xfb3   :  { %5786 = vset.pattern.permute.xlu1 %v5998_v2  ;;  %5787 = vset.pattern.permute.xlu0 %v6011_v52 }
 0xfb4   :  { %2455 = vperm.xlu1 %5786, %v5884_v37  }
 0xfb8   :  { %5788 = vset.pattern.permute.xlu1 %v6011_v52 }
0x101d   :  { %v2436_v63 = vpop.permute.xlu1 %2435 }
0x101e   :  { %v2459_v39 = vmul.f32 %v2436_v63, %v2411_v57 }
0x101f   :  { %v2431_v5 = vpop.permute.xlu0 %2430 }
0x1020   :  { %v2458_v52 = vmul.f32 %v2431_v5, %v2410_v23  ;;  %v2469_v1 = vmul.f32 %v2467_v56, %v2459_v39 }
0x1021   :  { %v2446_v6 = vpop.permute.xlu1 %2445 }
0x1022   :  { %v2468_v46 = vmul.f32 %v2467_v56, %v2458_v52  ;;  %v2461_v48 = vmul.f32 %v2446_v6, %v2413_v38  ;;  %v6912_v8 = vadd.f32 %v2477_v0, %v2469_v1 }
0x1024   :  { %v6910_v50 = vadd.f32 %v2477_v0, %v2468_v46  ;;  %v2403_v34 = vpop.permute.xlu0 %2402  ;;  %v2471_v51 = vmul.f32 %v2467_v56, %v2461_v48 }
0x1025   :  { %v2441_v47 = vpop.permute.xlu1 %2440  ;;  %v2414_v10 = vsub.f32 %v6842_v7, %v2403_v34 }
0x1026   :  { %v2460_v35 = vmul.f32 %v2441_v47, %v2412_v49  ;;  %5496 = vmatprep.mubr.msk.f32.mxu0 %vm306_vm14, %v6910_v50  ;;  %v6921_v45 = vadd.f32 %v2477_v0, %v2471_v51 }
0x1027   :  { %5497 = vmatmul.mubr.msk.f32.vlgmr.msra.gmra.mxu0 %vm306_vm14, %v6912_v8 }
0x1028   :  { %v2470_v21 = vmul.f32 %v2467_v56, %v2460_v35 }
0x102a   :  { %v6919_v12 = vadd.f32 %v2477_v0, %v2470_v21  ;;  %v2408_v53 = vpop.permute.xlu1 %2407  ;;  %v2451_v30 = vpop.permute.xlu0 %2450 }
0x102b   :  { %v2462_v43 = vmul.f32 %v2451_v30, %v2414_v10  ;;  %v2415_v9 = vsub.f32 %v6837_v4, %v2408_v53 }
0x102c   :  { %5499 = vmatprep.mubr.msk.f32.mxu0 %vm306_vm14, %v6919_v12 }
0x102d   :  { %v2472_v14 = vmul.f32 %v2467_v56, %v2462_v43  ;;  %5500 = vmatmul.mubr.msk.f32.gmra.mxu0 %vm306_vm14, %v6921_v45 }
0x102f   :  { %v6928_v18 = vadd.f32 %v2477_v0, %v2472_v14  ;;  %v2456_v59 = vpop.permute.xlu1 %2455 }
0x1030   :  { %v2463_v7 = vmul.f32 %v2456_v59, %v2415_v9 }
0x1031   :  { %5502 = vmatprep.mubr.msk.f32.mxu0 %vm306_vm14, %v6928_v18 }
0x1032   :  { %v2473_v16 = vmul.f32 %v2467_v56, %v2463_v7 }
0x1034   :  { %v6932_v28 = vadd.f32 %v2477_v0, %v2473_v16 }
0x1036   :  { %5503 = vmatmul.mubr.msk.f32.gmra.mxu0 %vm306_vm14, %v6932_v28 }
0x10e7   :  { %v5498_v61 = vpop.f32.mrf.mxu0 }
0x10e8   :  { %v6957_v31 = vadd.f32 %v5498_v61, %v4821_v29 }
0x10e9   :  { %v2580_v22 = vpop.f32.mrf.mxu0 }
0x10ea   :  { %v6939_v4 = vadd.f32 %v4821_v29, %v2580_v22 }
0x10ec   :  { %5517 = vmatprep.mubr.msk.f32.mxu1 %vm735_vm0, %v6939_v4 }
0x10ed   :  { %v5501_v54 = vpop.f32.mrf.mxu0 }
0x10ee   :  { %v6949_v37 = vadd.f32 %v5501_v54, %v4821_v29 }
0x10ef   :  { %v2590_v17 = vpop.f32.mrf.mxu0 }
0x10f0   :  { %v6953_v40 = vadd.f32 %v4821_v29, %v2590_v17 }
0x10f6   :  { %v5504_v55 = vpop.f32.mrf.mxu0 }
0x10f7   :  { %v6943_v25 = vadd.f32 %v5504_v55, %v4821_v29 }
0x10f8   :  { %v2600_v33 = vpop.f32.mrf.mxu0 }
0x10f9   :  { %v6945_v36 = vadd.f32 %v4821_v29, %v2600_v33  ;;  %2768 = vrot.lane.b32.xlu1 %v6943_v25, %s6004_s15 }
0x10fb   :  { %2766 = vrot.lane.b32.xlu0 %v6945_v36, %s6004_s15 }
0x10fd   :  { %2764 = vrot.lane.b32.xlu1 %v6949_v37, %s6004_s15 }
0x10ff   :  { %2762 = vrot.lane.b32.xlu0 %v6953_v40, %s6004_s15 }
0x1101   :  { %2760 = vrot.lane.b32.xlu1 %v6957_v31, %s6004_s15 }
0x1103   :  { %2758 = vrot.lane.b32.xlu0 %v6939_v4, %s6004_s15 }
0x1105   :  { %2746 = vrot.lane.b32.xlu1 %v6939_v4, %s6005_s16 }
0x1107   :  { %2748 = vrot.lane.b32.xlu0 %v6957_v31, %s6005_s16 }
0x1109   :  { %2750 = vrot.lane.b32.xlu1 %v6953_v40, %s6005_s16 }
0x110b   :  { %2752 = vrot.lane.b32.xlu0 %v6949_v37, %s6005_s16 }
0x110d   :  { %2754 = vrot.lane.b32.xlu1 %v6945_v36, %s6005_s16 }
0x110f   :  { %2756 = vrot.lane.b32.xlu0 %v6943_v25, %s6005_s16 }
0x1111   :  { %2625 = vrot.lane.b32.xlu1 %v6943_v25, %s6006_s17 }
0x1113   :  { %2623 = vrot.lane.b32.xlu0 %v6945_v36, %s6006_s17 }
0x1115   :  { %2621 = vrot.lane.b32.xlu1 %v6949_v37, %s6006_s17 }
0x1117   :  { %2619 = vrot.lane.b32.xlu0 %v6953_v40, %s6006_s17 }
0x1119   :  { %2617 = vrot.lane.b32.xlu1 %v6957_v31, %s6006_s17 }
0x111b   :  { %2615 = vrot.lane.b32.xlu0 %v6939_v4, %s6006_s17 }
0x116b   :  { %v2769_v20 = vpop.permute.xlu1 %2768 }
0x116c   :  { %5526 = vmatprep.subr.msk.mxu0 %vm735_vm0, %v2769_v20 }
0x116d   :  { %5527 = vmatpush3.xpose.msk.msra.mxu0 %vm735_vm0, %v2769_v20  ;;  %v2767_v44 = vpop.permute.xlu0 %2766 }
0x116e   :  { %5528 = vmatprep.subr.msk.mxu0 %vm735_vm0, %v2767_v44 }
0x116f   :  { %v2765_v57 = vpop.permute.xlu1 %2764 }
0x1171   :  { %5529 = vmatpush3.xpose.msk.msra.mxu0 %vm735_vm0, %v2767_v44  ;;  %v2763_v56 = vpop.permute.xlu0 %2762 }
0x1172   :  { %5530 = vmatprep.subr.msk.mxu0 %vm735_vm0, %v2765_v57 }
0x1173   :  { %v2761_v63 = vpop.permute.xlu1 %2760 }
0x1175   :  { %5531 = vmatpush3.xpose.msk.msra.mxu0 %vm735_vm0, %v2765_v57  ;;  %v2759_v23 = vpop.permute.xlu0 %2758 }
0x1176   :  { %5532 = vmatprep.subr.msk.mxu0 %vm735_vm0, %v2763_v56 }
0x1177   :  { %v2747_v39 = vpop.permute.xlu1 %2746 }
0x1178   :  { %5538 = vmatprep.mubr.msk.f32.mxu0 %vm735_vm0, %v2747_v39 }
0x1179   :  { %5533 = vmatpush3.xpose.msk.msra.mxu0 %vm735_vm0, %v2763_v56  ;;  %v2749_v5 = vpop.permute.xlu0 %2748 }
0x117a   :  { %5534 = vmatprep.subr.msk.mxu0 %vm735_vm0, %v2761_v63 }
0x117b   :  { %v2751_v52 = vpop.permute.xlu1 %2750 }
0x117d   :  { %5535 = vmatpush3.xpose.msk.msra.mxu0 %vm735_vm0, %v2761_v63  ;;  %v2753_v38 = vpop.permute.xlu0 %2752 }
0x117e   :  { %5536 = vmatprep.subr.msk.mxu0 %vm735_vm0, %v2759_v23 }
0x117f   :  { %v2755_v0 = vpop.permute.xlu1 %2754 }
0x1181   :  { %5537 = vmatpush3.xpose.msk.msra.mxu0 %vm735_vm0, %v2759_v23  ;;  %v2757_v1 = vpop.permute.xlu0 %2756 }
0x1183   :  { %v2626_v6 = vpop.permute.xlu1 %2625 }
0x1184   :  { %5505 = vmatprep.subr.msk.mxu1 %vm735_vm0, %v2626_v6  ;;  %5539 = vmatmul.mubr.msk.f32.vlgmr.msra.gmra.mxu0 %vm735_vm0, %v2749_v5 }
0x1185   :  { %5506 = vmatpush3.xpose.msk.msra.mxu1 %vm735_vm0, %v2626_v6  ;;  %5541 = vmatprep.mubr.msk.f32.mxu0 %vm735_vm0, %v2751_v52  ;;  %v2624_v46 = vpop.permute.xlu0 %2623 }
0x1186   :  { %5507 = vmatprep.subr.msk.mxu1 %vm735_vm0, %v2624_v46 }
0x1187   :  { %v2622_v48 = vpop.permute.xlu1 %2621 }
0x1188   :  { %5542 = vmatmul.mubr.msk.f32.gmra.mxu0 %vm735_vm0, %v2753_v38 }
0x1189   :  { %5508 = vmatpush3.xpose.msk.msra.mxu1 %vm735_vm0, %v2624_v46  ;;  %5544 = vmatprep.mubr.msk.f32.mxu0 %vm735_vm0, %v2755_v0  ;;  %v2620_v49 = vpop.permute.xlu0 %2619 }
0x118a   :  { %5509 = vmatprep.subr.msk.mxu1 %vm735_vm0, %v2622_v48 }
0x118b   :  { %v2618_v47 = vpop.permute.xlu1 %2617 }
0x118c   :  { %5545 = vmatmul.mubr.msk.f32.gmra.mxu0 %vm735_vm0, %v2757_v1 }
0x118d   :  { %5510 = vmatpush3.xpose.msk.msra.mxu1 %vm735_vm0, %v2622_v48  ;;  %v2616_v34 = vpop.permute.xlu0 %2615 }
0x118e   :  { %5511 = vmatprep.subr.msk.mxu1 %vm735_vm0, %v2620_v49 }
0x1191   :  { %5512 = vmatpush3.xpose.msk.msra.mxu1 %vm735_vm0, %v2620_v49 }
0x1192   :  { %5513 = vmatprep.subr.msk.mxu1 %vm735_vm0, %v2618_v47 }
0x1195   :  { %5514 = vmatpush3.xpose.msk.msra.mxu1 %vm735_vm0, %v2618_v47 }
0x1196   :  { %5515 = vmatprep.subr.msk.mxu1 %vm735_vm0, %v2616_v34 }
0x1199   :  { %5516 = vmatpush3.xpose.msk.msra.mxu1 %vm735_vm0, %v2616_v34 }
0x119c   :  { %5518 = vmatmul.mubr.msk.f32.vlgmr.msra.gmra.mxu1 %vm735_vm0, %v6957_v31 }
0x119d   :  { %5520 = vmatprep.mubr.msk.f32.mxu1 %vm735_vm0, %v6953_v40 }
0x11a0   :  { %5521 = vmatmul.mubr.msk.f32.gmra.mxu1 %vm735_vm0, %v6949_v37 }
0x11a1   :  { %5523 = vmatprep.mubr.msk.f32.mxu1 %vm735_vm0, %v6945_v36 }
0x11a4   :  { %5524 = vmatmul.mubr.msk.f32.gmra.mxu1 %vm735_vm0, %v6943_v25 }
0x1244   :  { %v5540_v35 = vpop.f32.mrf.mxu0 }
0x1245   :  { %2897 = vrot.lane.b32.xlu0 %v5540_v35, %s6007_s18 }
0x1246   :  { %v2860_v51 = vpop.f32.mrf.mxu0 }
0x1247   :  { %2895 = vrot.lane.b32.xlu1 %v2860_v51, %s6007_s18 }
0x1248   :  { %v5543_v21 = vpop.f32.mrf.mxu0 }
0x1249   :  { %2901 = vrot.lane.b32.xlu0 %v5543_v21, %s6007_s18 }
0x124a   :  { %v2870_v10 = vpop.f32.mrf.mxu0 }
0x124b   :  { %2899 = vrot.lane.b32.xlu1 %v2870_v10, %s6007_s18 }
0x124c   :  { %v5546_v53 = vpop.f32.mrf.mxu0 }
0x124d   :  { %2905 = vrot.lane.b32.xlu0 %v5546_v53, %s6007_s18 }
0x124e   :  { %v2880_v30 = vpop.f32.mrf.mxu0 }
0x124f   :  { %2903 = vrot.lane.b32.xlu1 %v2880_v30, %s6007_s18 }
0x125c   :  { %v5519_v43 = vpop.f32.mrf.mxu1 }
0x125e   :  { %v2717_v14 = vpop.f32.mrf.mxu1 }
0x1260   :  { %v5522_v9 = vpop.f32.mrf.mxu1 }
0x1262   :  { %v2727_v16 = vpop.f32.mrf.mxu1 }
0x1264   :  { %v5525_v20 = vpop.f32.mrf.mxu1 }
0x1266   :  { %v2737_v0 = vpop.f32.mrf.mxu1 }
0x12b7   :  { %v2898_v59 = vpop.permute.xlu0 %2897 }
0x12b8   :  { %v2914_v7 = vsel %vm1022_vm2, %v5519_v43, %v2898_v59 }
0x12b9   :  { %v2920_v61 = vmul.f32 0.25, %v2914_v7  ;;  %v2896_v29 = vpop.permute.xlu1 %2895 }
0x12ba   :  { %v2913_v22 = vsel %vm1022_vm2, %v2717_v14, %v2896_v29 }
0x12bb   :  { %v2919_v54 = vmul.f32 0.25, %v2913_v22  ;;  %v2902_v17 = vpop.permute.xlu0 %2901  ;;  %v2926_v55 = vadd.f32 %v2920_v61, %v6434_v62 }
0x12bc   :  { %v2916_v33 = vsel %vm1022_vm2, %v5522_v9, %v2902_v17 }
0x12bd   :  { %v2922_v44 = vmul.f32 0.25, %v2916_v33  ;;  %v2900_v57 = vpop.permute.xlu1 %2899  ;;  %v2934_v56 = vsel %vm1041_vm3, %v2926_v55, -inf  ;;  %v2925_v63 = vadd.f32 %v2919_v54, %v6437_v11 }
0x12be   :  { %v2915_v23 = vsel %vm1022_vm2, %v2727_v16, %v2900_v57  ;;  %2935 = vmax.xlane.f32.xlu0 %v2934_v56 }
0x12bf   :  { %v2921_v39 = vmul.f32 0.25, %v2915_v23  ;;  %v2906_v5 = vpop.permute.xlu0 %2905  ;;  %v2931_v52 = vsel %vm1041_vm3, %v2925_v63, -inf  ;;  %v2928_v38 = vadd.f32 %v2922_v44, %v6457_v32 }
0x12c0   :  { %v2918_v62 = vsel %vm1022_vm2, %v5525_v20, %v2906_v5  ;;  %2932 = vmax.xlane.f32.xlu1 %v2931_v52 }
0x12c1   :  { %v2924_v1 = vmul.f32 0.25, %v2918_v62  ;;  %v2904_v6 = vpop.permute.xlu1 %2903  ;;  %v2927_v46 = vadd.f32 %v2921_v39, %v6450_v24  ;;  %v2940_v47 = vsel %vm1041_vm3, %v2928_v38, -inf }
0x12c2   :  { %v2917_v48 = vsel %vm1022_vm2, %v2737_v0, %v2904_v6  ;;  %v7127_v6 = vld [vmem:[%s7574_s3 + $0x58] sm:$0xff] }
0x12c3   :  { %v2923_v11 = vmul.f32 0.25, %v2917_v48  ;;  %v2937_v49 = vsel %vm1041_vm3, %v2927_v46, -inf  ;;  %v2930_v34 = vadd.f32 %v2924_v1, %v6467_v42 }
0x12c4   :  { %2938 = vmax.xlane.f32.xlu0 %v2937_v49  ;;  %2941 = vmax.xlane.f32.xlu1 %v2940_v47  ;;  %v7143_v49 = vld [vmem:[%s7574_s3 + $0x48] sm:$0xff]  ;;  %v7150_v47 = vld [vmem:[%s7574_s3 + $0x40] sm:$0xff] }
0x12c5   :  { %v2929_v32 = vadd.f32 %v2923_v11, %v6464_v58  ;;  %v2946_v51 = vsel %vm1041_vm3, %v2930_v34, -inf }
0x12c7   :  { %v2943_v35 = vsel %vm1041_vm3, %v2929_v32, -inf }
0x12c8   :  { %2944 = vmax.xlane.f32.xlu0 %v2943_v35  ;;  %2947 = vmax.xlane.f32.xlu1 %v2946_v51  ;;  %v7157_v35 = vld [vmem:[%s7574_s3 + $0x38] sm:$0xff] }
0x12d9   :  { %3160 = vrot.lane.b32.xlu1 %v6945_v36, %s6009_s13 }
0x12dd   :  { %3158 = vrot.lane.b32.xlu1 %v6949_v37, %s6009_s13 }
0x12de   :  { %3162 = vrot.lane.b32.xlu0 %v6943_v25, %s6009_s13 }
0x12e1   :  { %3154 = vrot.lane.b32.xlu1 %v6957_v31, %s6009_s13 }
0x12e2   :  { %3156 = vrot.lane.b32.xlu0 %v6953_v40, %s6009_s13 }
0x12e6   :  { %3152 = vrot.lane.b32.xlu0 %v6939_v4, %s6009_s13 }
0x1347   :  { %v2936_v24 = vpop.xlane.xlu0 %2935 }
0x1348   :  { %v2950_v58 = vsub.f32 %v2926_v55, %v2936_v24 }
0x1349   :  { %v2933_v42 = vpop.xlane.xlu1 %2932 }
0x134a   :  { %v2957_v21 = vmul.f32 1.442695, %v2950_v58  ;;  %v2949_v10 = vsub.f32 %v2925_v63, %v2933_v42 }
0x134c   :  { %5885 = vpow2.f32 %v2957_v21  ;;  %v2955_v53 = vmul.f32 1.442695, %v2949_v10 }
0x134d   :  { %v2942_v30 = vpop.xlane.xlu1 %2941  ;;  %v2939_v43 = vpop.xlane.xlu0 %2938 }
0x134e   :  { %5887 = vpow2.f32 %v2955_v53  ;;  %v2952_v14 = vsub.f32 %v2928_v38, %v2942_v30  ;;  %v2951_v9 = vsub.f32 %v2927_v46, %v2939_v43  ;;  %v7084_v38 = vld [vmem:[%s7574_s3 + $0x70] sm:$0xff] }
0x134f   :  { %v7136_v46 = vld [vmem:[%s7574_s3 + $0x50] sm:$0xff] }
0x1350   :  { %v2961_v59 = vmul.f32 1.442695, %v2952_v14  ;;  %v2959_v7 = vmul.f32 1.442695, %v2951_v9 }
0x1351   :  { %v2948_v16 = vpop.xlane.xlu1 %2947  ;;  %v2945_v61 = vpop.xlane.xlu0 %2944 }
0x1352   :  { %5889 = vpow2.f32 %v2961_v59  ;;  %v2954_v29 = vsub.f32 %v2930_v34, %v2948_v16  ;;  %v2953_v22 = vsub.f32 %v2929_v32, %v2945_v61 }
0x1353   :  { %5891 = vpow2.f32 %v2959_v7 }
0x1354   :  { %v2965_v54 = vmul.f32 1.442695, %v2954_v29  ;;  %v2963_v17 = vmul.f32 1.442695, %v2953_v22 }
0x1355   :  { %v3161_v55 = vpop.permute.xlu1 %3160  ;;  %v3163_v33 = vpop.permute.xlu0 %3162 }
0x1356   :  { %5893 = vpow2.f32 %v2965_v54  ;;  %5568 = vmatprep.subr.mxu0 %v3163_v33 }
0x1357   :  { %5895 = vpow2.f32 %v2963_v17  ;;  %5569 = vmatpush3.msra.mxu0 %v3163_v33 }
0x1358   :  { %5570 = vmatprep.subr.mxu0 %v3161_v55 }
0x1359   :  { %v7065_v20 = vpop.eup %5885  ;;  %v3159_v44 = vpop.permute.xlu1 %3158  ;;  %5571 = vmatpush3.msra.mxu0 %v3161_v55 }
0x135a   :  { %v3157_v57 = vpop.permute.xlu0 %3156  ;;  %3142 = vrot.lane.b32.xlu0 %v7065_v20, %s6004_s15  ;;  %5572 = vmatprep.subr.mxu0 %v3159_v44 }
0x135b   :  { %v5888_v56 = vpop.eup %5887  ;;  %5573 = vmatpush3.msra.mxu0 %v3159_v44 }
0x135c   :  { %5559 = vmatprep.mubr.msk.f32.mxu1 %vm1022_vm2, %v5888_v56  ;;  %3140 = vrot.lane.b32.xlu1 %v5888_v56, %s6004_s15 }
0x135d   :  { %5574 = vmatprep.subr.mxu0 %v3157_v57  ;;  %v3155_v63 = vpop.permute.xlu1 %3154 }
0x135e   :  { %5575 = vmatpush3.msra.mxu0 %v3157_v57  ;;  %v3153_v5 = vpop.permute.xlu0 %3152 }
0x135f   :  { %v7071_v23 = vpop.eup %5889  ;;  %5576 = vmatprep.subr.mxu0 %v3155_v63 }
0x1360   :  { %v7073_v39 = vpop.eup %5891  ;;  %5577 = vmatpush3.msra.mxu0 %v3155_v63  ;;  %3146 = vrot.lane.b32.xlu0 %v7071_v23, %s6004_s15  ;;  %v4867_v63 = vld [vmem:[%s7577_s6 + $0x38] sm:$0xff] }
0x1361   :  { %3144 = vrot.lane.b32.xlu1 %v7073_v39, %s6004_s15  ;;  %5578 = vmatprep.subr.mxu0 %v3153_v5 }
0x1362   :  { %5579 = vmatpush3.msra.mxu0 %v3153_v5  ;;  %v4865_v5 = vld [vmem:[%s7577_s6 + $0x28] sm:$0xff] }
0x1363   :  { %v7079_v52 = vpop.eup %5893  ;;  %5606 = vmatprep.subr.mxu0 %v7084_v38 }
0x1364   :  { %v7087_v62 = vpop.eup %5895  ;;  %3150 = vrot.lane.b32.xlu0 %v7079_v52, %s6004_s15 }
0x1365   :  { %3148 = vrot.lane.b32.xlu1 %v7087_v62, %s6004_s15 }
0x1368   :  { %2975 = vrot.lane.b32.xlu0 %v6945_v36, %s6010_s4  ;;  %v7111_v36 = vld [vmem:[%s7574_s3 + $0x68] sm:$0xff] }
0x1369   :  { %2977 = vrot.lane.b32.xlu1 %v6943_v25, %s6010_s4 }
0x136c   :  { %2971 = vrot.lane.b32.xlu0 %v6953_v40, %s6010_s4 }
0x136d   :  { %2973 = vrot.lane.b32.xlu1 %v6949_v37, %s6010_s4  ;;  %v7119_v37 = vld [vmem:[%s7574_s3 + $0x60] sm:$0xff] }
0x1370   :  { %2967 = vrot.lane.b32.xlu0 %v6939_v4, %s6010_s4 }
0x1371   :  { %2969 = vrot.lane.b32.xlu1 %v6957_v31, %s6010_s4 }
0x13cc   :  { %v3143_v0 = vpop.permute.xlu0 %3142 }
0x13ce   :  { %v3141_v1 = vpop.permute.xlu1 %3140 }
0x13cf   :  { %5580 = vmatprep.mubr.msk.f32.mxu0 %vm1022_vm2, %v3141_v1 }
0x13d0   :  { %5581 = vmatmul.mubr.msk.f32.vlgmr.msra.gmra.mxu0 %vm1022_vm2, %v3143_v0 }
0x13d1   :  { %5607 = vmatpush3.msra.mxu0 %v7084_v38 }
0x13d2   :  { %v3147_v25 = vpop.permute.xlu0 %3146  ;;  %5608 = vmatprep.subr.mxu0 %v7111_v36 }
0x13d3   :  { %v3145_v4 = vpop.permute.xlu1 %3144  ;;  %5609 = vmatpush3.msra.mxu0 %v7111_v36 }
0x13d4   :  { %5583 = vmatprep.mubr.msk.f32.mxu0 %vm1022_vm2, %v3145_v4  ;;  %5610 = vmatprep.subr.mxu0 %v7119_v37 }
0x13d5   :  { %5584 = vmatmul.mubr.msk.f32.gmra.mxu0 %vm1022_vm2, %v3147_v25 }
0x13d6   :  { %v3151_v40 = vpop.permute.xlu0 %3150  ;;  %5611 = vmatpush3.msra.mxu0 %v7119_v37 }
0x13d7   :  { %v3149_v31 = vpop.permute.xlu1 %3148  ;;  %5612 = vmatprep.subr.mxu0 %v7127_v6 }
0x13d8   :  { %5586 = vmatprep.mubr.msk.f32.mxu0 %vm1022_vm2, %v3149_v31  ;;  %5613 = vmatpush3.msra.mxu0 %v7127_v6 }
0x13d9   :  { %5587 = vmatmul.mubr.msk.f32.gmra.mxu0 %vm1022_vm2, %v3151_v40  ;;  %5614 = vmatprep.subr.mxu0 %v7136_v46 }
0x13da   :  { %v2976_v48 = vpop.permute.xlu0 %2975  ;;  %5615 = vmatpush3.msra.mxu0 %v7136_v46 }
0x13db   :  { %v2978_v11 = vpop.permute.xlu1 %2977  ;;  %5616 = vmatprep.subr.mxu0 %v7143_v49 }
0x13dc   :  { %5547 = vmatprep.subr.mxu1 %v2978_v11  ;;  %5617 = vmatpush3.msra.mxu0 %v7143_v49 }
0x13dd   :  { %5548 = vmatpush3.msra.mxu1 %v2978_v11  ;;  %5618 = vmatprep.subr.mxu0 %v7150_v47 }
0x13de   :  { %5549 = vmatprep.subr.mxu1 %v2976_v48  ;;  %5619 = vmatpush3.msra.mxu0 %v7150_v47  ;;  %v2972_v32 = vpop.permute.xlu0 %2971 }
0x13df   :  { %v2974_v34 = vpop.permute.xlu1 %2973  ;;  %5550 = vmatpush3.msra.mxu1 %v2976_v48  ;;  %5620 = vmatprep.subr.mxu0 %v7157_v35 }
0x13e0   :  { %5551 = vmatprep.subr.mxu1 %v2974_v34  ;;  %5621 = vmatpush3.msra.mxu0 %v7157_v35 }
0x13e1   :  { %5552 = vmatpush3.msra.mxu1 %v2974_v34 }
0x13e2   :  { %5553 = vmatprep.subr.mxu1 %v2972_v32  ;;  %v2968_v24 = vpop.permute.xlu0 %2967 }
0x13e3   :  { %v2970_v51 = vpop.permute.xlu1 %2969  ;;  %5554 = vmatpush3.msra.mxu1 %v2972_v32 }
0x13e4   :  { %5555 = vmatprep.subr.mxu1 %v2970_v51 }
0x13e5   :  { %5556 = vmatpush3.msra.mxu1 %v2970_v51 }
0x13e6   :  { %5557 = vmatprep.subr.mxu1 %v2968_v24 }
0x13e7   :  { %5558 = vmatpush3.msra.mxu1 %v2968_v24 }
0x13e8   :  { %5560 = vmatmul.mubr.msk.f32.vlgmr.msra.gmra.mxu1 %vm1022_vm2, %v7065_v20  ;;  %5589 = vmatprep.subr.mxu1 %v4867_v63 }
0x13e9   :  { %5562 = vmatprep.mubr.msk.f32.mxu1 %vm1022_vm2, %v7073_v39  ;;  %5590 = vmatpush3.msra.mxu1 %v4867_v63 }
0x13ec   :  { %5563 = vmatmul.mubr.msk.f32.gmra.mxu1 %vm1022_vm2, %v7071_v23  ;;  %v4866_v23 = vld [vmem:[%s7577_s6 + $0x30] sm:$0xff] }
0x13ed   :  { %5565 = vmatprep.mubr.msk.f32.mxu1 %vm1022_vm2, %v7087_v62  ;;  %5591 = vmatprep.subr.mxu1 %v4866_v23 }
0x13ee   :  { %5592 = vmatpush3.msra.mxu1 %v4866_v23 }
0x13ef   :  { %5593 = vmatprep.subr.mxu1 %v4865_v5 }
0x13f0   :  { %5566 = vmatmul.mubr.msk.f32.gmra.mxu1 %vm1022_vm2, %v7079_v52  ;;  %v4864_v52 = vld [vmem:[%s7577_s6 + $0x20] sm:$0xff] }
0x13f1   :  { %5594 = vmatpush3.msra.mxu1 %v4865_v5 }
0x13f2   :  { %5595 = vmatprep.subr.mxu1 %v4864_v52 }
0x13f3   :  { %5596 = vmatpush3.msra.mxu1 %v4864_v52 }
0x1490   :  { %v7171_v58 = vpop.f32.mrf.mxu0 }
0x1491   :  { %5897 = vrcp.f32 %v7171_v58 }
0x1492   :  { %v7174_v42 = vpop.f32.mrf.mxu0 }
0x1493   :  { %5899 = vrcp.f32 %v7174_v42 }
0x1495   :  { %v7177_v21 = vpop.f32.mrf.mxu0 }
0x1497   :  { %v7179_v10 = vpop.f32.mrf.mxu0 }
0x1498   :  { %5901 = vrcp.f32 %v7179_v10 }
0x1499   :  { %v7182_v53 = vpop.f32.mrf.mxu0  ;;  %5903 = vrcp.f32 %v7177_v21 }
0x149b   :  { %v7185_v30 = vpop.f32.mrf.mxu0 }
0x149c   :  { %5905 = vrcp.f32 %v7185_v30 }
0x149d   :  { %5907 = vrcp.f32 %v7182_v53 }
0x149e   :  { %v5898_v43 = vpop.eup %5897 }
0x149f   :  { %3290 = vperm.xlu0 %5787, %v5898_v43  }
0x14a0   :  { %v5900_v14 = vpop.eup %5899 }
0x14a1   :  { %3285 = vperm.xlu1 %5788, %v5900_v14  }
0x14a5   :  { %v5902_v9 = vpop.eup %5901 }
0x14a6   :  { %3295 = vperm.xlu1 %5788, %v5902_v9   ;;  %v5904_v59 = vpop.eup %5903 }
0x14a8   :  { %v7189_v7 = vpop.f32.mrf.mxu1 }
0x14a9   :  { %v5906_v16 = vpop.eup %5905  ;;  %5909 = vrcp.f32 %v7189_v7 }
0x14aa   :  { %3300 = vperm.xlu1 %5788, %v5904_v59   ;;  %3305 = vperm.xlu0 %5787, %v5906_v16   ;;  %v3069_v61 = vpop.f32.mrf.mxu1  ;;  %v5908_v22 = vpop.eup %5907 }
0x14ab   :  { %5911 = vrcp.f32 %v3069_v61 }
0x14ac   :  { %v7192_v29 = vpop.f32.mrf.mxu1 }
0x14ad   :  { %5913 = vrcp.f32 %v7192_v29 }
0x14ae   :  { %3310 = vperm.xlu1 %5788, %v5908_v22   ;;  %v3079_v54 = vpop.f32.mrf.mxu1 }
0x14af   :  { %5915 = vrcp.f32 %v3079_v54 }
0x14b0   :  { %v7195_v17 = vpop.f32.mrf.mxu1 }
0x14b2   :  { %v7197_v55 = vpop.f32.mrf.mxu1 }
0x14b3   :  { %5917 = vrcp.f32 %v7197_v55 }
0x14b4   :  { %5919 = vrcp.f32 %v7195_v17 }
0x14b6   :  { %v5910_v33 = vpop.eup %5909 }
0x14b7   :  { %3111 = vperm.xlu1 %5788, %v5910_v33  }
0x14b8   :  { %v5912_v20 = vpop.eup %5911 }
0x14b9   :  { %3106 = vperm.xlu0 %5787, %v5912_v20  }
0x14ba   :  { %v5914_v44 = vpop.eup %5913 }
0x14bb   :  { %3121 = vperm.xlu1 %5788, %v5914_v44  }
0x14bc   :  { %v5916_v57 = vpop.eup %5915 }
0x14bd   :  { %3116 = vperm.xlu0 %5787, %v5916_v57  }
0x14c0   :  { %v5918_v56 = vpop.eup %5917 }
0x14c1   :  { %3126 = vperm.xlu1 %5788, %v5918_v56   ;;  %5789 = vset.pattern.permute.xlu0 %v5999_v3  ;;  %v5920_v39 = vpop.eup %5919 }
0x14c5   :  { %3131 = vperm.xlu1 %5788, %v5920_v39  }
0x14c9   :  { %5790 = vset.pattern.permute.xlu1 %v5999_v3 }
0x151a   :  { %v3291_v62 = vpop.permute.xlu0 %3290 }
0x151b   :  { %v3314_v0 = vmul.f32 %v7171_v58, %v3291_v62 }
0x151c   :  { %v3286_v1 = vpop.permute.xlu1 %3285 }
0x151d   :  { %3327 = vrot.lane.b32.xlu0 %v3314_v0, %s6012_s2  ;;  %v3313_v25 = vmul.f32 %v3286_v1, %v7174_v42 }
0x1521   :  { %v3296_v4 = vpop.permute.xlu1 %3295  ;;  %3325 = vrot.lane.b32.xlu0 %v3313_v25, %s6012_s2 }
0x1522   :  { %v3315_v40 = vmul.f32 %v3296_v4, %v7179_v10 }
0x1525   :  { %v3301_v31 = vpop.permute.xlu1 %3300  ;;  %v3306_v48 = vpop.permute.xlu0 %3305  ;;  %3329 = vrot.lane.b32.xlu0 %v3315_v40, %s6012_s2 }
0x1526   :  { %v3316_v11 = vmul.f32 %v7177_v21, %v3301_v31  ;;  %v3317_v34 = vmul.f32 %v3306_v48, %v7185_v30 }
0x1528   :  { %3331 = vrot.lane.b32.xlu1 %v3316_v11, %s6012_s2 }
0x1529   :  { %v3311_v32 = vpop.permute.xlu1 %3310  ;;  %3333 = vrot.lane.b32.xlu0 %v3317_v34, %s6012_s2 }
0x152a   :  { %v3318_v51 = vmul.f32 %v7182_v53, %v3311_v32 }
0x152c   :  { %3335 = vrot.lane.b32.xlu1 %v3318_v51, %s6012_s2 }
0x1532   :  { %v3112_v58 = vpop.permute.xlu1 %3111 }
0x1533   :  { %v3135_v21 = vmul.f32 %v7189_v7, %v3112_v58 }
0x1534   :  { %v3107_v24 = vpop.permute.xlu0 %3106 }
0x1535   :  { %v3134_v9 = vmul.f32 %v3107_v24, %v3069_v61 }
0x1536   :  { %v3122_v10 = vpop.permute.xlu1 %3121 }
0x1537   :  { %v3137_v44 = vmul.f32 %v7192_v29, %v3122_v10  ;;  %v7246_v29 = vld [vmem:[%s7578_s7 + $0x8] sm:$0x3f] }
0x1538   :  { %v3117_v42 = vpop.permute.xlu0 %3116 }
0x1539   :  { %v3136_v22 = vmul.f32 %v3117_v42, %v3079_v54 }
0x153c   :  { %v3127_v14 = vpop.permute.xlu1 %3126 }
0x153d   :  { %v3138_v7 = vmul.f32 %v3127_v14, %v7197_v55  ;;  %v3357_v55 = vrot.slane %v7246_v29, %v6425_v41 }
0x1540   :  { %v3132_v53 = vpop.permute.xlu1 %3131 }
0x1541   :  { %v3139_v63 = vmul.f32 %v7195_v17, %v3132_v53 }
0x158f   :  { %v3328_v43 = vpop.permute.xlu0 %3327 }
0x1590   :  { %v3344_v16 = vsel %vm735_vm0, %v3135_v21, %v3328_v43 }
0x1593   :  { %v3326_v59 = vpop.permute.xlu0 %3325 }
0x1594   :  { %v3343_v30 = vsel %vm735_vm0, %v3134_v9, %v3326_v59 }
0x1595   :  { %5597 = vmatprep.mubr.msk.f32.mxu1 %vm306_vm14, %v3343_v30 }
0x1596   :  { %5598 = vmatmul.mubr.msk.f32.vlgmr.msra.gmra.mxu1 %vm306_vm14, %v3344_v16 }
0x1597   :  { %v3330_v33 = vpop.permute.xlu0 %3329 }
0x1598   :  { %v3345_v20 = vsel %vm735_vm0, %v3136_v22, %v3330_v33 }
0x1599   :  { %5600 = vmatprep.mubr.msk.f32.mxu1 %vm306_vm14, %v3345_v20 }
0x159a   :  { %v3332_v61 = vpop.permute.xlu1 %3331 }
0x159b   :  { %v3346_v57 = vsel %vm735_vm0, %v3137_v44, %v3332_v61  ;;  %v3334_v56 = vpop.permute.xlu0 %3333 }
0x159c   :  { %5601 = vmatmul.mubr.msk.f32.gmra.mxu1 %vm306_vm14, %v3346_v57  ;;  %v3347_v54 = vsel %vm735_vm0, %v3138_v7, %v3334_v56 }
0x159d   :  { %5603 = vmatprep.mubr.msk.f32.mxu1 %vm306_vm14, %v3347_v54 }
0x159e   :  { %v3336_v23 = vpop.permute.xlu1 %3335 }
0x159f   :  { %v3348_v39 = vsel %vm735_vm0, %v3139_v63, %v3336_v23 }
0x15a0   :  { %5604 = vmatmul.mubr.msk.f32.gmra.mxu1 %vm306_vm14, %v3348_v39 }
0x1656   :  { %v5599_v5 = vpop.f32.mrf.mxu1 }
0x1657   :  { %v3448_v52 = vadd.f32 %v5599_v5, %v3357_v55 }
0x1658   :  { %v3442_v62 = vpop.f32.mrf.mxu1 }
0x1659   :  { %v7251_v17 = vadd.f32 %v3448_v52, %v6912_v8  ;;  %v3443_v0 = vadd.f32 %v3442_v62, %v3357_v55 }
0x165b   :  { %v3478_v1 = vmul.f32 %v7251_v17, %v7251_v17  ;;  %v7256_v25 = vadd.f32 %v3443_v0, %v6910_v50 }
0x165c   :  { %v5602_v4 = vpop.f32.mrf.mxu1 }
0x165d   :  { %v3477_v40 = vmul.f32 %v7256_v25, %v7256_v25  ;;  %v3458_v31 = vadd.f32 %v5602_v4, %v3357_v55  ;;  %3491 = vrot.lane.b32.xlu1 %v3478_v1, %s6002_s21 }
0x165e   :  { %v3452_v41 = vpop.f32.mrf.mxu1 }
0x165f   :  { %v7262_v48 = vadd.f32 %v3458_v31, %v6921_v45  ;;  %v3453_v8 = vadd.f32 %v3452_v41, %v3357_v55  ;;  %3489 = vrot.lane.b32.xlu0 %v3477_v40, %s6002_s21 }
0x1660   :  { %v5605_v11 = vpop.f32.mrf.mxu1 }
0x1661   :  { %v3480_v34 = vmul.f32 %v7262_v48, %v7262_v48  ;;  %v7268_v50 = vadd.f32 %v3453_v8, %v6919_v12  ;;  %v3468_v32 = vadd.f32 %v5605_v11, %v3357_v55 }
0x1662   :  { %v3462_v51 = vpop.f32.mrf.mxu1 }
0x1663   :  { %v3479_v24 = vmul.f32 %v7268_v50, %v7268_v50  ;;  %v7273_v58 = vadd.f32 %v3468_v32, %v6932_v28  ;;  %v3463_v45 = vadd.f32 %v3462_v51, %v3357_v55  ;;  %3495 = vrot.lane.b32.xlu1 %v3480_v34, %s6002_s21 }
0x1665   :  { %v3482_v42 = vmul.f32 %v7273_v58, %v7273_v58  ;;  %v7279_v10 = vadd.f32 %v3463_v45, %v6928_v18  ;;  %3493 = vrot.lane.b32.xlu0 %v3479_v24, %s6002_s21 }
0x1667   :  { %v3481_v12 = vmul.f32 %v7279_v10, %v7279_v10  ;;  %3499 = vrot.lane.b32.xlu1 %v3482_v42, %s6002_s21 }
0x1669   :  { %3497 = vrot.lane.b32.xlu0 %v3481_v12, %s6002_s21 }
0x16cf   :  { %v3492_v28 = vpop.permute.xlu1 %3491 }
0x16d0   :  { %v3508_v9 = vsel %vm306_vm14, %v7251_v17, %v3492_v28 }
0x16d1   :  { %v3490_v43 = vpop.permute.xlu0 %3489 }
0x16d2   :  { %v3507_v14 = vsel %vm306_vm14, %v7256_v25, %v3490_v43 }
0x16d3   :  { %5622 = vmatprep.mubr.msk.f32.mxu0 %vm313_vm15, %v3507_v14 }
0x16d4   :  { %5623 = vmatmul.mubr.msk.f32.vlgmr.msra.gmra.mxu0 %vm313_vm15, %v3508_v9 }
0x16d5   :  { %v3496_v18 = vpop.permute.xlu1 %3495 }
0x16d6   :  { %v3510_v30 = vsel %vm306_vm14, %v7262_v48, %v3496_v18 }
0x16d7   :  { %v3494_v21 = vpop.permute.xlu0 %3493 }
0x16d8   :  { %v3509_v59 = vsel %vm306_vm14, %v7268_v50, %v3494_v21  ;;  %v4883_v21 = vld [vmem:[%s7579_s8 + $0x40] sm:$0xff] }
0x16d9   :  { %5625 = vmatprep.mubr.msk.f32.mxu0 %vm313_vm15, %v3509_v59  ;;  %v3500_v16 = vpop.permute.xlu1 %3499  ;;  %5631 = vmatprep.subr.mxu1 %v4883_v21 }
0x16da   :  { %5626 = vmatmul.mubr.msk.f32.gmra.mxu0 %vm313_vm15, %v3510_v30  ;;  %v3512_v33 = vsel %vm306_vm14, %v7273_v58, %v3500_v16  ;;  %5632 = vmatpush3.msra.mxu1 %v4883_v21  ;;  %v4882_v16 = vld [vmem:[%s7579_s8 + $0x38] sm:$0xff]  ;;  %v4885_v21 = vld [vmem:[%s7579_s8 + $0x48] ss:$0 sm:$0xff] }
0x16db   :  { %v3498_v22 = vpop.permute.xlu0 %3497  ;;  %5633 = vmatprep.subr.mxu1 %v4882_v16 }
0x16dc   :  { %v3511_v53 = vsel %vm306_vm14, %v7279_v10, %v3498_v22  ;;  %5634 = vmatpush3.msra.mxu1 %v4882_v16 }
0x16dd   :  { %5628 = vmatprep.mubr.msk.f32.mxu0 %vm313_vm15, %v3511_v53 }
0x16de   :  { %5629 = vmatmul.mubr.msk.f32.gmra.mxu0 %vm313_vm15, %v3512_v33  ;;  %v4881_v33 = vld [vmem:[%s7579_s8 + $0x30] sm:$0xff] }
0x16df   :  { %5635 = vmatprep.subr.mxu1 %v4881_v33 }
0x16e0   :  { %5636 = vmatpush3.msra.mxu1 %v4881_v33 }
0x1794   :  { %v5624_v20 = vpop.f32.mrf.mxu0 }
0x1795   :  { %v3627_v44 = vmul.f32 %v5624_v20, %v5624_v20 }
0x1796   :  { %v3597_v7 = vpop.f32.mrf.mxu0 }
0x1797   :  { %v3626_v61 = vmul.f32 %v3597_v7, %v3597_v7  ;;  %3640 = vrot.lane.b32.xlu1 %v3627_v44, %s6003_s22 }
0x1799   :  { %3638 = vrot.lane.b32.xlu0 %v3626_v61, %s6003_s22 }
0x179a   :  { %v5627_v57 = vpop.f32.mrf.mxu0 }
0x179b   :  { %v3629_v56 = vmul.f32 %v5627_v57, %v5627_v57 }
0x179c   :  { %v3607_v54 = vpop.f32.mrf.mxu0 }
0x179d   :  { %v3628_v63 = vmul.f32 %v3607_v54, %v3607_v54  ;;  %3644 = vrot.lane.b32.xlu1 %v3629_v56, %s6003_s22 }
0x179e   :  { %v7307_v23 = vpop.f32.mrf.mxu0 }
0x179f   :  { %v3631_v39 = vmul.f32 %v7307_v23, %v7307_v23  ;;  %3642 = vrot.lane.b32.xlu0 %v3628_v63, %s6003_s22 }
0x17a0   :  { %v7312_v55 = vpop.f32.mrf.mxu0 }
0x17a1   :  { %v3630_v5 = vmul.f32 %v7312_v55, %v7312_v55  ;;  %3648 = vrot.lane.b32.xlu1 %v3631_v39, %s6003_s22 }
0x17a3   :  { %3646 = vrot.lane.b32.xlu0 %v3630_v5, %s6003_s22 }
0x17a5   :  { %3675 = vperm.xlu1 %5790, %v5624_v20  }
0x17a7   :  { %3670 = vperm.xlu0 %5789, %v3597_v7  }
0x17a9   :  { %3680 = vperm.xlu1 %5790, %v3607_v54  }
0x17ab   :  { %5791 = vset.pattern.permute.xlu0 %v5998_v2 }
0x17ad   :  { %3685 = vperm.xlu1 %5790, %v5627_v57  }
0x17b1   :  { %5792 = vset.pattern.permute.xlu1 %v5998_v2 }
0x1809   :  { %v3641_v52 = vpop.permute.xlu1 %3640 }
0x180a   :  { %v3657_v62 = vsub.f32 %v5624_v20, %v3641_v52  ;;  %v4880_v20 = vld [vmem:[%s7579_s8 + $0x28] sm:$0xff] }
0x180b   :  { %v3639_v0 = vpop.permute.xlu0 %3638  ;;  %5637 = vmatprep.subr.mxu1 %v4880_v20 }
0x180c   :  { %v3663_v1 = vmax.f32 %v3657_v62, 0.0  ;;  %v3656_v4 = vsub.f32 %v3597_v7, %v3639_v0  ;;  %5638 = vmatpush3.msra.mxu1 %v4880_v20 }
0x180d   :  { %5673 = vmatprep.subr.mxu1 %v7084_v38 }
0x180e   :  { %v3705_v40 = vadd.f32 1e-12, %v3663_v1  ;;  %v3662_v31 = vmax.f32 %v3656_v4, 0.0 }
0x180f   :  { %v3645_v41 = vpop.permute.xlu1 %3644 }
0x1810   :  { %5921 = vrsqrt.f32 %v3705_v40  ;;  %v3704_v8 = vadd.f32 1e-12, %v3662_v31  ;;  %v3659_v11 = vsub.f32 %v5627_v57, %v3645_v41 }
0x1811   :  { %v3643_v34 = vpop.permute.xlu0 %3642 }
0x1812   :  { %5923 = vrsqrt.f32 %v3704_v8  ;;  %v3665_v32 = vmax.f32 %v3659_v11, 0.0  ;;  %v3658_v51 = vsub.f32 %v3607_v54, %v3643_v34 }
0x1813   :  { %v3649_v24 = vpop.permute.xlu1 %3648 }
0x1814   :  { %v3707_v45 = vadd.f32 1e-12, %v3665_v32  ;;  %v3664_v42 = vmax.f32 %v3658_v51, 0.0  ;;  %v3661_v43 = vsub.f32 %v7307_v23, %v3649_v24 }
0x1815   :  { %v3647_v12 = vpop.permute.xlu0 %3646 }
0x1816   :  { %5925 = vrsqrt.f32 %v3707_v45  ;;  %v3706_v28 = vadd.f32 1e-12, %v3664_v42  ;;  %v3660_v14 = vsub.f32 %v7312_v55, %v3647_v12  ;;  %v3667_v18 = vmax.f32 %v3661_v43, 0.0 }
0x1818   :  { %5927 = vrsqrt.f32 %v3706_v28  ;;  %v3666_v9 = vmax.f32 %v3660_v14, 0.0  ;;  %v3709_v22 = vadd.f32 1e-12, %v3667_v18  ;;  %v4894_v14 = vld [vmem:[%s7580_s9 + $0x50] sm:$0xff]  ;;  %v4892_v18 = vld [vmem:[%s7580_s9 + $0x40] sm:$0xff] }
0x181a   :  { %v3708_v59 = vadd.f32 1e-12, %v3666_v9  ;;  %v4893_v9 = vld [vmem:[%s7580_s9 + $0x48] sm:$0xff] }
0x181c   :  { %5929 = vrsqrt.f32 %v3708_v59 }
0x181d   :  { %v5922_v30 = vpop.eup %5921  ;;  %5931 = vrsqrt.f32 %v3709_v22 }
0x181e   :  { %3723 = vperm.xlu0 %5791, %v5922_v30  }
0x181f   :  { %v5924_v53 = vpop.eup %5923 }
0x1820   :  { %3718 = vperm.xlu1 %5792, %v5924_v53   ;;  %v3676_v56 = vpop.permute.xlu1 %3675 }
0x1821   :  { %v3699_v39 = vsub.f32 %v7251_v17, %v3676_v56 }
0x1822   :  { %v3671_v63 = vpop.permute.xlu0 %3670 }
0x1823   :  { %v5926_v44 = vpop.eup %5925  ;;  %v3698_v52 = vsub.f32 %v7256_v25, %v3671_v63 }
0x1824   :  { %3733 = vperm.xlu1 %5792, %v5926_v44   ;;  %v3681_v54 = vpop.permute.xlu1 %3680 }
0x1825   :  { %v5928_v7 = vpop.eup %5927  ;;  %v3700_v17 = vsub.f32 %v7268_v50, %v3681_v54 }
0x1826   :  { %3728 = vperm.xlu0 %5791, %v5928_v7  }
0x1828   :  { %5794 = vset.pattern.permute.xlu1 %v5999_v3 }
0x1829   :  { %3695 = vperm.xlu1 %5794, %v7307_v23   ;;  %v5930_v61 = vpop.eup %5929  ;;  %v3686_v23 = vpop.permute.xlu1 %3685 }
0x182a   :  { %5793 = vset.pattern.permute.xlu0 %v5999_v3  ;;  %v5932_v57 = vpop.eup %5931  ;;  %v3701_v40 = vsub.f32 %v7262_v48, %v3686_v23 }
0x182b   :  { %3690 = vperm.xlu0 %5793, %v7312_v55   ;;  %v3755_v55 = vrot.slane %v7246_v29, %v1864_v13 }
0x182d   :  { %5795 = vset.pattern.permute.xlu1 %v5998_v2 }
0x182e   :  { %3738 = vperm.xlu1 %5795, %v5930_v61  }
0x182f   :  { %5796 = vset.pattern.permute.xlu0 %v5998_v2 }
0x1830   :  { %3743 = vperm.xlu0 %5796, %v5932_v57  }
0x1832   :  { %5798 = vset.pattern.permute.xlu1 %v5999_v3 }
0x1834   :  { %5797 = vset.pattern.permute.xlu0 %v5999_v3  ;;  %v3765_v3 = vrot.slane %v7246_v29, %v1874_v19 }
0x1899   :  { %v3724_v5 = vpop.permute.xlu0 %3723 }
0x189a   :  { %v3747_v62 = vmul.f32 %v3724_v5, %v3699_v39 }
0x189b   :  { %v3719_v0 = vpop.permute.xlu1 %3718 }
0x189c   :  { %v3746_v1 = vmul.f32 %v3719_v0, %v3698_v52  ;;  %v3757_v4 = vmul.f32 %v3755_v55, %v3747_v62 }
0x189e   :  { %v3756_v31 = vmul.f32 %v3755_v55, %v3746_v1  ;;  %v7355_v11 = vadd.f32 %v3765_v3, %v3757_v4 }
0x189f   :  { %v3734_v41 = vpop.permute.xlu1 %3733 }
0x18a0   :  { %v7353_v8 = vadd.f32 %v3765_v3, %v3756_v31  ;;  %v3749_v13 = vmul.f32 %v3734_v41, %v3701_v40 }
0x18a1   :  { %v3729_v25 = vpop.permute.xlu0 %3728 }
0x18a2   :  { %v3748_v34 = vmul.f32 %v3729_v25, %v3700_v17  ;;  %5639 = vmatprep.mubr.msk.f32.mxu1 %vm306_vm14, %v7353_v8  ;;  %v3759_v32 = vmul.f32 %v3755_v55, %v3749_v13 }
0x18a3   :  { %5640 = vmatmul.mubr.msk.f32.vlgmr.msra.gmra.mxu1 %vm306_vm14, %v7355_v11 }
0x18a4   :  { %v3758_v19 = vmul.f32 %v3755_v55, %v3748_v34  ;;  %v3696_v48 = vpop.permute.xlu1 %3695  ;;  %5674 = vmatpush3.msra.mxu1 %v7084_v38  ;;  %v7366_v24 = vadd.f32 %v3765_v3, %v3759_v32 }
0x18a5   :  { %5675 = vmatprep.subr.mxu1 %v7111_v36  ;;  %v3703_v42 = vsub.f32 %v7273_v58, %v3696_v48 }
0x18a6   :  { %v7363_v50 = vadd.f32 %v3765_v3, %v3758_v19  ;;  %v3691_v51 = vpop.permute.xlu0 %3690  ;;  %5676 = vmatpush3.msra.mxu1 %v7111_v36 }
0x18a7   :  { %5677 = vmatprep.subr.mxu1 %v7119_v37  ;;  %v3702_v45 = vsub.f32 %v7279_v10, %v3691_v51 }
0x18a8   :  { %5642 = vmatprep.mubr.msk.f32.mxu1 %vm306_vm14, %v7363_v50  ;;  %5678 = vmatpush3.msra.mxu1 %v7119_v37 }
0x18a9   :  { %5643 = vmatmul.mubr.msk.f32.gmra.mxu1 %vm306_vm14, %v7366_v24  ;;  %v3739_v38 = vpop.permute.xlu1 %3738  ;;  %5679 = vmatprep.subr.mxu1 %v7127_v6 }
0x18aa   :  { %v3750_v36 = vmul.f32 %v3739_v38, %v3702_v45  ;;  %5680 = vmatpush3.msra.mxu1 %v7127_v6  ;;  %v4899_v6 = vld [vmem:[%s7580_s9 + $0x78] sm:$0xff] }
0x18ab   :  { %v3744_v12 = vpop.permute.xlu0 %3743  ;;  %5681 = vmatprep.subr.mxu1 %v7136_v46  ;;  %5648 = vmatprep.subr.mxu0 %v4899_v6 }
0x18ac   :  { %v3760_v10 = vmul.f32 %v3755_v55, %v3750_v36  ;;  %v3751_v28 = vmul.f32 %v3744_v12, %v3703_v42  ;;  %5682 = vmatpush3.msra.mxu1 %v7136_v46  ;;  %5649 = vmatpush3.msra.mxu0 %v4899_v6  ;;  %v4898_v46 = vld [vmem:[%s7580_s9 + $0x70] sm:$0xff] }
0x18ad   :  { %5683 = vmatprep.subr.mxu1 %v7143_v49  ;;  %5650 = vmatprep.subr.mxu0 %v4898_v46 }
0x18ae   :  { %v7381_v37 = vadd.f32 %v3765_v3, %v3760_v10  ;;  %v3761_v43 = vmul.f32 %v3755_v55, %v3751_v28  ;;  %5684 = vmatpush3.msra.mxu1 %v7143_v49  ;;  %5651 = vmatpush3.msra.mxu0 %v4898_v46  ;;  %v4897_v49 = vld [vmem:[%s7580_s9 + $0x68] sm:$0xff] }
0x18af   :  { %5685 = vmatprep.subr.mxu1 %v7150_v47  ;;  %5652 = vmatprep.subr.mxu0 %v4897_v49 }
0x18b0   :  { %v7385_v58 = vadd.f32 %v3765_v3, %v3761_v43  ;;  %5645 = vmatprep.mubr.msk.f32.mxu1 %vm306_vm14, %v7381_v37  ;;  %5686 = vmatpush3.msra.mxu1 %v7150_v47  ;;  %v4896_v47 = vld [vmem:[%s7580_s9 + $0x60] sm:$0xff] }
0x18b1   :  { %5687 = vmatprep.subr.mxu1 %v7157_v35  ;;  %5653 = vmatpush3.msra.mxu0 %v4897_v49 }
0x18b2   :  { %5646 = vmatmul.mubr.msk.f32.gmra.mxu1 %vm306_vm14, %v7385_v58  ;;  %5654 = vmatprep.subr.mxu0 %v4896_v47 }
0x18b3   :  { %5688 = vmatpush3.msra.mxu1 %v7157_v35  ;;  %5655 = vmatpush3.msra.mxu0 %v4896_v47  ;;  %v4895_v35 = vld [vmem:[%s7580_s9 + $0x58] sm:$0xff] }
0x18b4   :  { %5656 = vmatprep.subr.mxu0 %v4895_v35 }
0x18b5   :  { %5657 = vmatpush3.msra.mxu0 %v4895_v35 }
0x18b6   :  { %5658 = vmatprep.subr.mxu0 %v4894_v14 }
0x18b7   :  { %5659 = vmatpush3.msra.mxu0 %v4894_v14 }
0x18b8   :  { %5660 = vmatprep.subr.mxu0 %v4893_v9 }
0x18b9   :  { %5661 = vmatpush3.msra.mxu0 %v4893_v9 }
0x18ba   :  { %5662 = vmatprep.subr.mxu0 %v4892_v18 }
0x18bb   :  { %5663 = vmatpush3.msra.mxu0 %v4892_v18 }
0x1963   :  { %v5641_v59 = vpop.f32.mrf.mxu1 }
0x1964   :  { %v3872_v30 = vadd.f32 %v5641_v59, %v4885_v21 }
0x1965   :  { %v3866_v16 = vpop.f32.mrf.mxu1 }
0x1966   :  { %v3902_v22 = vmul.f32 0.044715, %v3872_v30  ;;  %v3867_v53 = vadd.f32 %v4885_v21, %v3866_v16  ;;  %v3896_v35 = vmul.f32 0.5, %v3872_v30 }
0x1968   :  { %v3908_v33 = vmul.f32 %v3902_v22, %v3872_v30  ;;  %v3901_v20 = vmul.f32 0.044715, %v3867_v53  ;;  %v3895_v49 = vmul.f32 0.5, %v3867_v53 }
0x1969   :  { %v5644_v44 = vpop.f32.mrf.mxu1 }
0x196a   :  { %v3914_v7 = vmul.f32 %v3908_v33, %v3872_v30  ;;  %v3907_v61 = vmul.f32 %v3901_v20, %v3867_v53  ;;  %v3882_v57 = vadd.f32 %v5644_v44, %v4885_v21 }
0x196b   :  { %v3876_v56 = vpop.f32.mrf.mxu1 }
0x196c   :  { %v3920_v54 = vadd.f32 %v3914_v7, %v3872_v30  ;;  %v3913_v63 = vmul.f32 %v3907_v61, %v3867_v53  ;;  %v3904_v23 = vmul.f32 0.044715, %v3882_v57  ;;  %v3877_v39 = vadd.f32 %v4885_v21, %v3876_v56 }
0x196d   :  { %v3898_v33 = vmul.f32 0.5, %v3882_v57 }
0x196e   :  { %v3926_v55 = vmul.f32 0.7978846, %v3920_v54  ;;  %v3919_v5 = vadd.f32 %v3913_v63, %v3867_v53  ;;  %v3910_v52 = vmul.f32 %v3904_v23, %v3882_v57  ;;  %v3903_v62 = vmul.f32 0.044715, %v3877_v39 }
0x196f   :  { %v3897_v16 = vmul.f32 0.5, %v3877_v39 }
0x1970   :  { %5933 = vtanh.f32 %v3926_v55  ;;  %v3916_v0 = vmul.f32 %v3910_v52, %v3882_v57  ;;  %v3909_v1 = vmul.f32 %v3903_v62, %v3877_v39  ;;  %v3925_v3 = vmul.f32 0.7978846, %v3919_v5 }
0x1972   :  { %v3922_v4 = vadd.f32 %v3916_v0, %v3882_v57  ;;  %v3915_v40 = vmul.f32 %v3909_v1, %v3877_v39  ;;  %v5647_v31 = vpop.f32.mrf.mxu1  ;;  %5935 = vtanh.f32 %v3925_v3  ;;  %v3961_v57 = vrot.slane %v7246_v29, %v2068_v27 }
0x1973   :  { %v3892_v41 = vadd.f32 %v5647_v31, %v4885_v21 }
0x1974   :  { %v3921_v17 = vadd.f32 %v3915_v40, %v3877_v39  ;;  %v3886_v13 = vpop.f32.mrf.mxu1  ;;  %v3928_v25 = vmul.f32 0.7978846, %v3922_v4 }
0x1975   :  { %v3906_v34 = vmul.f32 0.044715, %v3892_v41  ;;  %v3887_v32 = vadd.f32 %v4885_v21, %v3886_v13  ;;  %v3900_v54 = vmul.f32 0.5, %v3892_v41 }
0x1976   :  { %v3927_v19 = vmul.f32 0.7978846, %v3921_v17  ;;  %5937 = vtanh.f32 %v3928_v25 }
0x1977   :  { %v3912_v48 = vmul.f32 %v3906_v34, %v3892_v41  ;;  %v3905_v51 = vmul.f32 0.044715, %v3887_v32  ;;  %v3899_v61 = vmul.f32 0.5, %v3887_v32 }
0x1978   :  { %5939 = vtanh.f32 %v3927_v19 }
0x1979   :  { %v3918_v45 = vmul.f32 %v3912_v48, %v3892_v41  ;;  %v3911_v38 = vmul.f32 %v3905_v51, %v3887_v32 }
0x197b   :  { %v3924_v42 = vadd.f32 %v3918_v45, %v3892_v41  ;;  %v3917_v36 = vmul.f32 %v3911_v38, %v3887_v32 }
0x197d   :  { %v5934_v12 = vpop.eup %5933  ;;  %v3923_v10 = vadd.f32 %v3917_v36, %v3887_v32  ;;  %v3930_v28 = vmul.f32 0.7978846, %v3924_v42 }
0x197e   :  { %v3938_v6 = vadd.f32 1.0, %v5934_v12 }
0x197f   :  { %v5936_v43 = vpop.eup %5935  ;;  %v3929_v46 = vmul.f32 0.7978846, %v3923_v10  ;;  %5941 = vtanh.f32 %v3930_v28 }
0x1980   :  { %v3937_v47 = vadd.f32 1.0, %v5936_v43  ;;  %v3944_v18 = vmul.f32 %v3938_v6, %v3896_v35 }
0x1981   :  { %5943 = vtanh.f32 %v3929_v46 }
0x1982   :  { %v3943_v14 = vmul.f32 %v3937_v47, %v3895_v49 }
0x1983   :  { %v5938_v9 = vpop.eup %5937 }
0x1984   :  { %5664 = vmatprep.mubr.msk.f32.mxu0 %vm313_vm15, %v3943_v14  ;;  %v3940_v59 = vadd.f32 1.0, %v5938_v9 }
0x1985   :  { %v5940_v21 = vpop.eup %5939  ;;  %5665 = vmatmul.mubr.msk.f32.vlgmr.msra.gmra.mxu0 %vm313_vm15, %v3944_v18 }
0x1986   :  { %v3939_v22 = vadd.f32 1.0, %v5940_v21  ;;  %v3946_v44 = vmul.f32 %v3940_v59, %v3898_v33 }
0x1988   :  { %v3945_v20 = vmul.f32 %v3939_v22, %v3897_v16 }
0x198a   :  { %5667 = vmatprep.mubr.msk.f32.mxu0 %vm313_vm15, %v3945_v20 }
0x198b   :  { %5668 = vmatmul.mubr.msk.f32.gmra.mxu0 %vm313_vm15, %v3946_v44 }
0x198c   :  { %v5942_v30 = vpop.eup %5941 }
0x198d   :  { %v3942_v7 = vadd.f32 1.0, %v5942_v30 }
0x198e   :  { %v5944_v53 = vpop.eup %5943 }
0x198f   :  { %v3941_v56 = vadd.f32 1.0, %v5944_v53  ;;  %v3948_v23 = vmul.f32 %v3942_v7, %v3900_v54 }
0x1991   :  { %v3947_v63 = vmul.f32 %v3941_v56, %v3899_v61 }
0x1993   :  { %5670 = vmatprep.mubr.msk.f32.mxu0 %vm313_vm15, %v3947_v63 }
0x1994   :  { %5671 = vmatmul.mubr.msk.f32.gmra.mxu0 %vm313_vm15, %v3948_v23 }
0x1a45   :  { %v5666_v39 = vpop.f32.mrf.mxu0 }
0x1a46   :  { %v4052_v5 = vadd.f32 %v5666_v39, %v3961_v57 }
0x1a47   :  { %v4046_v55 = vpop.f32.mrf.mxu0 }
0x1a48   :  { %v4047_v52 = vadd.f32 %v4046_v55, %v3961_v57  ;;  %v7434_v1 = vadd.f32 %v4052_v5, %v7355_v11 }
0x1a4a   :  { %v7431_v62 = vadd.f32 %v4047_v52, %v7353_v8  ;;  %v4082_v27 = vmul.f32 %v7434_v1, %v7434_v1 }
0x1a4b   :  { %v5669_v0 = vpop.f32.mrf.mxu0 }
0x1a4c   :  { %v4081_v3 = vmul.f32 %v7431_v62, %v7431_v62  ;;  %v4062_v4 = vadd.f32 %v5669_v0, %v3961_v57 }
0x1a4d   :  { %v4056_v40 = vpop.f32.mrf.mxu0 }
0x1a4e   :  { %v4057_v31 = vadd.f32 %v4056_v40, %v3961_v57  ;;  %4093 = vrot.lane.b32.xlu1 %v4081_v3, %s6002_s21  ;;  %v7442_v41 = vadd.f32 %v4062_v4, %v7366_v24 }
0x1a50   :  { %v7445_v8 = vadd.f32 %v4057_v31, %v7363_v50  ;;  %v4084_v17 = vmul.f32 %v7442_v41, %v7442_v41 }
0x1a52   :  { %v4083_v11 = vmul.f32 %v7445_v8, %v7445_v8  ;;  %4095 = vrot.lane.b32.xlu1 %v4082_v27, %s6002_s21 }
0x1a54   :  { %4097 = vrot.lane.b32.xlu0 %v4083_v11, %s6002_s21  ;;  %v5672_v13 = vpop.f32.mrf.mxu0 }
0x1a55   :  { %v4072_v25 = vadd.f32 %v5672_v13, %v3961_v57 }
0x1a56   :  { %v4066_v34 = vpop.f32.mrf.mxu0  ;;  %4099 = vrot.lane.b32.xlu1 %v4084_v17, %s6002_s21 }
0x1a57   :  { %v7455_v24 = vadd.f32 %v4072_v25, %v7385_v58  ;;  %v4067_v50 = vadd.f32 %v4066_v34, %v3961_v57 }
0x1a59   :  { %v4086_v32 = vmul.f32 %v7455_v24, %v7455_v24  ;;  %v7460_v19 = vadd.f32 %v4067_v50, %v7381_v37  ;;  %v6013_v50 = vmov 0.0  }
0x1a5a   :  { %5698 = vmatprep.subr.mxu0 %v6013_v50  ;;  %5713 = vmatprep.subr.mxu1 %v6013_v50 }
0x1a5b   :  { %v4085_v48 = vmul.f32 %v7460_v19, %v7460_v19  ;;  %4103 = vrot.lane.b32.xlu1 %v4086_v32, %s6002_s21  ;;  %5710 = vmatprep.mubr.msk.f32.mxu0 %vm6014_vm4, %v6013_v50 }
0x1a5d   :  { %4101 = vrot.lane.b32.xlu0 %v4085_v48, %s6002_s21 }
0x1ac0   :  { %v4094_v51 = vpop.permute.xlu1 %4093 }
0x1ac1   :  { %v4111_v45 = vsel %vm306_vm14, %v7431_v62, %v4094_v51 }
0x1ac2   :  { %5689 = vmatprep.mubr.msk.f32.mxu1 %vm313_vm15, %v4111_v45  ;;  %v4453_v45 = vld [vmem:[%s7581_s10 + $0x18] sm:$0xff] }
0x1ac4   :  { %v4096_v58 = vpop.permute.xlu1 %4095 }
0x1ac5   :  { %v4112_v38 = vsel %vm306_vm14, %v7434_v1, %v4096_v58  ;;  %v4452_v58 = vld [vmem:[%s7581_s10 + $0x10] sm:$0xff] }
0x1ac6   :  { %v4098_v42 = vpop.permute.xlu0 %4097  ;;  %5690 = vmatmul.mubr.msk.f32.vlgmr.msra.gmra.mxu1 %vm313_vm15, %v4112_v38  ;;  %v4451_v38 = vld [vmem:[%s7581_s10 + $0x8] sm:$0xff] }
0x1ac7   :  { %v4113_v37 = vsel %vm306_vm14, %v7445_v8, %v4098_v42  ;;  %5714 = vmatpush3.msra.mxu1 %v4453_v45  ;;  %v4450_v42 = vld [vmem:[%s7581_s10] sm:$0xff] }
0x1ac8   :  { %5692 = vmatprep.mubr.msk.f32.mxu1 %vm313_vm15, %v4113_v37  ;;  %v4100_v36 = vpop.permute.xlu1 %4099  ;;  %5715 = vmatprep.subr.mxu1 %v6013_v50 }
0x1ac9   :  { %v4114_v12 = vsel %vm306_vm14, %v7442_v41, %v4100_v36  ;;  %5716 = vmatpush3.msra.mxu1 %v4452_v58 }
0x1aca   :  { %5693 = vmatmul.mubr.msk.f32.gmra.mxu1 %vm313_vm15, %v4114_v12  ;;  %5717 = vmatprep.subr.mxu1 %v6013_v50 }
0x1acb   :  { %5718 = vmatpush3.msra.mxu1 %v4451_v38 }
0x1acc   :  { %5719 = vmatprep.subr.mxu1 %v6013_v50 }
0x1acd   :  { %v4104_v10 = vpop.permute.xlu1 %4103  ;;  %5720 = vmatpush3.msra.mxu1 %v4450_v42 }
0x1ace   :  { %v4116_v6 = vsel %vm306_vm14, %v7455_v24, %v4104_v10 }
0x1acf   :  { %v4102_v28 = vpop.permute.xlu0 %4101 }
0x1ad0   :  { %v4115_v43 = vsel %vm306_vm14, %v7460_v19, %v4102_v28 }
0x1ad1   :  { %5695 = vmatprep.mubr.msk.f32.mxu1 %vm313_vm15, %v4115_v43 }
0x1ad2   :  { %5696 = vmatmul.mubr.msk.f32.gmra.mxu1 %vm313_vm15, %v4116_v6 }
0x1ad3   :  { %5721 = vmatprep.mubr.msk.f32.mxu1 %vm6014_vm4, %v6013_v50 }
0x1b86   :  { %v5691_v46 = vpop.f32.mrf.mxu1 }
0x1b87   :  { %v4231_v22 = vmul.f32 %v5691_v46, %v5691_v46 }
0x1b88   :  { %v4201_v49 = vpop.f32.mrf.mxu1 }
0x1b89   :  { %v4230_v33 = vmul.f32 %v4201_v49, %v4201_v49 }
0x1b8a   :  { %v5694_v47 = vpop.f32.mrf.mxu1 }
0x1b8b   :  { %v4233_v59 = vmul.f32 %v5694_v47, %v5694_v47 }
0x1b8c   :  { %v4211_v35 = vpop.f32.mrf.mxu1 }
0x1b8d   :  { %v4232_v16 = vmul.f32 %v4211_v35, %v4211_v35 }
0x1b92   :  { %v5697_v14 = vpop.f32.mrf.mxu1 }
0x1b93   :  { %v4235_v9 = vmul.f32 %v5697_v14, %v5697_v14 }
0x1b94   :  { %v4221_v18 = vpop.f32.mrf.mxu1 }
0x1b95   :  { %v4234_v21 = vmul.f32 %v4221_v18, %v4221_v18  ;;  %4252 = vrot.lane.b32.xlu0 %v4235_v9, %s6003_s22  ;;  %v4369_v9 = vrot.slane %v7246_v29, %v2476_v26 }
0x1b97   :  { %4250 = vrot.lane.b32.xlu1 %v4234_v21, %s6003_s22 }
0x1b99   :  { %4248 = vrot.lane.b32.xlu0 %v4233_v59, %s6003_s22 }
0x1b9b   :  { %4246 = vrot.lane.b32.xlu1 %v4232_v16, %s6003_s22 }
0x1b9d   :  { %4244 = vrot.lane.b32.xlu0 %v4231_v22, %s6003_s22 }
0x1b9f   :  { %4242 = vrot.lane.b32.xlu1 %v4230_v33, %s6003_s22 }
0x1ba1   :  { %4299 = vperm.xlu0 %5797, %v5697_v14  }
0x1ba3   :  { %4294 = vperm.xlu1 %5798, %v4221_v18  }
0x1ba5   :  { %4289 = vperm.xlu0 %5797, %v5694_v47  }
0x1ba7   :  { %5799 = vset.pattern.permute.xlu1 %v5998_v2 }
0x1ba9   :  { %4284 = vperm.xlu0 %5797, %v4211_v35  }
0x1bad   :  { %4279 = vperm.xlu0 %5797, %v5691_v46  }
0x1bb1   :  { %4274 = vperm.xlu0 %5797, %v4201_v49  }
0x1bb5   :  { %5800 = vset.pattern.permute.xlu0 %v5998_v2 }
0x1c07   :  { %v4253_v20 = vpop.permute.xlu0 %4252 }
0x1c08   :  { %v4265_v44 = vsub.f32 %v5697_v14, %v4253_v20 }
0x1c09   :  { %v4251_v30 = vpop.permute.xlu1 %4250 }
0x1c0a   :  { %v4271_v61 = vmax.f32 %v4265_v44, 0.0  ;;  %v4264_v54 = vsub.f32 %v4221_v18, %v4251_v30 }
0x1c0b   :  { %v4249_v53 = vpop.permute.xlu0 %4248 }
0x1c0c   :  { %v4263_v7 = vsub.f32 %v5694_v47, %v4249_v53  ;;  %v4313_v57 = vadd.f32 1e-12, %v4271_v61  ;;  %v4270_v55 = vmax.f32 %v4264_v54, 0.0  ;;  %v4359_v47 = vrot.slane %v7246_v29, %v2466_v15 }
0x1c0d   :  { %v4247_v56 = vpop.permute.xlu1 %4246 }
0x1c0e   :  { %v4269_v63 = vmax.f32 %v4263_v7, 0.0  ;;  %v4262_v5 = vsub.f32 %v4211_v35, %v4247_v56  ;;  %v4312_v2 = vadd.f32 1e-12, %v4270_v55 }
0x1c0f   :  { %v4245_v0 = vpop.permute.xlu0 %4244 }
0x1c10   :  { %v4311_v23 = vadd.f32 1e-12, %v4269_v63  ;;  %v4268_v4 = vmax.f32 %v4262_v5, 0.0  ;;  %v4261_v40 = vsub.f32 %v5691_v46, %v4245_v0 }
0x1c11   :  { %v4243_v39 = vpop.permute.xlu1 %4242 }
0x1c12   :  { %5945 = vrsqrt.f32 %v4311_v23  ;;  %v4260_v52 = vsub.f32 %v4201_v49, %v4243_v39  ;;  %v4310_v27 = vadd.f32 1e-12, %v4268_v4  ;;  %v4267_v11 = vmax.f32 %v4261_v40, 0.0  ;;  %v4913_v39 = vld [vmem:[%s7581_s10 + $0x20] ss:$0 sm:$0xff]  ;;  %s4649_s10 = sld [smem:[#allocation2]] }
0x1c13   :  { %5947 = vrsqrt.f32 %v4313_v57 }
0x1c14   :  { %v4266_v3 = vmax.f32 %v4260_v52, 0.0  ;;  %v4309_v17 = vadd.f32 1e-12, %v4267_v11 }
0x1c16   :  { %v4308_v31 = vadd.f32 1e-12, %v4266_v3 }
0x1c18   :  { %5949 = vrsqrt.f32 %v4308_v31 }
0x1c19   :  { %5951 = vrsqrt.f32 %v4312_v2 }
0x1c1a   :  { %5953 = vrsqrt.f32 %v4310_v27 }
0x1c1b   :  { %5955 = vrsqrt.f32 %v4309_v17 }
0x1c1c   :  { %v4300_v37 = vpop.permute.xlu0 %4299 }
0x1c1d   :  { %v4307_v6 = vsub.f32 %v7455_v24, %v4300_v37 }
0x1c1e   :  { %v4295_v12 = vpop.permute.xlu1 %4294 }
0x1c1f   :  { %v5946_v13 = vpop.eup %5945  ;;  %v4306_v14 = vsub.f32 %v7460_v19, %v4295_v12 }
0x1c20   :  { %4337 = vperm.xlu1 %5799, %v5946_v13   ;;  %v5948_v25 = vpop.eup %5947  ;;  %v4290_v36 = vpop.permute.xlu0 %4289 }
0x1c21   :  { %v4305_v49 = vsub.f32 %v7442_v41, %v4290_v36 }
0x1c24   :  { %4347 = vperm.xlu1 %5799, %v5948_v25   ;;  %v4285_v10 = vpop.permute.xlu0 %4284 }
0x1c25   :  { %v5950_v34 = vpop.eup %5949  ;;  %v4304_v33 = vsub.f32 %v7445_v8, %v4285_v10 }
0x1c26   :  { %4322 = vperm.xlu0 %5800, %v5950_v34   ;;  %v5952_v32 = vpop.eup %5951 }
0x1c27   :  { %v5954_v48 = vpop.eup %5953 }
0x1c28   :  { %4342 = vperm.xlu1 %5799, %v5952_v32   ;;  %v5956_v51 = vpop.eup %5955  ;;  %v4280_v43 = vpop.permute.xlu0 %4279 }
0x1c29   :  { %v4303_v26 = vsub.f32 %v7434_v1, %v4280_v43  ;;  %v4376_v1 = vld [vmem:[%s7574_s3 + $0x30] sm:$0x3f]  ;;  %s4917_s3 = sld [smem:[#allocation2 + $0x1]] }
0x1c2a   :  { %4539 = vrot.lane.b32.xlu0 %v4451_v38, %s6006_s17 }
0x1c2c   :  { %4332 = vperm.xlu1 %5799, %v5954_v48   ;;  %v4275_v59 = vpop.permute.xlu0 %4274 }
0x1c2d   :  { %v4302_v19 = vsub.f32 %v7431_v62, %v4275_v59 }
0x1c2e   :  { %4550 = vrot.lane.b32.xlu0 %v4913_v39, %s6006_s17 }
0x1c30   :  { %4327 = vperm.xlu1 %5799, %v5956_v51  }
0x1c34   :  { %4543 = vrot.lane.b32.xlu1 %v4453_v45, %s6006_s17 }
0x1c38   :  { %4541 = vrot.lane.b32.xlu1 %v4452_v58, %s6006_s17 }
0x1c3c   :  { %4537 = vrot.lane.b32.xlu1 %v4450_v42, %s6006_s17 }
0x1c9b   :  { %v4338_v28 = vpop.permute.xlu1 %4337 }
0x1c9c   :  { %v4353_v18 = vmul.f32 %v4338_v28, %v4305_v49 }
0x1c9e   :  { %v4363_v41 = vmul.f32 %v4359_v47, %v4353_v18 }
0x1c9f   :  { %v4348_v46 = vpop.permute.xlu1 %4347 }
0x1ca0   :  { %v4355_v35 = vmul.f32 %v4348_v46, %v4307_v6  ;;  %v4373_v29 = vadd.f32 %v4369_v9, %v4363_v41 }
0x1ca1   :  { %v4323_v44 = vpop.permute.xlu0 %4322 }
0x1ca2   :  { %v4365_v21 = vmul.f32 %v4359_v47, %v4355_v35  ;;  %v4350_v7 = vmul.f32 %v4323_v44, %v4302_v19  ;;  %v4689_v35 = vstv %s4917_s3 }
0x1ca3   :  { %v4343_v16 = vpop.permute.xlu1 %4342  ;;  %vm4690_vm7 = vcmp.eq.s32.totalorder %v6422_v60, %v4689_v35 }
0x1ca4   :  { %v4375_v22 = vadd.f32 %v4369_v9, %v4365_v21  ;;  %v4354_v24 = vmul.f32 %v4343_v16, %v4306_v14  ;;  %v4360_v63 = vmul.f32 %v4359_v47, %v4350_v7  ;;  %v4918_v14 = vsel %vm4690_vm7, 1.0, %v6013_v50 }
0x1ca5   :  { %v4540_v3 = vpop.permute.xlu0 %4539  ;;  %v4694_v18 = vrot.slane %v4918_v14, 5 }
0x1ca6   :  { %v4364_v20 = vmul.f32 %v4359_v47, %v4354_v24  ;;  %5699 = vmatpush3.msra.mxu0 %v4375_v22  ;;  %v4370_v57 = vadd.f32 %v4369_v9, %v4360_v63 }
0x1ca7   :  { %v4333_v15 = vpop.permute.xlu1 %4332  ;;  %5700 = vmatprep.subr.mxu0 %v6013_v50 }
0x1ca8   :  { %v4374_v30 = vadd.f32 %v4369_v9, %v4364_v20  ;;  %v4352_v53 = vmul.f32 %v4333_v15, %v4304_v33 }
0x1ca9   :  { %v4551_v11 = vpop.permute.xlu0 %4550 }
0x1caa   :  { %v4362_v61 = vmul.f32 %v4359_v47, %v4352_v53  ;;  %5701 = vmatpush3.msra.mxu0 %v4374_v30 }
0x1cab   :  { %5702 = vmatprep.subr.mxu0 %v6013_v50  ;;  %v4328_v8 = vpop.permute.xlu1 %4327 }
0x1cac   :  { %v4372_v56 = vadd.f32 %v4369_v9, %v4362_v61  ;;  %v4351_v54 = vmul.f32 %v4328_v8, %v4303_v26  ;;  %5703 = vmatpush3.msra.mxu0 %v4373_v29 }
0x1cad   :  { %5704 = vmatprep.subr.mxu0 %v6013_v50 }
0x1cae   :  { %v4361_v23 = vmul.f32 %v4359_v47, %v4351_v54  ;;  %5705 = vmatpush3.msra.mxu0 %v4372_v56 }
0x1caf   :  { %5706 = vmatprep.subr.mxu0 %v6013_v50  ;;  %v4544_v52 = vpop.permute.xlu1 %4543 }
0x1cb0   :  { %v4371_v62 = vadd.f32 %v4369_v9, %v4361_v23  ;;  %v4650_v9 = vstv %s4649_s10 }
0x1cb1   :  { %vm4651_vm8 = vcmp.eq.s32.totalorder %v6422_v60, %v4650_v9 }
0x1cb2   :  { %5707 = vmatpush3.msra.mxu0 %v4371_v62  ;;  %v4916_v41 = vsel %vm4651_vm8, 1.0, %v6013_v50 }
0x1cb3   :  { %5708 = vmatprep.subr.mxu0 %v6013_v50  ;;  %v4542_v0 = vpop.permute.xlu1 %4541 }
0x1cb4   :  { %5709 = vmatpush3.msra.mxu0 %v4370_v57 }
0x1cb5   :  { %5711 = vmatmul.mubr.msk.f32.vlgmr.msra.gmra.mxu0 %vm1022_vm2, %v4376_v1  ;;  %5724 = vmatprep.subr.mxu0 %v6013_v50 }
0x1cb6   :  { %5732 = vmatprep.mubr.msk.f32.mxu0 %vm6014_vm4, %v6013_v50  ;;  %5725 = vmatpush3.msra.mxu0 %v4544_v52 }
0x1cb7   :  { %5726 = vmatprep.subr.mxu0 %v6013_v50  ;;  %v4538_v2 = vpop.permute.xlu1 %4537 }
0x1cb8   :  { %5727 = vmatpush3.msra.mxu0 %v4542_v0 }
0x1cb9   :  { %5728 = vmatprep.subr.mxu0 %v6013_v50 }
0x1cba   :  { %5729 = vmatpush3.msra.mxu0 %v4540_v3 }
0x1cbb   :  { %5730 = vmatprep.subr.mxu0 %v6013_v50 }
0x1cbc   :  { %5731 = vmatpush3.msra.mxu0 %v4538_v2 }
0x1d75   :  { %v4446_v55 = vpop.f32.mrf.mxu0 }
0x1d76   :  { %5722 = vmatmul.mubr.msk.f32.vlgmr.msra.gmra.mxu1 %vm306_vm14, %v4446_v55 }
0x1d77   :  { %v5712_v5 = vpop.f32.mrf.mxu0 }
0x1e36   :  { %v4528_v4 = vpop.f32.mrf.mxu1 }
0x1e37   :  { %v4529_v40 = vadd.f32 %v4913_v39, %v4528_v4 }
0x1e38   :  { %v5723_v31 = vpop.f32.mrf.mxu1 }
0x1e39   :  { %5957 = vtanh.f32 %v4529_v40 }
0x1e46   :  { %v5958_v27 = vpop.eup %5957 }
0x1e47   :  { %5733 = vmatmul.mubr.msk.f32.vlgmr.msra.gmra.mxu0 %vm306_vm14, %v5958_v27 }
0x1f07   :  { %v4622_v17 = vpop.f32.mrf.mxu0 }
0x1f08   :  { %v7550_v13 = vadd.f32 %v4622_v17, %v4551_v11 }
0x1f09   :  { %v5734_v25 = vpop.f32.mrf.mxu0 }
0x1f0a   :  { %v4627_v34 = vsel %vm4626_vm5, %v7550_v13, -inf  ;;  %v4665_v32 = vsel %vm4664_vm6, %v7550_v13, -inf  ;;  %v4696_v33 = vmul.f32 %v4694_v18, %v7550_v13  ;;  %v4654_v30 = vmul.f32 %v4916_v41, %v7550_v13 }
0x1f0b   :  { %v4628_v48 = vrot.slane %v4627_v34, 4  ;;  %v4666_v51 = vrot.slane %v4665_v32, 4 }
0x1f0c   :  { %v4698_v53 = vrot.slane %v4696_v33, 3  ;;  %v4655_v61 = vsel %vm4626_vm5, %v4654_v30, 0.0 }
0x1f0d   :  { %v4629_v45 = vmax.f32 %v4627_v34, %v4628_v48  ;;  %v4667_v58 = vmax.f32 %v4665_v32, %v4666_v51  ;;  %v4656_v63 = vrot.slane %v4655_v61, 4 }
0x1f0e   :  { %v4700_v8 = vsel %vm4626_vm5, %v4698_v53, 0.0 }
0x1f0f   :  { %v4630_v38 = vrot.slane %v4629_v45, 2  ;;  %v4668_v42 = vrot.slane %v4667_v58, 2  ;;  %v4701_v23 = vrot.slane %v4700_v8, 4  ;;  %v4657_v57 = vadd.f32 %v4656_v63, %v4655_v61 }
0x1f11   :  { %v4631_v37 = vmax.f32 %v4629_v45, %v4630_v38  ;;  %v4669_v36 = vmax.f32 %v4667_v58, %v4668_v42  ;;  %v4702_v1 = vadd.f32 %v4701_v23, %v4700_v8  ;;  %v4658_v39 = vrot.slane %v4657_v57, 2 }
0x1f13   :  { %v4632_v12 = vrot.slane %v4631_v37, 1  ;;  %v4670_v10 = vrot.slane %v4669_v36, 1  ;;  %v4703_v55 = vrot.slane %v4702_v1, 2  ;;  %v4659_v5 = vadd.f32 %v4658_v39, %v4657_v57 }
0x1f15   :  { %v4633_v28 = vmax.f32 %v4631_v37, %v4632_v12  ;;  %v4671_v43 = vmax.f32 %v4669_v36, %v4670_v10  ;;  %v4704_v52 = vadd.f32 %v4703_v55, %v4702_v1  ;;  %v4660_v2 = vrot.slane %v4659_v5, 1 }
0x1f17   :  { %v4634_v6 = vsub.f32 %v7550_v13, %v4633_v28  ;;  %v4672_v46 = vsub.f32 %v7550_v13, %v4671_v43  ;;  %v4705_v4 = vrot.slane %v4704_v52, 1  ;;  %v4661_v11 = vadd.f32 %v4660_v2, %v4659_v5 }
0x1f19   :  { %v4635_v49 = vmul.f32 1.442695, %v4634_v6  ;;  %v4673_v47 = vmul.f32 1.442695, %v4672_v46  ;;  %v4706_v25 = vadd.f32 %v4705_v4, %v4704_v52 }
0x1f1b   :  { %5959 = vpow2.f32 %v4635_v49 }
0x1f1c   :  { %5961 = vpow2.f32 %v4673_v47 }
0x1f28   :  { %v5960_v21 = vpop.eup %5959 }
0x1f29   :  { %v5962_v59 = vpop.eup %5961  ;;  %v4637_v16 = vsel %vm4626_vm5, %v5960_v21, 0.0 }
0x1f2a   :  { %v4638_v22 = vrot.slane %v4637_v16, 4  ;;  %v4676_v24 = vrot.slane %v5962_v59, 3 }
0x1f2c   :  { %v4639_v20 = vadd.f32 %v4638_v22, %v4637_v16  ;;  %v4678_v44 = vsel %vm4626_vm5, %v4676_v24, 0.0 }
0x1f2d   :  { %v4679_v15 = vrot.slane %v4678_v44, 4 }
0x1f2e   :  { %v4640_v19 = vrot.slane %v4639_v20, 2 }
0x1f2f   :  { %v4680_v26 = vadd.f32 %v4679_v15, %v4678_v44 }
0x1f30   :  { %v4641_v29 = vadd.f32 %v4640_v19, %v4639_v20 }
0x1f31   :  { %v4681_v60 = vrot.slane %v4680_v26, 2 }
0x1f32   :  { %v4642_v7 = vrot.slane %v4641_v29, 1 }
0x1f33   :  { %v4682_v56 = vadd.f32 %v4681_v60, %v4680_v26 }
0x1f34   :  { %v4643_v54 = vadd.f32 %v4642_v7, %v4641_v29 }
0x1f35   :  { %v4683_v50 = vrot.slane %v4682_v56, 1 }
0x1f36   :  { %5963 = vlog2.f32 %v4643_v54 }
0x1f37   :  { %v4684_v62 = vadd.f32 %v4683_v50, %v4682_v56 }
0x1f39   :  { %5965 = vlog2.f32 %v4684_v62 }
0x1f43   :  { %v5964_v0 = vpop.eup %5963 }
0x1f44   :  { %v4645_v3 = vmul.f32 0.6931472, %v5964_v0 }
0x1f46   :  { %v5966_v40 = vpop.eup %5965  ;;  %v4646_v31 = vadd.f32 %v4645_v3, %v4633_v28 }
0x1f47   :  { %v4686_v27 = vmul.f32 0.6931472, %v5966_v40 }
0x1f48   :  { %v4662_v34 = vsub.f32 %v4646_v31, %v4661_v11 }
0x1f49   :  { %v4687_v17 = vadd.f32 %v4686_v27, %v4671_v43 }
0x1f4b   :  { %v4707_v32 = vsub.f32 %v4687_v17, %v4706_v25 }
0x1f4d   :  { %v4708_v48 = vadd.f32 %v4707_v32, %v4662_v34 }
0x1f4f   :  { %v4709_v51 = vmul.f32 0.5, %v4708_v48 }
0x1f51   :  { %v4711_v45 = vsel %vm4710_vm9, %v7550_v13, %v4709_v51 }
0x1f52   :  { %v4713_v58 = vsel %vm4712_vm10, %v4711_v45, 0.0 }
0x1f53   :  { %4715 = vst.msk [vmem:[%s7582_s11] sm:$0xff] %vm4714_vm12, %v4713_v58 }
0x1f54   :  { %4720 = vsyncpa [#allocation3], 1 }

</bundles_post_ra>
